<compile_context>
chip_gen: v7x
topology: tpu7x:2x2x1
jax: 0.10.0
libtpu: 0.0.40
codegen_flags: <defaults>
</compile_context>

<pallas_src>
import functools

import jax
import jax.numpy as jnp
from jax.experimental import pallas as pl
from jax.experimental.pallas import tpu as pltpu


def basic_block_kernel(x_ref, w1_ref, b1_ref, w2_ref, b2_ref, out_ref, pad_ref):
    """One residual block for a (Nb, H, W, C) batch tile.

    x_ref   : (Nb, H, W, C)      f32  input (also the residual)
    w1_ref  : (9*C, C)           cdt  conv1 weights, BN1 scale folded, im2col layout
    b1_ref  : (1, C)             f32  BN1 shift
    w2_ref  : (9*C, C)           cdt  conv2 weights, BN2 scale folded, im2col layout
    b2_ref  : (1, C)             f32  BN2 shift
    out_ref : (Nb, H, W, C)      f32  output
    pad_ref : (Nb, H+2, W+2, C)  cdt  VMEM halo scratch (reused by both convs)
    """
    Nb, H, W, C = x_ref.shape
    cdt = pad_ref.dtype

    x = x_ref[...]                                            # f32 residual

    # Zero only the 1-pixel halo ring (the interior is always overwritten).
    # Done every grid step so it stays correct under megacore grid sharding.
    zrow = jnp.zeros((Nb, 1, W + 2, C), cdt)
    zcol = jnp.zeros((Nb, H, 1, C), cdt)
    pad_ref[:, 0:1, :, :] = zrow
    pad_ref[:, H + 1:H + 2, :, :] = zrow
    pad_ref[:, 1:H + 1, 0:1, :] = zcol
    pad_ref[:, 1:H + 1, W + 1:W + 2, :] = zcol

    # Interior of the padded tile = input (cast to MXU compute dtype).
    pad_ref[:, 1:H + 1, 1:W + 1, :] = x.astype(cdt)

    def conv3x3(w2d):
        # im2col: concatenate the 9 shifted taps along channels -> K = 9*C,
        # then a single tall MXU matmul with M = Nb*H*W, f32 accumulation.
        taps = [pad_ref[:, ky:ky + H, kx:kx + W, :]
                for ky in range(3) for kx in range(3)]
        patch = jnp.concatenate(taps, axis=-1).reshape(Nb * H * W, 9 * C)
        return jnp.dot(patch, w2d, preferred_element_type=jnp.float32)

    # conv1 (BN1 scale already in the weights) -> shift -> ReLU   (f32 epilogue)
    a1 = jnp.maximum(conv3x3(w1_ref[...]) + b1_ref[...], 0.0)     # (Nb*H*W, C)

    # Re-use the halo scratch for conv2's padded input (border is still zero).
    pad_ref[:, 1:H + 1, 1:W + 1, :] = a1.reshape(Nb, H, W, C).astype(cdt)

    # conv2 -> shift -> residual add -> ReLU (all f32)
    c2 = conv3x3(w2_ref[...]) + b2_ref[...]
    out_ref[...] = jnp.maximum(c2.reshape(Nb, H, W, C) + x, 0.0).astype(out_ref.dtype)


def _fold_bn_into_conv(w_oihw, gamma, beta, mean, var, eps, compute_dtype):
    """Fold BN scale into the conv weights; return im2col weights + f32 shift."""
    scale = gamma / jnp.sqrt(var + eps)                            # (Cout,)
    shift = (beta - mean * scale).astype(jnp.float32)              # (Cout,)
    w_hwio = jnp.transpose(w_oihw, (2, 3, 1, 0)).astype(jnp.float32)  # (3,3,Cin,Cout)
    w_hwio = w_hwio * scale[None, None, None, :]                   # absorb BN scale
    kh, kw, cin, cout = w_hwio.shape
    w2d = w_hwio.reshape(kh * kw * cin, cout).astype(compute_dtype)  # (9*Cin, Cout)
    return w2d, shift.reshape(1, cout)


def _default_block_n(n):
    """Largest divisor of n that is <= 8 while keeping >= 2 grid steps (v7x)."""
    cap = min(8, max(1, n // 2))
    for d in range(cap, 0, -1):
        if n % d == 0:
            return d
    return 1


@functools.partial(jax.jit, static_argnames=("eps", "compute_dtype", "block_n"))
def basic_block_forward_nhwc(x_nhwc, params, eps=1e-5,
                             compute_dtype=jnp.bfloat16, block_n=None):
    """NHWC entry point (no layout transposes). x_nhwc: (N, H, W, C) f32."""
    w1, g1, b1, m1, v1, w2, g2, b2, m2, v2 = params
    x = x_nhwc.astype(jnp.float32)
    N, H, W, C = x.shape
    nb = _default_block_n(N) if block_n is None else block_n
    assert N % nb == 0, (N, nb)

    w1_2d, sh1 = _fold_bn_into_conv(w1, g1, b1, m1, v1, eps, compute_dtype)
    w2_2d, sh2 = _fold_bn_into_conv(w2, g2, b2, m2, v2, eps, compute_dtype)

    return pl.pallas_call(
        basic_block_kernel,
        out_shape=jax.ShapeDtypeStruct((N, H, W, C), jnp.float32),
        grid=(N // nb,),
        in_specs=[
            pl.BlockSpec((nb, H, W, C), lambda n: (n, 0, 0, 0)),
            pl.BlockSpec((9 * C, C), lambda n: (0, 0)),
            pl.BlockSpec((1, C), lambda n: (0, 0)),
            pl.BlockSpec((9 * C, C), lambda n: (0, 0)),
            pl.BlockSpec((1, C), lambda n: (0, 0)),
        ],
        out_specs=pl.BlockSpec((nb, H, W, C), lambda n: (n, 0, 0, 0)),
        scratch_shapes=[pltpu.VMEM((nb, H + 2, W + 2, C), compute_dtype)],
        compiler_params=pltpu.CompilerParams(dimension_semantics=("parallel",)),
    )(x, w1_2d, sh1, w2_2d, sh2)


@functools.partial(jax.jit, static_argnames=("eps", "compute_dtype", "block_n"))
def basic_block_forward(x_nchw, params, eps=1e-5,
                        compute_dtype=jnp.bfloat16, block_n=None):
    """PyTorch-layout wrapper. x_nchw: (N, C, H, W) f32 -> (N, C, H, W) f32."""
    x = jnp.transpose(x_nchw, (0, 2, 3, 1))                   # NCHW -> NHWC
    out = basic_block_forward_nhwc(x, params, eps=eps,
                                   compute_dtype=compute_dtype, block_n=block_n)
    return jnp.transpose(out, (0, 3, 1, 2))                   # NHWC -> NCHW


def reference_forward(x, params, eps=1e-5):
    """Pure-JAX NCHW reference mirroring the PyTorch module (eval-mode BN)."""
    w1, g1, b1, m1, v1, w2, g2, b2, m2, v2 = params
    dn = ("NCHW", "OIHW", "NCHW")

    def bn(y, g, b, m, v):
        inv = g / jnp.sqrt(v + eps)
        return y * inv[None, :, None, None] + (b - m * inv)[None, :, None, None]

    out = jax.lax.conv_general_dilated(x, w1, (1, 1), ((1, 1), (1, 1)),
                                       dimension_numbers=dn,
                                       precision=jax.lax.Precision.HIGHEST)
    out = jnp.maximum(bn(out, g1, b1, m1, v1), 0.0)
    out = jax.lax.conv_general_dilated(out, w2, (1, 1), ((1, 1), (1, 1)),
                                       dimension_numbers=dn,
                                       precision=jax.lax.Precision.HIGHEST)
    out = bn(out, g2, b2, m2, v2)
    return jnp.maximum(out + x, 0.0)


if __name__ == "__main__":
    key = jax.random.PRNGKey(0)
    N, C, H, W = 2, 4, 16, 16          # inplanes == planes, stride=1, downsample=None
    ks = jax.random.split(key, 11)

    x = jax.random.normal(ks[0], (N, C, H, W), jnp.float32)

    w1 = 0.1 * jax.random.normal(ks[1], (C, C, 3, 3), jnp.float32)   # conv1 weight (OIHW)
    g1 = 1.0 + 0.1 * jax.random.normal(ks[2], (C,), jnp.float32)     # bn1 gamma
    b1 = 0.1 * jax.random.normal(ks[3], (C,), jnp.float32)           # bn1 beta
    m1 = 0.1 * jax.random.normal(ks[4], (C,), jnp.float32)           # bn1 running mean
    v1 = 0.5 + 0.5 * jnp.abs(jax.random.normal(ks[5], (C,), jnp.float32))  # bn1 running var

    w2 = 0.1 * jax.random.normal(ks[6], (C, C, 3, 3), jnp.float32)   # conv2 weight (OIHW)
    g2 = 1.0 + 0.1 * jax.random.normal(ks[7], (C,), jnp.float32)
    b2 = 0.1 * jax.random.normal(ks[8], (C,), jnp.float32)
    m2 = 0.1 * jax.random.normal(ks[9], (C,), jnp.float32)
    v2 = 0.5 + 0.5 * jnp.abs(jax.random.normal(ks[10], (C,), jnp.float32))

    params = (w1, g1, b1, m1, v1, w2, g2, b2, m2, v2)

    ref = reference_forward(x, params)

    # f32 compute path: validates forward-pass semantics tightly.
    out_f32 = jax.block_until_ready(
        basic_block_forward(x, params, compute_dtype=jnp.float32))
    assert out_f32.shape == (N, C, H, W), out_f32.shape
    err_f32 = float(jnp.max(jnp.abs(out_f32 - ref)))
    assert jnp.allclose(out_f32, ref, rtol=2e-3, atol=2e-3), f"f32 max_err={err_f32}"

    # bf16 MXU path (default): same math with bf16 matmul operands, f32 accumulation.
    out_bf16 = jax.block_until_ready(basic_block_forward(x, params))
    assert out_bf16.shape == (N, C, H, W), out_bf16.shape
    err_bf16 = float(jnp.max(jnp.abs(out_bf16 - ref)))
    assert jnp.allclose(out_bf16, ref, rtol=5e-2, atol=5e-2), f"bf16 max_err={err_bf16}"

    print("KERNEL_OK")
</pallas_src>

<mosaic_0001>
module attributes {stable_mosaic.version = 11 : i64} {
  func.func @basic_block_kernel(%arg0: i32, %arg1: memref<1x16x16x4xf32, #tpu.memory_space<vmem>>, %arg2: memref<36x4xf32, #tpu.memory_space<vmem>>, %arg3: memref<1x4xf32, #tpu.memory_space<vmem>>, %arg4: memref<36x4xf32, #tpu.memory_space<vmem>>, %arg5: memref<1x4xf32, #tpu.memory_space<vmem>>, %arg6: memref<1x16x16x4xf32, #tpu.memory_space<vmem>>, %arg7: memref<1x18x18x4xf32, #tpu.memory_space<vmem>>) attributes {dimension_semantics = [#tpu.dimension_semantics<parallel>], iteration_bounds = array<i64: 2>, scalar_prefetch = 0 : i64, scratch_operands = 1 : i64, tpu.core_type = #tpu.core_type<tc>, window_params = [{transform_indices = @transform_0, window_bounds = array<i64: 1, 16, 16, 4>}, {pipeline_mode = #tpu.pipeline_mode<synchronous>, transform_indices = @transform_1, window_bounds = array<i64: 36, 4>}, {pipeline_mode = #tpu.pipeline_mode<synchronous>, transform_indices = @transform_2, window_bounds = array<i64: 1, 4>}, {pipeline_mode = #tpu.pipeline_mode<synchronous>, transform_indices = @transform_3, window_bounds = array<i64: 36, 4>}, {pipeline_mode = #tpu.pipeline_mode<synchronous>, transform_indices = @transform_4, window_bounds = array<i64: 1, 4>}, {transform_indices = @transform_5, window_bounds = array<i64: 1, 16, 16, 4>}]} {
    %c0 = arith.constant 0 : index
    %c0_0 = arith.constant 0 : index
    %c0_1 = arith.constant 0 : index
    %c0_2 = arith.constant 0 : index
    %0 = vector.load %arg1[%c0, %c0_0, %c0_1, %c0_2] : memref<1x16x16x4xf32, #tpu.memory_space<vmem>>, vector<1x16x16x4xf32>
    %cst = arith.constant 0.000000e+00 : f32
    %1 = vector.broadcast %cst : f32 to vector<1x1x18x4xf32>
    %cst_3 = arith.constant 0.000000e+00 : f32
    %2 = vector.broadcast %cst_3 : f32 to vector<1x16x1x4xf32>
    %c0_4 = arith.constant 0 : index
    %c0_5 = arith.constant 0 : index
    %c0_6 = arith.constant 0 : index
    %c0_7 = arith.constant 0 : index
    %3 = vector.load %arg7[%c0_4, %c0_5, %c0_6, %c0_7] : memref<1x18x18x4xf32, #tpu.memory_space<vmem>>, vector<1x1x18x4xf32>
    tpu.vector_store %arg7[%c0_4, %c0_5, %c0_6, %c0_7], %1 {strides = array<i32>} : memref<1x18x18x4xf32, #tpu.memory_space<vmem>>, vector<1x1x18x4xf32>,
    %c0_8 = arith.constant 0 : index
    %c17 = arith.constant 17 : index
    %c0_9 = arith.constant 0 : index
    %c0_10 = arith.constant 0 : index
    %4 = vector.load %arg7[%c0_8, %c17, %c0_9, %c0_10] : memref<1x18x18x4xf32, #tpu.memory_space<vmem>>, vector<1x1x18x4xf32>
    tpu.vector_store %arg7[%c0_8, %c17, %c0_9, %c0_10], %1 {strides = array<i32>} : memref<1x18x18x4xf32, #tpu.memory_space<vmem>>, vector<1x1x18x4xf32>,
    %c0_11 = arith.constant 0 : index
    %c1 = arith.constant 1 : index
    %c0_12 = arith.constant 0 : index
    %c0_13 = arith.constant 0 : index
    %5 = vector.load %arg7[%c0_11, %c1, %c0_12, %c0_13] : memref<1x18x18x4xf32, #tpu.memory_space<vmem>>, vector<1x16x1x4xf32>
    tpu.vector_store %arg7[%c0_11, %c1, %c0_12, %c0_13], %2 {strides = array<i32>} : memref<1x18x18x4xf32, #tpu.memory_space<vmem>>, vector<1x16x1x4xf32>,
    %c0_14 = arith.constant 0 : index
    %c1_15 = arith.constant 1 : index
    %c17_16 = arith.constant 17 : index
    %c0_17 = arith.constant 0 : index
    %6 = vector.load %arg7[%c0_14, %c1_15, %c17_16, %c0_17] : memref<1x18x18x4xf32, #tpu.memory_space<vmem>>, vector<1x16x1x4xf32>
    tpu.vector_store %arg7[%c0_14, %c1_15, %c17_16, %c0_17], %2 {strides = array<i32>} : memref<1x18x18x4xf32, #tpu.memory_space<vmem>>, vector<1x16x1x4xf32>,
    %c0_18 = arith.constant 0 : index
    %c1_19 = arith.constant 1 : index
    %c1_20 = arith.constant 1 : index
    %c0_21 = arith.constant 0 : index
    %7 = vector.load %arg7[%c0_18, %c1_19, %c1_20, %c0_21] : memref<1x18x18x4xf32, #tpu.memory_space<vmem>>, vector<1x16x16x4xf32>
    tpu.vector_store %arg7[%c0_18, %c1_19, %c1_20, %c0_21], %0 {strides = array<i32>} : memref<1x18x18x4xf32, #tpu.memory_space<vmem>>, vector<1x16x16x4xf32>,
    %c0_22 = arith.constant 0 : index
    %c0_23 = arith.constant 0 : index
    %8 = vector.load %arg2[%c0_22, %c0_23] : memref<36x4xf32, #tpu.memory_space<vmem>>, vector<36x4xf32>
    %c0_24 = arith.constant 0 : index
    %c0_25 = arith.constant 0 : index
    %c0_26 = arith.constant 0 : index
    %c0_27 = arith.constant 0 : index
    %9 = vector.load %arg7[%c0_24, %c0_25, %c0_26, %c0_27] : memref<1x18x18x4xf32, #tpu.memory_space<vmem>>, vector<1x16x16x4xf32>
    %c0_28 = arith.constant 0 : index
    %c0_29 = arith.constant 0 : index
    %c1_30 = arith.constant 1 : index
    %c0_31 = arith.constant 0 : index
    %10 = vector.load %arg7[%c0_28, %c0_29, %c1_30, %c0_31] : memref<1x18x18x4xf32, #tpu.memory_space<vmem>>, vector<1x16x16x4xf32>
    %c0_32 = arith.constant 0 : index
    %c0_33 = arith.constant 0 : index
    %c2 = arith.constant 2 : index
    %c0_34 = arith.constant 0 : index
    %11 = vector.load %arg7[%c0_32, %c0_33, %c2, %c0_34] : memref<1x18x18x4xf32, #tpu.memory_space<vmem>>, vector<1x16x16x4xf32>
    %c0_35 = arith.constant 0 : index
    %c1_36 = arith.constant 1 : index
    %c0_37 = arith.constant 0 : index
    %c0_38 = arith.constant 0 : index
    %12 = vector.load %arg7[%c0_35, %c1_36, %c0_37, %c0_38] : memref<1x18x18x4xf32, #tpu.memory_space<vmem>>, vector<1x16x16x4xf32>
    %c0_39 = arith.constant 0 : index
    %c1_40 = arith.constant 1 : index
    %c1_41 = arith.constant 1 : index
    %c0_42 = arith.constant 0 : index
    %13 = vector.load %arg7[%c0_39, %c1_40, %c1_41, %c0_42] : memref<1x18x18x4xf32, #tpu.memory_space<vmem>>, vector<1x16x16x4xf32>
    %c0_43 = arith.constant 0 : index
    %c1_44 = arith.constant 1 : index
    %c2_45 = arith.constant 2 : index
    %c0_46 = arith.constant 0 : index
    %14 = vector.load %arg7[%c0_43, %c1_44, %c2_45, %c0_46] : memref<1x18x18x4xf32, #tpu.memory_space<vmem>>, vector<1x16x16x4xf32>
    %c0_47 = arith.constant 0 : index
    %c2_48 = arith.constant 2 : index
    %c0_49 = arith.constant 0 : index
    %c0_50 = arith.constant 0 : index
    %15 = vector.load %arg7[%c0_47, %c2_48, %c0_49, %c0_50] : memref<1x18x18x4xf32, #tpu.memory_space<vmem>>, vector<1x16x16x4xf32>
    %c0_51 = arith.constant 0 : index
    %c2_52 = arith.constant 2 : index
    %c1_53 = arith.constant 1 : index
    %c0_54 = arith.constant 0 : index
    %16 = vector.load %arg7[%c0_51, %c2_52, %c1_53, %c0_54] : memref<1x18x18x4xf32, #tpu.memory_space<vmem>>, vector<1x16x16x4xf32>
    %c0_55 = arith.constant 0 : index
    %c2_56 = arith.constant 2 : index
    %c2_57 = arith.constant 2 : index
    %c0_58 = arith.constant 0 : index
    %17 = vector.load %arg7[%c0_55, %c2_56, %c2_57, %c0_58] : memref<1x18x18x4xf32, #tpu.memory_space<vmem>>, vector<1x16x16x4xf32>
    %18 = tpu.concatenate %9, %10, %11, %12, %13, %14, %15, %16, %17 in 3 : vector<1x16x16x4xf32>, vector<1x16x16x4xf32>, vector<1x16x16x4xf32>, vector<1x16x16x4xf32>, vector<1x16x16x4xf32>, vector<1x16x16x4xf32>, vector<1x16x16x4xf32>, vector<1x16x16x4xf32>, vector<1x16x16x4xf32> -> vector<1x16x16x36xf32>
    %19 = vector.shape_cast %18 : vector<1x16x16x36xf32> to vector<256x36xf32>
    %cst_59 = arith.constant dense<0.000000e+00> : vector<256x4xf32>
    %20 = tpu.matmul %19, %8, %cst_59 {dimension_numbers = #tpu.dot_dimension_numbers<[1], [0], [0], [1], [0, 0, 1, 1], [], []>} : vector<256x36xf32>, vector<36x4xf32>, vector<256x4xf32> -> vector<256x4xf32>
    %c0_60 = arith.constant 0 : index
    %c0_61 = arith.constant 0 : index
    %21 = vector.load %arg3[%c0_60, %c0_61] : memref<1x4xf32, #tpu.memory_space<vmem>>, vector<1x4xf32>
    %22 = vector.broadcast %21 : vector<1x4xf32> to vector<256x4xf32>
    %23 = arith.addf %20, %22 : vector<256x4xf32>
    %cst_62 = arith.constant 0.000000e+00 : f32
    %24 = vector.broadcast %cst_62 : f32 to vector<256x4xf32>
    %25 = arith.maximumf %23, %24 : vector<256x4xf32>
    %26 = vector.shape_cast %25 : vector<256x4xf32> to vector<1x16x16x4xf32>
    %c0_63 = arith.constant 0 : index
    %c1_64 = arith.constant 1 : index
    %c1_65 = arith.constant 1 : index
    %c0_66 = arith.constant 0 : index
    %27 = vector.load %arg7[%c0_63, %c1_64, %c1_65, %c0_66] : memref<1x18x18x4xf32, #tpu.memory_space<vmem>>, vector<1x16x16x4xf32>
    tpu.vector_store %arg7[%c0_63, %c1_64, %c1_65, %c0_66], %26 {strides = array<i32>} : memref<1x18x18x4xf32, #tpu.memory_space<vmem>>, vector<1x16x16x4xf32>,
    %c0_67 = arith.constant 0 : index
    %c0_68 = arith.constant 0 : index
    %28 = vector.load %arg4[%c0_67, %c0_68] : memref<36x4xf32, #tpu.memory_space<vmem>>, vector<36x4xf32>
    %c0_69 = arith.constant 0 : index
    %c0_70 = arith.constant 0 : index
    %c0_71 = arith.constant 0 : index
    %c0_72 = arith.constant 0 : index
    %29 = vector.load %arg7[%c0_69, %c0_70, %c0_71, %c0_72] : memref<1x18x18x4xf32, #tpu.memory_space<vmem>>, vector<1x16x16x4xf32>
    %c0_73 = arith.constant 0 : index
    %c0_74 = arith.constant 0 : index
    %c1_75 = arith.constant 1 : index
    %c0_76 = arith.constant 0 : index
    %30 = vector.load %arg7[%c0_73, %c0_74, %c1_75, %c0_76] : memref<1x18x18x4xf32, #tpu.memory_space<vmem>>, vector<1x16x16x4xf32>
    %c0_77 = arith.constant 0 : index
    %c0_78 = arith.constant 0 : index
    %c2_79 = arith.constant 2 : index
    %c0_80 = arith.constant 0 : index
    %31 = vector.load %arg7[%c0_77, %c0_78, %c2_79, %c0_80] : memref<1x18x18x4xf32, #tpu.memory_space<vmem>>, vector<1x16x16x4xf32>
    %c0_81 = arith.constant 0 : index
    %c1_82 = arith.constant 1 : index
    %c0_83 = arith.constant 0 : index
    %c0_84 = arith.constant 0 : index
    %32 = vector.load %arg7[%c0_81, %c1_82, %c0_83, %c0_84] : memref<1x18x18x4xf32, #tpu.memory_space<vmem>>, vector<1x16x16x4xf32>
    %c0_85 = arith.constant 0 : index
    %c1_86 = arith.constant 1 : index
    %c1_87 = arith.constant 1 : index
    %c0_88 = arith.constant 0 : index
    %33 = vector.load %arg7[%c0_85, %c1_86, %c1_87, %c0_88] : memref<1x18x18x4xf32, #tpu.memory_space<vmem>>, vector<1x16x16x4xf32>
    %c0_89 = arith.constant 0 : index
    %c1_90 = arith.constant 1 : index
    %c2_91 = arith.constant 2 : index
    %c0_92 = arith.constant 0 : index
    %34 = vector.load %arg7[%c0_89, %c1_90, %c2_91, %c0_92] : memref<1x18x18x4xf32, #tpu.memory_space<vmem>>, vector<1x16x16x4xf32>
    %c0_93 = arith.constant 0 : index
    %c2_94 = arith.constant 2 : index
    %c0_95 = arith.constant 0 : index
    %c0_96 = arith.constant 0 : index
    %35 = vector.load %arg7[%c0_93, %c2_94, %c0_95, %c0_96] : memref<1x18x18x4xf32, #tpu.memory_space<vmem>>, vector<1x16x16x4xf32>
    %c0_97 = arith.constant 0 : index
    %c2_98 = arith.constant 2 : index
    %c1_99 = arith.constant 1 : index
    %c0_100 = arith.constant 0 : index
    %36 = vector.load %arg7[%c0_97, %c2_98, %c1_99, %c0_100] : memref<1x18x18x4xf32, #tpu.memory_space<vmem>>, vector<1x16x16x4xf32>
    %c0_101 = arith.constant 0 : index
    %c2_102 = arith.constant 2 : index
    %c2_103 = arith.constant 2 : index
    %c0_104 = arith.constant 0 : index
    %37 = vector.load %arg7[%c0_101, %c2_102, %c2_103, %c0_104] : memref<1x18x18x4xf32, #tpu.memory_space<vmem>>, vector<1x16x16x4xf32>
    %38 = tpu.concatenate %29, %30, %31, %32, %33, %34, %35, %36, %37 in 3 : vector<1x16x16x4xf32>, vector<1x16x16x4xf32>, vector<1x16x16x4xf32>, vector<1x16x16x4xf32>, vector<1x16x16x4xf32>, vector<1x16x16x4xf32>, vector<1x16x16x4xf32>, vector<1x16x16x4xf32>, vector<1x16x16x4xf32> -> vector<1x16x16x36xf32>
    %39 = vector.shape_cast %38 : vector<1x16x16x36xf32> to vector<256x36xf32>
    %cst_105 = arith.constant dense<0.000000e+00> : vector<256x4xf32>
    %40 = tpu.matmul %39, %28, %cst_105 {dimension_numbers = #tpu.dot_dimension_numbers<[1], [0], [0], [1], [0, 0, 1, 1], [], []>} : vector<256x36xf32>, vector<36x4xf32>, vector<256x4xf32> -> vector<256x4xf32>
    %c0_106 = arith.constant 0 : index
    %c0_107 = arith.constant 0 : index
    %41 = vector.load %arg5[%c0_106, %c0_107] : memref<1x4xf32, #tpu.memory_space<vmem>>, vector<1x4xf32>
    %42 = vector.broadcast %41 : vector<1x4xf32> to vector<256x4xf32>
    %43 = arith.addf %40, %42 : vector<256x4xf32>
    %44 = vector.shape_cast %43 : vector<256x4xf32> to vector<1x16x16x4xf32>
    %45 = arith.addf %44, %0 : vector<1x16x16x4xf32>
    %cst_108 = arith.constant 0.000000e+00 : f32
    %46 = vector.broadcast %cst_108 : f32 to vector<1x16x16x4xf32>
    %47 = arith.maximumf %45, %46 : vector<1x16x16x4xf32>
    %c0_109 = arith.constant 0 : index
    %c0_110 = arith.constant 0 : index
    %c0_111 = arith.constant 0 : index
    %c0_112 = arith.constant 0 : index
    %48 = vector.load %arg6[%c0_109, %c0_110, %c0_111, %c0_112] : memref<1x16x16x4xf32, #tpu.memory_space<vmem>>, vector<1x16x16x4xf32>
    tpu.vector_store %arg6[%c0_109, %c0_110, %c0_111, %c0_112], %47 {strides = array<i32>} : memref<1x16x16x4xf32, #tpu.memory_space<vmem>>, vector<1x16x16x4xf32>,
    return
  }
  func.func @transform_0(%arg0: i32) -> (i32, i32, i32, i32) {
    %c0_i32 = arith.constant 0 : i32
    %c0_i32_0 = arith.constant 0 : i32
    %c0_i32_1 = arith.constant 0 : i32
    %c0_i32_2 = arith.constant 0 : i32
    return %arg0, %c0_i32, %c0_i32_0, %c0_i32_1 : i32, i32, i32, i32
  }
  func.func @transform_1(%arg0: i32) -> (i32, i32) {
    %c0_i32 = arith.constant 0 : i32
    %c0_i32_0 = arith.constant 0 : i32
    %c0_i32_1 = arith.constant 0 : i32
    return %c0_i32, %c0_i32_0 : i32, i32
  }
  func.func @transform_2(%arg0: i32) -> (i32, i32) {
    %c0_i32 = arith.constant 0 : i32
    %c0_i32_0 = arith.constant 0 : i32
    %c0_i32_1 = arith.constant 0 : i32
    return %c0_i32, %c0_i32_0 : i32, i32
  }
  func.func @transform_3(%arg0: i32) -> (i32, i32) {
    %c0_i32 = arith.constant 0 : i32
    %c0_i32_0 = arith.constant 0 : i32
    %c0_i32_1 = arith.constant 0 : i32
    return %c0_i32, %c0_i32_0 : i32, i32
  }
  func.func @transform_4(%arg0: i32) -> (i32, i32) {
    %c0_i32 = arith.constant 0 : i32
    %c0_i32_0 = arith.constant 0 : i32
    %c0_i32_1 = arith.constant 0 : i32
    return %c0_i32, %c0_i32_0 : i32, i32
  }
  func.func @transform_5(%arg0: i32) -> (i32, i32, i32, i32) {
    %c0_i32 = arith.constant 0 : i32
    %c0_i32_0 = arith.constant 0 : i32
    %c0_i32_1 = arith.constant 0 : i32
    %c0_i32_2 = arith.constant 0 : i32
    return %arg0, %c0_i32, %c0_i32_0, %c0_i32_1 : i32, i32, i32, i32
  }
}

</mosaic_0001>

<bundles_post_ra>
// kernel: basic_block_forward_nhwc.1
= control target key start
LH: loop header
LB: loop body
LE: loop exit
PB: predicated region body
PF: predicated region fallthrough
CT: control target
= control target key end

     0   :  { %s4748_s18 = smov 0   ;;  %s7805_s0 = inlined_call_operand.vmem [shape: f32[2,16,16,4], index: 0, kind: input, shape index: {}]   ;;  %s7806_s1 = inlined_call_operand.vmem [shape: f32[36,4], index: 1, kind: input, shape index: {}]   ;;  %s7807_s2 = inlined_call_operand.vmem [shape: f32[1,4], index: 2, kind: input, shape index: {}]   ;;  %s7808_s3 = inlined_call_operand.vmem [shape: f32[36,4], index: 3, kind: input, shape index: {}]   ;;  %s7809_s4 = inlined_call_operand.vmem [shape: f32[1,4], index: 4, kind: input, shape index: {}]   ;;  %s7810_s5 = inlined_call_operand.vmem [shape: f32[2,16,16,4], index: 5, kind: output, shape index: {}]  }
   0x1 LB: > { %s4365_s19 = sadd.s32 4294967295, %s4707_s18   ;;  %p4369_p0 = scmp.ge.s32.totalorder %s4707_s18, 1  ;;  %s4707_s18 = sphi %s4748_s18, %s15_s18  }
   0x2   : > { %p187_p1 = scmp.lt.s32.totalorder %s4707_s18, 3 }
   0x4   : > { %p188_p2 = pnand %p4369_p0, %p187_p1 }
   0x6   : > { %191 = sbr.rel (%p188_p2) target bundleno = 1668 (0x684), region = 40 }
   0xd   : > { %vm257_vm0 = vcmask 31744   ;;  %vm260_vm1 = vcmask 25600   ;;  %p4758_p3 = scmp.lt.s32.totalorder %s4365_s19, 1  ;;  %vm267_vm2 = vcmask 24576   ;;  %v4709_v0 = vmov 0.0   ;;  %s4710_s25 = smov 4  }
   0xe   : > { %258 = vst.msk [vmem:[#allocation2] sm:$0xff] %vm257_vm0, %v4709_v0  ;;  %259 = vst.msk [vmem:[#allocation2 + $0x8] sm:$0xff] %vm257_vm0, %v4709_v0  ;;  %s4711_s26 = smov 8   ;;  %s4712_s27 = smov 12   ;;  %vm2017_vm3 = vcmask 1043456   ;;  %vm1682_vm4 = vcmask 64512  }
   0xf   : > { %263 = vst.msk [vmem:[#allocation2 + $0x198] sm:$0xff] %vm257_vm0, %v4709_v0  ;;  %264 = vst.msk [vmem:[#allocation2 + $0x1a0] sm:$0xff] %vm257_vm0, %v4709_v0  ;;  %s8446_s19 = smov (!%p4758_p3, %s4365_s19), 1  ;;  %s4713_s28 = smov 16   ;;  %vm1715_vm5 = vcmask 97280   ;;  %vm1748_vm6 = vcmask 130048  }
  0x10   : > { %261 = vst.msk [vmem:[#allocation2 + $0x10] sm:$0x3] %vm260_vm1, %v4709_v0  ;;  %265 = vst.msk [vmem:[#allocation2 + $0x1a8] sm:$0x3] %vm260_vm1, %v4709_v0  ;;  %s4444_s21 = sshll.u32 %s8446_s19, 8  ;;  %s4714_s29 = smov 20  }
  0x11   : > { %284 = vst.msk [vmem:[#allocation2 + $0x29] sm:$0x1] %vm267_vm2, %v4709_v0  ;;  %268 = vst.msk [vmem:[#allocation2 + $0x18] sm:$0x1] %vm267_vm2, %v4709_v0  ;;  %s4810_s24 = scalar_lea.vmem %s7805_s0, %s4444_s21  ;;  %s4715_s30 = smov 24   ;;  %vm1781_vm7 = vcmask 162816  }
  0x12   : > { %269 = vst.msk [vmem:[#allocation2 + $0x30] sm:$0x1] %vm267_vm2, %v4709_v0  ;;  %270 = vst.msk [vmem:[#allocation2 + $0x48] sm:$0x1] %vm267_vm2, %v4709_v0  ;;  %v4813_v1 = vld [vmem:[%s4810_s24] sm:$0xff]  ;;  %v4816_v2 = vld [vmem:[%s4810_s24 + $0x10] sm:$0xff]  ;;  %s7557_s12 = scalar_lea.vmem %s7810_s5, %s4444_s21 }
  0x13   : > { %271 = vst.msk [vmem:[#allocation2 + $0x60] sm:$0x1] %vm267_vm2, %v4709_v0  ;;  %272 = vst.msk [vmem:[#allocation2 + $0x78] sm:$0x1] %vm267_vm2, %v4709_v0  ;;  %v4819_v3 = vld [vmem:[%s4810_s24 + $0x8] sm:$0xff]  ;;  %v4828_v4 = vld [vmem:[%s4810_s24 + $0x20] sm:$0xff] }
  0x14   : > { %273 = vst.msk [vmem:[#allocation2 + $0x90] sm:$0x1] %vm267_vm2, %v4709_v0  ;;  %274 = vst.msk [vmem:[#allocation2 + $0xa8] sm:$0x1] %vm267_vm2, %v4709_v0  ;;  %v4831_v5 = vld [vmem:[%s4810_s24 + $0x18] sm:$0xff]  ;;  %v4834_v6 = vld [vmem:[%s4810_s24 + $0x30] sm:$0xff] }
  0x15   : > { %275 = vst.msk [vmem:[#allocation2 + $0xc0] sm:$0x1] %vm267_vm2, %v4709_v0  ;;  %276 = vst.msk [vmem:[#allocation2 + $0xd8] sm:$0x1] %vm267_vm2, %v4709_v0  ;;  %v369_v7 = vld [vmem:[#allocation2 + $0x1] sm:$0xff]  ;;  %v4852_v11 = vld [vmem:[%s4810_s24 + $0x38] sm:$0xff] }
  0x16   : > { %277 = vst.msk [vmem:[#allocation2 + $0xf0] sm:$0x1] %vm267_vm2, %v4709_v0  ;;  %278 = vst.msk [vmem:[#allocation2 + $0x108] sm:$0x1] %vm267_vm2, %v4709_v0  ;;  %v4843_v9 = vld [vmem:[%s4810_s24 + $0x28] sm:$0xff]  ;;  %658 = vrot.lane.b32.xlu0 %v369_v7, %s4710_s25  ;;  %v4849_v10 = vld [vmem:[%s4810_s24 + $0x40] sm:$0xff] }
  0x17   : > { %279 = vst.msk [vmem:[#allocation2 + $0x120] sm:$0x1] %vm267_vm2, %v4709_v0  ;;  %280 = vst.msk [vmem:[#allocation2 + $0x138] sm:$0x1] %vm267_vm2, %v4709_v0  ;;  %v370_v8 = vld [vmem:[#allocation2 + $0x9] sm:$0xff]  ;;  %v4867_v14 = vld [vmem:[%s4810_s24 + $0x60] sm:$0xff] }
  0x18   : > { %281 = vst.msk [vmem:[#allocation2 + $0x150] sm:$0x1] %vm267_vm2, %v4709_v0  ;;  %282 = vst.msk [vmem:[#allocation2 + $0x168] sm:$0x1] %vm267_vm2, %v4709_v0  ;;  %v4855_v12 = vld [vmem:[%s4810_s24 + $0x50] sm:$0xff]  ;;  %v4864_v13 = vld [vmem:[%s4810_s24 + $0x48] sm:$0xff] }
  0x19   : > { %283 = vst.msk [vmem:[#allocation2 + $0x180] sm:$0x1] %vm267_vm2, %v4709_v0  ;;  %285 = vst.msk [vmem:[#allocation2 + $0x41] sm:$0x1] %vm267_vm2, %v4709_v0  ;;  %v4870_v15 = vld [vmem:[%s4810_s24 + $0x58] sm:$0xff]  ;;  %v4879_v16 = vld [vmem:[%s4810_s24 + $0x70] sm:$0xff] }
  0x1a   : > { %286 = vst.msk [vmem:[#allocation2 + $0x59] sm:$0x1] %vm267_vm2, %v4709_v0  ;;  %287 = vst.msk [vmem:[#allocation2 + $0x71] sm:$0x1] %vm267_vm2, %v4709_v0  ;;  %v4882_v17 = vld [vmem:[%s4810_s24 + $0x68] sm:$0xff]  ;;  %v4885_v18 = vld [vmem:[%s4810_s24 + $0x80] sm:$0xff]  ;;  %660 = vrot.lane.b32.xlu0 %v370_v8, %s4710_s25 }
  0x1b   : > { %288 = vst.msk [vmem:[#allocation2 + $0x89] sm:$0x1] %vm267_vm2, %v4709_v0  ;;  %289 = vst.msk [vmem:[#allocation2 + $0xa1] sm:$0x1] %vm267_vm2, %v4709_v0  ;;  %v4894_v19 = vld [vmem:[%s4810_s24 + $0x78] sm:$0xff]  ;;  %v4897_v20 = vld [vmem:[%s4810_s24 + $0x90] sm:$0xff] }
  0x1c   : > { %290 = vst.msk [vmem:[#allocation2 + $0xb9] sm:$0x1] %vm267_vm2, %v4709_v0  ;;  %291 = vst.msk [vmem:[#allocation2 + $0xd1] sm:$0x1] %vm267_vm2, %v4709_v0  ;;  %v4900_v21 = vld [vmem:[%s4810_s24 + $0x88] sm:$0xff]  ;;  %v4910_v22 = vld [vmem:[%s4810_s24 + $0xa0] sm:$0xff] }
  0x1d   : > { %292 = vst.msk [vmem:[#allocation2 + $0xe9] sm:$0x1] %vm267_vm2, %v4709_v0  ;;  %293 = vst.msk [vmem:[#allocation2 + $0x101] sm:$0x1] %vm267_vm2, %v4709_v0  ;;  %v4913_v23 = vld [vmem:[%s4810_s24 + $0x98] sm:$0xff]  ;;  %v4916_v24 = vld [vmem:[%s4810_s24 + $0xb0] sm:$0xff] }
  0x1e   : > { %294 = vst.msk [vmem:[#allocation2 + $0x119] sm:$0x1] %vm267_vm2, %v4709_v0  ;;  %295 = vst.msk [vmem:[#allocation2 + $0x131] sm:$0x1] %vm267_vm2, %v4709_v0  ;;  %v4933_v28 = vld [vmem:[%s4810_s24 + $0xa8] sm:$0xff]  ;;  %v4936_v29 = vld [vmem:[%s4810_s24 + $0xc0] sm:$0xff] }
  0x1f   : > { %296 = vst.msk [vmem:[#allocation2 + $0x149] sm:$0x1] %vm267_vm2, %v4709_v0  ;;  %297 = vst.msk [vmem:[#allocation2 + $0x161] sm:$0x1] %vm267_vm2, %v4709_v0  ;;  %v4955_v33 = vld [vmem:[%s4810_s24 + $0xb8] sm:$0xff]  ;;  %v4958_v34 = vld [vmem:[%s4810_s24 + $0xd0] sm:$0xff] }
  0x20   : > { %298 = vst.msk [vmem:[#allocation2 + $0x179] sm:$0x1] %vm267_vm2, %v4709_v0  ;;  %299 = vst.msk [vmem:[#allocation2 + $0x191] sm:$0x1] %vm267_vm2, %v4709_v0  ;;  %v4961_v35 = vld [vmem:[%s4810_s24 + $0xc8] sm:$0xff]  ;;  %v4972_v36 = vld [vmem:[%s4810_s24 + $0xe0] sm:$0xff] }
  0x21   : > { %7885 = vst [vmem:[#allocation3_spill] sm:$0xff] %v4813_v1  ;;  %7886 = vst [vmem:[#allocation4_spill] sm:$0xff] %v4816_v2  ;;  %v4975_v37 = vld [vmem:[%s4810_s24 + $0xd8] sm:$0xff]  ;;  %v4984_v39 = vld [vmem:[%s4810_s24 + $0xe8] sm:$0xff]  ;;  %s4716_s14 = smov 28   ;;  %s4717_s17 = smov 32  }
  0x22   : > { %7887 = vst [vmem:[#allocation5_spill] sm:$0xff] %v4819_v3  ;;  %300 = vst.msk [vmem:[#allocation2 + $0x19] sm:$0xff] %vm257_vm0, %v4813_v1  ;;  %v5061_v58 = vld [vmem:[%s4810_s24 + $0xf0] sm:$0xff]  ;;  %v5078_v62 = vld [vmem:[%s4810_s24 + $0xf8] sm:$0xff]  ;;  %vm1814_vm8 = vcmask 195584   ;;  %vm1847_vm9 = vcmask 228352  }
  0x23   : > { %302 = vst.msk [vmem:[#allocation2 + $0x31] sm:$0xff] %vm257_vm0, %v4816_v2  ;;  %301 = vst.msk [vmem:[#allocation2 + $0x21] sm:$0xff] %vm257_vm0, %v4819_v3  ;;  %v401_v0 = vld [vmem:[#allocation2 + $0x2] sm:$0xff]  ;;  %vm1880_vm10 = vcmask 261120   ;;  %vm1920_vm11 = vcmask 293888  }
  0x24   : > { %7888 = vst [vmem:[#allocation6_spill] sm:$0xff] %v4828_v4  ;;  %7889 = vst [vmem:[#allocation7_spill] sm:$0xff] %v4831_v5 }
  0x25   : > { %7890 = vst [vmem:[#allocation8_spill] sm:$0xff] %v4834_v6  ;;  %304 = vst.msk [vmem:[#allocation2 + $0x49] sm:$0xff] %vm257_vm0, %v4828_v4 }
  0x26   : > { %303 = vst.msk [vmem:[#allocation2 + $0x39] sm:$0xff] %vm257_vm0, %v4831_v5  ;;  %306 = vst.msk [vmem:[#allocation2 + $0x61] sm:$0xff] %vm257_vm0, %v4834_v6 }
  0x27   : > { %7891 = vst [vmem:[#allocation9_spill] sm:$0xff] %v4843_v9  ;;  %305 = vst.msk [vmem:[#allocation2 + $0x51] sm:$0xff] %vm257_vm0, %v4843_v9 }
  0x28   : > { %7892 = vst [vmem:[#allocation10_spill] sm:$0xff] %v4849_v10  ;;  %7893 = vst [vmem:[#allocation11_spill] sm:$0xff] %v4852_v11 }
  0x29   : > { %7894 = vst [vmem:[#allocation12_spill] sm:$0xff] %v4855_v12  ;;  %308 = vst.msk [vmem:[#allocation2 + $0x79] sm:$0xff] %vm257_vm0, %v4849_v10  ;;  %v4918_v25 = vld [vmem:[#allocation2 + $0x19] sm:$0xff] }
  0x2a   : > { %307 = vst.msk [vmem:[#allocation2 + $0x69] sm:$0xff] %vm257_vm0, %v4852_v11  ;;  %310 = vst.msk [vmem:[#allocation2 + $0x91] sm:$0xff] %vm257_vm0, %v4855_v12  ;;  %v4920_v26 = vld [vmem:[#allocation2 + $0x31] sm:$0xff]  ;;  %662 = vrot.lane.b32.xlu1 %v4918_v25, %s4710_s25  ;;  %v4930_v27 = vld [vmem:[#allocation2 + $0x21] sm:$0xff] }
  0x2b   : > { %7895 = vst [vmem:[#allocation13_spill] sm:$0xff] %v4864_v13  ;;  %7896 = vst [vmem:[#allocation14_spill] sm:$0xff] %v4867_v14  ;;  %666 = vrot.lane.b32.xlu0 %v4920_v26, %s4710_s25  ;;  %v5093_v8 = vld [vmem:[#allocation2 + $0x1a] sm:$0xff] }
  0x2c   : > { %7897 = vst [vmem:[#allocation15_spill] sm:$0xff] %v4870_v15  ;;  %309 = vst.msk [vmem:[#allocation2 + $0x81] sm:$0xff] %vm257_vm0, %v4864_v13  ;;  %v4944_v30 = vld [vmem:[#allocation2 + $0x49] sm:$0xff] }
  0x2d   : > { %312 = vst.msk [vmem:[#allocation2 + $0xa9] sm:$0xff] %vm257_vm0, %v4867_v14  ;;  %311 = vst.msk [vmem:[#allocation2 + $0x99] sm:$0xff] %vm257_vm0, %v4870_v15  ;;  %v4948_v31 = vld [vmem:[#allocation2 + $0x39] sm:$0xff]  ;;  %v4952_v32 = vld [vmem:[#allocation2 + $0x61] sm:$0xff] }
  0x2e   : > { %7898 = vst [vmem:[#allocation16_spill] sm:$0xff] %v4879_v16  ;;  %7899 = vst [vmem:[#allocation17_spill] sm:$0xff] %v4882_v17  ;;  %664 = vrot.lane.b32.xlu1 %v4930_v27, %s4710_s25  ;;  %v4977_v38 = vld [vmem:[#allocation2 + $0x51] sm:$0xff] }
  0x2f   : > { %7900 = vst [vmem:[#allocation18_spill] sm:$0xff] %v4885_v18  ;;  %314 = vst.msk [vmem:[#allocation2 + $0xc1] sm:$0xff] %vm257_vm0, %v4879_v16  ;;  %670 = vrot.lane.b32.xlu0 %v4944_v30, %s4710_s25 }
  0x30   : > { %313 = vst.msk [vmem:[#allocation2 + $0xb1] sm:$0xff] %vm257_vm0, %v4882_v17  ;;  %316 = vst.msk [vmem:[#allocation2 + $0xd9] sm:$0xff] %vm257_vm0, %v4885_v18  ;;  %v4990_v40 = vld [vmem:[#allocation2 + $0x79] sm:$0xff] }
  0x31   : > { %7901 = vst [vmem:[#allocation19_spill] sm:$0xff] %v4894_v19  ;;  %7902 = vst [vmem:[#allocation20_spill] sm:$0xff] %v4897_v20  ;;  %v4994_v41 = vld [vmem:[#allocation2 + $0x69] sm:$0xff]  ;;  %v4998_v42 = vld [vmem:[#allocation2 + $0x91] sm:$0xff] }
  0x32   : > { %7903 = vst [vmem:[#allocation21_spill] sm:$0xff] %v4900_v21  ;;  %315 = vst.msk [vmem:[#allocation2 + $0xc9] sm:$0xff] %vm257_vm0, %v4894_v19  ;;  %668 = vrot.lane.b32.xlu1 %v4948_v31, %s4710_s25 }
  0x33   : > { %318 = vst.msk [vmem:[#allocation2 + $0xf1] sm:$0xff] %vm257_vm0, %v4897_v20  ;;  %317 = vst.msk [vmem:[#allocation2 + $0xe1] sm:$0xff] %vm257_vm0, %v4900_v21  ;;  %674 = vrot.lane.b32.xlu0 %v4952_v32, %s4710_s25  ;;  %v5002_v43 = vld [vmem:[#allocation2 + $0x81] sm:$0xff] }
  0x34   : > { %7904 = vst [vmem:[#allocation22_spill] sm:$0xff] %v4910_v22  ;;  %7905 = vst [vmem:[#allocation23_spill] sm:$0xff] %v4913_v23  ;;  %v5006_v44 = vld [vmem:[#allocation2 + $0xa9] sm:$0xff]  ;;  %v5010_v45 = vld [vmem:[#allocation2 + $0x99] sm:$0xff] }
  0x35   : > { %7906 = vst [vmem:[#allocation24_spill] sm:$0xff] %v4916_v24  ;;  %320 = vst.msk [vmem:[#allocation2 + $0x109] sm:$0xff] %vm257_vm0, %v4910_v22  ;;  %v5142_v22 = vld [vmem:[#allocation2 + $0x9a] sm:$0xff] }
  0x36   : > { %319 = vst.msk [vmem:[#allocation2 + $0xf9] sm:$0xff] %vm257_vm0, %v4913_v23  ;;  %322 = vst.msk [vmem:[#allocation2 + $0x121] sm:$0xff] %vm257_vm0, %v4916_v24  ;;  %672 = vrot.lane.b32.xlu1 %v4977_v38, %s4710_s25  ;;  %v5014_v46 = vld [vmem:[#allocation2 + $0xc1] sm:$0xff] }
  0x37   : > { %7907 = vst [vmem:[#allocation25_spill] sm:$0xff] %v4933_v28  ;;  %7908 = vst [vmem:[#allocation26_spill] sm:$0xff] %v4936_v29  ;;  %678 = vrot.lane.b32.xlu0 %v4990_v40, %s4710_s25  ;;  %v5018_v47 = vld [vmem:[#allocation2 + $0xb1] sm:$0xff]  ;;  %v5022_v48 = vld [vmem:[#allocation2 + $0xd9] sm:$0xff] }
  0x38   : > { %321 = vst.msk [vmem:[#allocation2 + $0x111] sm:$0xff] %vm257_vm0, %v4933_v28  ;;  %324 = vst.msk [vmem:[#allocation2 + $0x139] sm:$0xff] %vm257_vm0, %v4936_v29  ;;  %v5126_v29 = vld [vmem:[#allocation2 + $0x6a] sm:$0xff]  ;;  %v5134_v24 = vld [vmem:[#allocation2 + $0x82] sm:$0xff] }
  0x39   : > { %7909 = vst [vmem:[#allocation27_spill] sm:$0xff] %v4955_v33  ;;  %7910 = vst [vmem:[#allocation28_spill] sm:$0xff] %v4958_v34  ;;  %v5026_v49 = vld [vmem:[#allocation2 + $0xc9] sm:$0xff]  ;;  %v5150_v20 = vld [vmem:[#allocation2 + $0xb2] sm:$0xff] }
  0x3a   : > { %7911 = vst [vmem:[#allocation29_spill] sm:$0xff] %v4961_v35  ;;  %323 = vst.msk [vmem:[#allocation2 + $0x129] sm:$0xff] %vm257_vm0, %v4955_v33  ;;  %676 = vrot.lane.b32.xlu1 %v4994_v41, %s4710_s25  ;;  %v5030_v50 = vld [vmem:[#allocation2 + $0xf1] sm:$0xff]  ;;  %v5034_v51 = vld [vmem:[#allocation2 + $0xe1] sm:$0xff] }
  0x3b   : > { %326 = vst.msk [vmem:[#allocation2 + $0x151] sm:$0xff] %vm257_vm0, %v4958_v34  ;;  %325 = vst.msk [vmem:[#allocation2 + $0x141] sm:$0xff] %vm257_vm0, %v4961_v35  ;;  %682 = vrot.lane.b32.xlu0 %v4998_v42, %s4710_s25  ;;  %v5114_v34 = vld [vmem:[#allocation2 + $0x62] sm:$0xff]  ;;  %v5130_v35 = vld [vmem:[#allocation2 + $0x92] sm:$0xff] }
  0x3c   : > { %7912 = vst [vmem:[#allocation30_spill] sm:$0xff] %v4972_v36  ;;  %7913 = vst [vmem:[#allocation31_spill] sm:$0xff] %v4975_v37  ;;  %v5038_v52 = vld [vmem:[#allocation2 + $0x109] sm:$0xff]  ;;  %v5154_v23 = vld [vmem:[#allocation2 + $0xda] sm:$0xff] }
  0x3d   : > { %328 = vst.msk [vmem:[#allocation2 + $0x169] sm:$0xff] %vm257_vm0, %v4972_v36  ;;  %327 = vst.msk [vmem:[#allocation2 + $0x159] sm:$0xff] %vm257_vm0, %v4975_v37  ;;  %v5042_v53 = vld [vmem:[#allocation2 + $0xf9] sm:$0xff]  ;;  %v5046_v54 = vld [vmem:[#allocation2 + $0x121] sm:$0xff] }
  0x3e   : > { %7914 = vst [vmem:[#allocation32_spill] sm:$0xff] %v4984_v39  ;;  %329 = vst.msk [vmem:[#allocation2 + $0x171] sm:$0xff] %vm257_vm0, %v4984_v39  ;;  %680 = vrot.lane.b32.xlu1 %v5002_v43, %s4710_s25  ;;  %v5102_v36 = vld [vmem:[#allocation2 + $0x22] sm:$0xff]  ;;  %v5106_v39 = vld [vmem:[#allocation2 + $0x4a] sm:$0xff] }
  0x3f   : > { %686 = vrot.lane.b32.xlu0 %v5006_v44, %s4710_s25  ;;  %v5050_v55 = vld [vmem:[#allocation2 + $0x111] sm:$0xff]  ;;  %v5054_v56 = vld [vmem:[#allocation2 + $0x139] sm:$0xff]  ;;  %7915 = vst [vmem:[#allocation33_spill] sm:$0xff] %v5061_v58  ;;  %330 = vst.msk [vmem:[#allocation2 + $0x181] sm:$0xff] %vm257_vm0, %v5061_v58 }
  0x40   : > { %7916 = vst [vmem:[#allocation34_spill] sm:$0xff] %v5078_v62  ;;  %331 = vst.msk [vmem:[#allocation2 + $0x189] sm:$0xff] %vm257_vm0, %v5078_v62  ;;  %v402_v58 = vld [vmem:[#allocation2 + $0xa] sm:$0xff]  ;;  %v5099_v62 = vld [vmem:[#allocation2 + $0x32] sm:$0xff] }
  0x41   : > { %v5058_v57 = vld [vmem:[#allocation2 + $0x129] sm:$0xff]  ;;  %v5122_v37 = vld [vmem:[#allocation2 + $0x7a] sm:$0xff]  ;;  %v5162_v21 = vld [vmem:[#allocation2 + $0xf2] sm:$0xff] }
  0x42   : > { %684 = vrot.lane.b32.xlu1 %v5010_v45, %s4710_s25  ;;  %v5067_v59 = vld [vmem:[#allocation2 + $0x151] sm:$0xff]  ;;  %v5071_v60 = vld [vmem:[#allocation2 + $0x141] sm:$0xff] }
  0x43   : > { %690 = vrot.lane.b32.xlu0 %v5014_v46, %s4710_s25  ;;  %v5138_v33 = vld [vmem:[#allocation2 + $0xaa] sm:$0xff]  ;;  %v5146_v28 = vld [vmem:[#allocation2 + $0xc2] sm:$0xff]  ;;  %v5174_v14 = vld [vmem:[#allocation2 + $0xfa] sm:$0xff] }
  0x44   : > { %v5075_v61 = vld [vmem:[#allocation2 + $0x169] sm:$0xff]  ;;  %v5084_v63 = vld [vmem:[#allocation2 + $0x159] sm:$0xff] }
  0x45   : > { %v5090_v7 = vld [vmem:[#allocation2 + $0x171] sm:$0xff]  ;;  %v5166_v16 = vld [vmem:[#allocation2 + $0xe2] sm:$0xff]  ;;  %v5186_v15 = vld [vmem:[#allocation2 + $0x13a] sm:$0xff] }
  0x46   : > { %688 = vrot.lane.b32.xlu1 %v5018_v47, %s4710_s25  ;;  %v5158_v18 = vld [vmem:[#allocation2 + $0xca] sm:$0xff]  ;;  %v5178_v17 = vld [vmem:[#allocation2 + $0x122] sm:$0xff]  ;;  %v5182_v12 = vld [vmem:[#allocation2 + $0x112] sm:$0xff] }
  0x47   : > { %694 = vrot.lane.b32.xlu0 %v5022_v48, %s4710_s25  ;;  %v5170_v19 = vld [vmem:[#allocation2 + $0x10a] sm:$0xff]  ;;  %v5196_v6 = vld [vmem:[#allocation2 + $0x152] sm:$0xff]  ;;  %v5202_v4 = vld [vmem:[#allocation2 + $0x142] sm:$0xff] }
  0x48   : > { %v5192_v13 = vld [vmem:[#allocation2 + $0x12a] sm:$0xff]  ;;  %7919 = vst [vmem:[#allocation37_spill] sm:$0xff] %v5202_v4  ;;  %v5214_v1 = vld [vmem:[#allocation2 + $0x15a] sm:$0xff] }
  0x49   : > { %v5208_v2 = vld [vmem:[#allocation2 + $0x16a] sm:$0xff]  ;;  %7923 = vst [vmem:[#allocation41_spill] sm:$0xff] %v5214_v1 }
  0x4a   : > { %692 = vrot.lane.b32.xlu1 %v5026_v49, %s4710_s25  ;;  %7921 = vst [vmem:[#allocation39_spill] sm:$0xff] %v5208_v2 }
  0x4b   : > { %698 = vrot.lane.b32.xlu0 %v5030_v50, %s4710_s25 }
  0x4e   : > { %696 = vrot.lane.b32.xlu1 %v5034_v51, %s4710_s25 }
  0x4f   : > { %702 = vrot.lane.b32.xlu0 %v5038_v52, %s4710_s25 }
  0x52   : > { %700 = vrot.lane.b32.xlu1 %v5042_v53, %s4710_s25 }
  0x53   : > { %706 = vrot.lane.b32.xlu0 %v5046_v54, %s4710_s25 }
  0x56   : > { %704 = vrot.lane.b32.xlu1 %v5050_v55, %s4710_s25 }
  0x57   : > { %710 = vrot.lane.b32.xlu0 %v5054_v56, %s4710_s25 }
  0x5a   : > { %708 = vrot.lane.b32.xlu1 %v5058_v57, %s4710_s25 }
  0x5b   : > { %714 = vrot.lane.b32.xlu0 %v5067_v59, %s4710_s25 }
  0x5e   : > { %712 = vrot.lane.b32.xlu1 %v5071_v60, %s4710_s25 }
  0x5f   : > { %718 = vrot.lane.b32.xlu0 %v5075_v61, %s4710_s25 }
  0x62   : > { %716 = vrot.lane.b32.xlu1 %v5084_v63, %s4710_s25 }
  0x63   : > { %786 = vrot.lane.b32.xlu0 %v401_v0, %s4711_s26  ;;  %v5110_v0 = vld [vmem:[#allocation2 + $0x3a] sm:$0xff] }
  0x66   : > { %720 = vrot.lane.b32.xlu1 %v5090_v7, %s4710_s25 }
  0x67   : > { %790 = vrot.lane.b32.xlu0 %v5093_v8, %s4711_s26 }
  0x6a   : > { %788 = vrot.lane.b32.xlu1 %v402_v58, %s4711_s26  ;;  %v5118_v58 = vld [vmem:[#allocation2 + $0x52] sm:$0xff] }
  0x6b   : > { %794 = vrot.lane.b32.xlu0 %v5099_v62, %s4711_s26 }
  0x6e   : > { %792 = vrot.lane.b32.xlu1 %v5102_v36, %s4711_s26 }
  0x6f   : > { %798 = vrot.lane.b32.xlu0 %v5106_v39, %s4711_s26 }
  0x72   : > { %796 = vrot.lane.b32.xlu1 %v5110_v0, %s4711_s26 }
  0x73   : > { %802 = vrot.lane.b32.xlu0 %v5114_v34, %s4711_s26 }
  0x76   : > { %800 = vrot.lane.b32.xlu1 %v5118_v58, %s4711_s26 }
  0x77   : > { %806 = vrot.lane.b32.xlu0 %v5122_v37, %s4711_s26 }
  0x7a   : > { %804 = vrot.lane.b32.xlu1 %v5126_v29, %s4711_s26 }
  0x7b   : > { %810 = vrot.lane.b32.xlu0 %v5130_v35, %s4711_s26 }
  0x7e   : > { %808 = vrot.lane.b32.xlu1 %v5134_v24, %s4711_s26 }
  0x7f   : > { %814 = vrot.lane.b32.xlu0 %v5138_v33, %s4711_s26 }
  0x82   : > { %812 = vrot.lane.b32.xlu1 %v5142_v22, %s4711_s26 }
  0x83   : > { %818 = vrot.lane.b32.xlu0 %v5146_v28, %s4711_s26 }
  0x86   : > { %816 = vrot.lane.b32.xlu1 %v5150_v20, %s4711_s26 }
  0x87   : > { %822 = vrot.lane.b32.xlu0 %v5154_v23, %s4711_s26 }
  0x88   : > { %v5188_v10 = vpop.permute.xlu0 %658 }
  0x89   : > { %7917 = vst [vmem:[#allocation35_spill] sm:$0xff] %v5188_v10  ;;  %v5226_v10 = vld [vmem:[#allocation2 + $0x172] sm:$0xff] }
  0x8a   : > { %820 = vrot.lane.b32.xlu1 %v5158_v18, %s4711_s26  ;;  %7927 = vst [vmem:[#allocation45_spill] sm:$0xff] %v5226_v10 }
  0x8b   : > { %826 = vrot.lane.b32.xlu0 %v5162_v21, %s4711_s26 }
  0x8c   : > { %v5198_v11 = vpop.permute.xlu0 %660 }
  0x8d   : > { %7918 = vst [vmem:[#allocation36_spill] sm:$0xff] %v5198_v11 }
  0x8e   : > { %824 = vrot.lane.b32.xlu1 %v5166_v16, %s4711_s26 }
  0x8f   : > { %830 = vrot.lane.b32.xlu0 %v5170_v19, %s4711_s26 }
  0x92   : > { %828 = vrot.lane.b32.xlu1 %v5174_v14, %s4711_s26 }
  0x93   : > { %834 = vrot.lane.b32.xlu0 %v5178_v17, %s4711_s26 }
  0x96   : > { %832 = vrot.lane.b32.xlu1 %v5182_v12, %s4711_s26 }
  0x97   : > { %838 = vrot.lane.b32.xlu0 %v5186_v15, %s4711_s26 }
  0x9a   : > { %836 = vrot.lane.b32.xlu1 %v5192_v13, %s4711_s26 }
  0x9b   : > { %842 = vrot.lane.b32.xlu0 %v5196_v6, %s4711_s26 }
  0x9c   : > { %v5206_v9 = vpop.permute.xlu1 %662 }
  0x9d   : > { %7920 = vst [vmem:[#allocation38_spill] sm:$0xff] %v5206_v9  ;;  %v5210_v5 = vpop.permute.xlu0 %666  ;;  %v5224_v9 = vld [vmem:[#allocation2 + $0x18] sm:$0xff] }
  0x9e   : > { %7922 = vst [vmem:[#allocation40_spill] sm:$0xff] %v5210_v5  ;;  %840 = vrot.lane.b32.xlu1 %v5202_v4, %s4711_s26  ;;  %7926 = vst [vmem:[#allocation44_spill] sm:$0xff] %v5224_v9 }
  0x9f   : > { %846 = vrot.lane.b32.xlu0 %v5208_v2, %s4711_s26 }
  0xa0   : > { %v5218_v3 = vpop.permute.xlu1 %664 }
  0xa1   : > { %7924 = vst [vmem:[#allocation42_spill] sm:$0xff] %v5218_v3  ;;  %v5220_v11 = vpop.permute.xlu0 %670  ;;  %v5236_v3 = vld [vmem:[#allocation2 + $0x30] sm:$0xff] }
  0xa2   : > { %7925 = vst [vmem:[#allocation43_spill] sm:$0xff] %v5220_v11  ;;  %844 = vrot.lane.b32.xlu1 %v5214_v1, %s4711_s26  ;;  %7930 = vst [vmem:[#allocation48_spill] sm:$0xff] %v5236_v3  ;;  %v5242_v1 = vld [vmem:[#allocation2 + $0x20] sm:$0xff] }
  0xa3   : > { %914 = vrot.lane.b32.xlu0 %v5224_v9, %s4712_s27  ;;  %7932 = vst [vmem:[#allocation50_spill] sm:$0xff] %v5242_v1  ;;  %v5254_v9 = vld [vmem:[#allocation2 + $0x38] sm:$0xff] }
  0xa4   : > { %v5230_v5 = vpop.permute.xlu1 %668  ;;  %7936 = vst [vmem:[#allocation54_spill] sm:$0xff] %v5254_v9 }
  0xa5   : > { %7928 = vst [vmem:[#allocation46_spill] sm:$0xff] %v5230_v5  ;;  %v5232_v4 = vpop.permute.xlu0 %674  ;;  %v5248_v5 = vld [vmem:[#allocation2 + $0x48] sm:$0xff] }
  0xa6   : > { %7929 = vst [vmem:[#allocation47_spill] sm:$0xff] %v5232_v4  ;;  %848 = vrot.lane.b32.xlu1 %v5226_v10, %s4711_s26  ;;  %7934 = vst [vmem:[#allocation52_spill] sm:$0xff] %v5248_v5 }
  0xa7   : > { %918 = vrot.lane.b32.xlu0 %v5236_v3, %s4712_s27 }
  0xa8   : > { %v5240_v11 = vpop.permute.xlu1 %672 }
  0xa9   : > { %7931 = vst [vmem:[#allocation49_spill] sm:$0xff] %v5240_v11  ;;  %v5244_v2 = vpop.permute.xlu0 %678  ;;  %v5260_v11 = vld [vmem:[#allocation2 + $0x60] sm:$0xff] }
  0xaa   : > { %7933 = vst [vmem:[#allocation51_spill] sm:$0xff] %v5244_v2  ;;  %916 = vrot.lane.b32.xlu1 %v5242_v1, %s4712_s27  ;;  %7938 = vst [vmem:[#allocation56_spill] sm:$0xff] %v5260_v11  ;;  %v5266_v1 = vld [vmem:[#allocation2 + $0x50] sm:$0xff] }
  0xab   : > { %922 = vrot.lane.b32.xlu0 %v5248_v5, %s4712_s27  ;;  %7940 = vst [vmem:[#allocation58_spill] sm:$0xff] %v5266_v1 }
  0xac   : > { %v5252_v4 = vpop.permute.xlu1 %676 }
  0xad   : > { %7935 = vst [vmem:[#allocation53_spill] sm:$0xff] %v5252_v4  ;;  %v5256_v10 = vpop.permute.xlu0 %682  ;;  %v5272_v4 = vld [vmem:[#allocation2 + $0x78] sm:$0xff] }
  0xae   : > { %7937 = vst [vmem:[#allocation55_spill] sm:$0xff] %v5256_v10  ;;  %920 = vrot.lane.b32.xlu1 %v5254_v9, %s4712_s27  ;;  %7942 = vst [vmem:[#allocation60_spill] sm:$0xff] %v5272_v4  ;;  %v5278_v9 = vld [vmem:[#allocation2 + $0x68] sm:$0xff] }
  0xaf   : > { %926 = vrot.lane.b32.xlu0 %v5260_v11, %s4712_s27  ;;  %7944 = vst [vmem:[#allocation62_spill] sm:$0xff] %v5278_v9 }
  0xb0   : > { %v5264_v2 = vpop.permute.xlu1 %680 }
  0xb1   : > { %7939 = vst [vmem:[#allocation57_spill] sm:$0xff] %v5264_v2  ;;  %v5268_v3 = vpop.permute.xlu0 %686  ;;  %v5284_v2 = vld [vmem:[#allocation2 + $0x90] sm:$0xff] }
  0xb2   : > { %7941 = vst [vmem:[#allocation59_spill] sm:$0xff] %v5268_v3  ;;  %924 = vrot.lane.b32.xlu1 %v5266_v1, %s4712_s27  ;;  %7946 = vst [vmem:[#allocation64_spill] sm:$0xff] %v5284_v2  ;;  %v5290_v1 = vld [vmem:[#allocation2 + $0x80] sm:$0xff] }
  0xb3   : > { %930 = vrot.lane.b32.xlu0 %v5272_v4, %s4712_s27  ;;  %7948 = vst [vmem:[#allocation66_spill] sm:$0xff] %v5290_v1 }
  0xb4   : > { %v5276_v10 = vpop.permute.xlu1 %684 }
  0xb5   : > { %7943 = vst [vmem:[#allocation61_spill] sm:$0xff] %v5276_v10  ;;  %v5280_v5 = vpop.permute.xlu0 %690  ;;  %v5296_v10 = vld [vmem:[#allocation2 + $0xa8] sm:$0xff] }
  0xb6   : > { %7945 = vst [vmem:[#allocation63_spill] sm:$0xff] %v5280_v5  ;;  %928 = vrot.lane.b32.xlu1 %v5278_v9, %s4712_s27  ;;  %7950 = vst [vmem:[#allocation68_spill] sm:$0xff] %v5296_v10  ;;  %v5302_v9 = vld [vmem:[#allocation2 + $0x98] sm:$0xff] }
  0xb7   : > { %934 = vrot.lane.b32.xlu0 %v5284_v2, %s4712_s27  ;;  %7952 = vst [vmem:[#allocation70_spill] sm:$0xff] %v5302_v9 }
  0xb8   : > { %v5288_v3 = vpop.permute.xlu1 %688 }
  0xb9   : > { %7947 = vst [vmem:[#allocation65_spill] sm:$0xff] %v5288_v3  ;;  %v5292_v11 = vpop.permute.xlu0 %694  ;;  %v5308_v3 = vld [vmem:[#allocation2 + $0xc0] sm:$0xff] }
  0xba   : > { %7949 = vst [vmem:[#allocation67_spill] sm:$0xff] %v5292_v11  ;;  %932 = vrot.lane.b32.xlu1 %v5290_v1, %s4712_s27  ;;  %7954 = vst [vmem:[#allocation72_spill] sm:$0xff] %v5308_v3  ;;  %v5314_v1 = vld [vmem:[#allocation2 + $0xb0] sm:$0xff] }
  0xbb   : > { %938 = vrot.lane.b32.xlu0 %v5296_v10, %s4712_s27  ;;  %7956 = vst [vmem:[#allocation74_spill] sm:$0xff] %v5314_v1 }
  0xbc   : > { %v5300_v5 = vpop.permute.xlu1 %692 }
  0xbd   : > { %7951 = vst [vmem:[#allocation69_spill] sm:$0xff] %v5300_v5  ;;  %v5304_v4 = vpop.permute.xlu0 %698  ;;  %v5320_v5 = vld [vmem:[#allocation2 + $0xd8] sm:$0xff] }
  0xbe   : > { %7953 = vst [vmem:[#allocation71_spill] sm:$0xff] %v5304_v4  ;;  %936 = vrot.lane.b32.xlu1 %v5302_v9, %s4712_s27  ;;  %7958 = vst [vmem:[#allocation76_spill] sm:$0xff] %v5320_v5  ;;  %v5326_v9 = vld [vmem:[#allocation2 + $0xc8] sm:$0xff] }
  0xbf   : > { %942 = vrot.lane.b32.xlu0 %v5308_v3, %s4712_s27  ;;  %7960 = vst [vmem:[#allocation78_spill] sm:$0xff] %v5326_v9 }
  0xc0   : > { %v5312_v11 = vpop.permute.xlu1 %696 }
  0xc1   : > { %7955 = vst [vmem:[#allocation73_spill] sm:$0xff] %v5312_v11  ;;  %v5316_v2 = vpop.permute.xlu0 %702  ;;  %v5332_v11 = vld [vmem:[#allocation2 + $0xf0] sm:$0xff] }
  0xc2   : > { %7957 = vst [vmem:[#allocation75_spill] sm:$0xff] %v5316_v2  ;;  %940 = vrot.lane.b32.xlu1 %v5314_v1, %s4712_s27  ;;  %7962 = vst [vmem:[#allocation80_spill] sm:$0xff] %v5332_v11  ;;  %v5338_v1 = vld [vmem:[#allocation2 + $0xe0] sm:$0xff] }
  0xc3   : > { %946 = vrot.lane.b32.xlu0 %v5320_v5, %s4712_s27  ;;  %7964 = vst [vmem:[#allocation82_spill] sm:$0xff] %v5338_v1 }
  0xc4   : > { %v5324_v4 = vpop.permute.xlu1 %700 }
  0xc5   : > { %7959 = vst [vmem:[#allocation77_spill] sm:$0xff] %v5324_v4  ;;  %v5328_v10 = vpop.permute.xlu0 %706  ;;  %v5344_v4 = vld [vmem:[#allocation2 + $0x108] sm:$0xff] }
  0xc6   : > { %7961 = vst [vmem:[#allocation79_spill] sm:$0xff] %v5328_v10  ;;  %944 = vrot.lane.b32.xlu1 %v5326_v9, %s4712_s27  ;;  %7966 = vst [vmem:[#allocation84_spill] sm:$0xff] %v5344_v4  ;;  %v5350_v9 = vld [vmem:[#allocation2 + $0xf8] sm:$0xff] }
  0xc7   : > { %950 = vrot.lane.b32.xlu0 %v5332_v11, %s4712_s27  ;;  %7968 = vst [vmem:[#allocation86_spill] sm:$0xff] %v5350_v9 }
  0xc8   : > { %v5336_v2 = vpop.permute.xlu1 %704 }
  0xc9   : > { %7963 = vst [vmem:[#allocation81_spill] sm:$0xff] %v5336_v2  ;;  %v5340_v3 = vpop.permute.xlu0 %710  ;;  %v5356_v2 = vld [vmem:[#allocation2 + $0x120] sm:$0xff] }
  0xca   : > { %7965 = vst [vmem:[#allocation83_spill] sm:$0xff] %v5340_v3  ;;  %948 = vrot.lane.b32.xlu1 %v5338_v1, %s4712_s27  ;;  %7970 = vst [vmem:[#allocation88_spill] sm:$0xff] %v5356_v2  ;;  %v5362_v1 = vld [vmem:[#allocation2 + $0x110] sm:$0xff] }
  0xcb   : > { %954 = vrot.lane.b32.xlu0 %v5344_v4, %s4712_s27  ;;  %7972 = vst [vmem:[#allocation90_spill] sm:$0xff] %v5362_v1 }
  0xcc   : > { %v5348_v10 = vpop.permute.xlu1 %708 }
  0xcd   : > { %7967 = vst [vmem:[#allocation85_spill] sm:$0xff] %v5348_v10  ;;  %v5352_v5 = vpop.permute.xlu0 %714  ;;  %v5368_v10 = vld [vmem:[#allocation2 + $0x138] sm:$0xff] }
  0xce   : > { %7969 = vst [vmem:[#allocation87_spill] sm:$0xff] %v5352_v5  ;;  %952 = vrot.lane.b32.xlu1 %v5350_v9, %s4712_s27  ;;  %7974 = vst [vmem:[#allocation92_spill] sm:$0xff] %v5368_v10  ;;  %v5374_v9 = vld [vmem:[#allocation2 + $0x128] sm:$0xff] }
  0xcf   : > { %958 = vrot.lane.b32.xlu0 %v5356_v2, %s4712_s27  ;;  %7976 = vst [vmem:[#allocation94_spill] sm:$0xff] %v5374_v9 }
  0xd0   : > { %v5360_v3 = vpop.permute.xlu1 %712 }
  0xd1   : > { %7971 = vst [vmem:[#allocation89_spill] sm:$0xff] %v5360_v3  ;;  %v5364_v11 = vpop.permute.xlu0 %718  ;;  %v5380_v3 = vld [vmem:[#allocation2 + $0x150] sm:$0xff] }
  0xd2   : > { %7973 = vst [vmem:[#allocation91_spill] sm:$0xff] %v5364_v11  ;;  %956 = vrot.lane.b32.xlu1 %v5362_v1, %s4712_s27  ;;  %7978 = vst [vmem:[#allocation96_spill] sm:$0xff] %v5380_v3  ;;  %v5386_v1 = vld [vmem:[#allocation2 + $0x140] sm:$0xff] }
  0xd3   : > { %962 = vrot.lane.b32.xlu0 %v5368_v10, %s4712_s27  ;;  %7980 = vst [vmem:[#allocation98_spill] sm:$0xff] %v5386_v1  ;;  %v5400_v10 = vld [vmem:[#allocation2 + $0x180] sm:$0xff] }
  0xd4   : > { %v5372_v5 = vpop.permute.xlu1 %716 }
  0xd5   : > { %7975 = vst [vmem:[#allocation93_spill] sm:$0xff] %v5372_v5  ;;  %v5376_v4 = vpop.permute.xlu0 %786  ;;  %v5392_v5 = vld [vmem:[#allocation2 + $0x168] sm:$0xff] }
  0xd6   : > { %7977 = vst [vmem:[#allocation95_spill] sm:$0xff] %v5376_v4  ;;  %960 = vrot.lane.b32.xlu1 %v5374_v9, %s4712_s27  ;;  %v5398_v9 = vld [vmem:[#allocation2 + $0x158] sm:$0xff] }
  0xd7   : > { %966 = vrot.lane.b32.xlu0 %v5380_v3, %s4712_s27  ;;  %7983 = vst [vmem:[#allocation101_spill] sm:$0xff] %v5398_v9 }
  0xd8   : > { %v5384_v11 = vpop.permute.xlu1 %720 }
  0xd9   : > { %7979 = vst [vmem:[#allocation97_spill] sm:$0xff] %v5384_v11  ;;  %v5388_v2 = vpop.permute.xlu0 %790 }
  0xda   : > { %7981 = vst [vmem:[#allocation99_spill] sm:$0xff] %v5388_v2  ;;  %964 = vrot.lane.b32.xlu1 %v5386_v1, %s4712_s27  ;;  %v5410_v2 = vld [vmem:[#allocation2 + $0x170] sm:$0xff] }
  0xdb   : > { %970 = vrot.lane.b32.xlu0 %v5392_v5, %s4712_s27 }
  0xdc   : > { %v5396_v4 = vpop.permute.xlu1 %788 }
  0xdd   : > { %7982 = vst [vmem:[#allocation100_spill] sm:$0xff] %v5396_v4  ;;  %v5402_v3 = vpop.permute.xlu0 %794  ;;  %v5416_v4 = vld [vmem:[#allocation2 + $0x188] sm:$0xff] }
  0xde   : > { %7984 = vst [vmem:[#allocation102_spill] sm:$0xff] %v5402_v3  ;;  %968 = vrot.lane.b32.xlu1 %v5398_v9, %s4712_s27 }
  0xdf   : > { %974 = vrot.lane.b32.xlu0 %v5400_v10, %s4712_s27 }
  0xe0   : > { %v5408_v11 = vpop.permute.xlu1 %792 }
  0xe1   : > { %7985 = vst [vmem:[#allocation103_spill] sm:$0xff] %v5408_v11  ;;  %v5412_v1 = vpop.permute.xlu0 %798 }
  0xe2   : > { %7986 = vst [vmem:[#allocation104_spill] sm:$0xff] %v5412_v1  ;;  %972 = vrot.lane.b32.xlu1 %v5410_v2, %s4712_s27 }
  0xe3   : > { %1042 = vrot.lane.b32.xlu0 %v4918_v25, %s4713_s28 }
  0xe4   : > { %v5420_v3 = vpop.permute.xlu1 %796 }
  0xe5   : > { %7987 = vst [vmem:[#allocation105_spill] sm:$0xff] %v5420_v3  ;;  %v5422_v9 = vpop.permute.xlu0 %802 }
  0xe6   : > { %7988 = vst [vmem:[#allocation106_spill] sm:$0xff] %v5422_v9  ;;  %976 = vrot.lane.b32.xlu1 %v5416_v4, %s4712_s27 }
  0xe7   : > { %1046 = vrot.lane.b32.xlu0 %v4920_v26, %s4713_s28 }
  0xe8   : > { %v5428_v1 = vpop.permute.xlu1 %800 }
  0xe9   : > { %v5430_v11 = vpop.permute.xlu0 %806 }
  0xea   : > { %1044 = vrot.lane.b32.xlu1 %v4930_v27, %s4713_s28 }
  0xeb   : > { %1050 = vrot.lane.b32.xlu0 %v4944_v30, %s4713_s28 }
  0xec   : > { %v5436_v25 = vpop.permute.xlu1 %804 }
  0xed   : > { %v5438_v3 = vpop.permute.xlu0 %810 }
  0xee   : > { %7989 = vst [vmem:[#allocation107_spill] sm:$0xff] %v5438_v3  ;;  %1048 = vrot.lane.b32.xlu1 %v4948_v31, %s4713_s28  ;;  %v614_v3 = vld [vmem:[#allocation2 + $0x122] sm:$0xff] }
  0xef   : > { %1054 = vrot.lane.b32.xlu0 %v4952_v32, %s4713_s28 }
  0xf0   : > { %v5444_v26 = vpop.permute.xlu1 %808 }
  0xf1   : > { %7990 = vst [vmem:[#allocation108_spill] sm:$0xff] %v5444_v26  ;;  %v5446_v9 = vpop.permute.xlu0 %814 }
  0xf2   : > { %7991 = vst [vmem:[#allocation109_spill] sm:$0xff] %v5446_v9  ;;  %1052 = vrot.lane.b32.xlu1 %v4977_v38, %s4713_s28  ;;  %v610_v9 = vld [vmem:[#allocation2 + $0xf2] sm:$0xff] }
  0xf3   : > { %1058 = vrot.lane.b32.xlu0 %v4990_v40, %s4713_s28 }
  0xf4   : > { %v5452_v27 = vpop.permute.xlu1 %812 }
  0xf5   : > { %7992 = vst [vmem:[#allocation110_spill] sm:$0xff] %v5452_v27  ;;  %v5454_v30 = vpop.permute.xlu0 %818  ;;  %v580_v27 = vld [vmem:[#allocation2 + $0x109] sm:$0xff] }
  0xf6   : > { %7993 = vst [vmem:[#allocation111_spill] sm:$0xff] %v5454_v30  ;;  %1056 = vrot.lane.b32.xlu1 %v4994_v41, %s4713_s28 }
  0xf7   : > { %1062 = vrot.lane.b32.xlu0 %v4998_v42, %s4713_s28 }
  0xf8   : > { %v5460_v31 = vpop.permute.xlu1 %816 }
  0xf9   : > { %7994 = vst [vmem:[#allocation112_spill] sm:$0xff] %v5460_v31  ;;  %v5462_v32 = vpop.permute.xlu0 %822 }
  0xfa   : > { %7995 = vst [vmem:[#allocation113_spill] sm:$0xff] %v5462_v32  ;;  %1060 = vrot.lane.b32.xlu1 %v5002_v43, %s4713_s28 }
  0xfb   : > { %1066 = vrot.lane.b32.xlu0 %v5006_v44, %s4713_s28 }
  0xfc   : > { %v5468_v38 = vpop.permute.xlu1 %820 }
  0xfd   : > { %7996 = vst [vmem:[#allocation114_spill] sm:$0xff] %v5468_v38  ;;  %v5470_v40 = vpop.permute.xlu0 %826  ;;  %v565_v38 = vld [vmem:[#allocation2 + $0x51] sm:$0xff] }
  0xfe   : > { %7997 = vst [vmem:[#allocation115_spill] sm:$0xff] %v5470_v40  ;;  %1064 = vrot.lane.b32.xlu1 %v5010_v45, %s4713_s28  ;;  %v8053_v40 = vld [vmem:[#allocation70_spill] sm:$0xff] }
  0xff   : > { %1070 = vrot.lane.b32.xlu0 %v5014_v46, %s4713_s28 }
 0x100   : > { %v5476_v41 = vpop.permute.xlu1 %824 }
 0x101   : > { %7998 = vst [vmem:[#allocation116_spill] sm:$0xff] %v5476_v41  ;;  %v5478_v42 = vpop.permute.xlu0 %830  ;;  %v8057_v41 = vld [vmem:[#allocation74_spill] sm:$0xff] }
 0x102   : > { %7999 = vst [vmem:[#allocation117_spill] sm:$0xff] %v5478_v42  ;;  %1068 = vrot.lane.b32.xlu1 %v5018_v47, %s4713_s28  ;;  %v8045_v42 = vld [vmem:[#allocation62_spill] sm:$0xff] }
 0x103   : > { %1074 = vrot.lane.b32.xlu0 %v5022_v48, %s4713_s28 }
 0x104   : > { %v5484_v43 = vpop.permute.xlu1 %828 }
 0x105   : > { %8000 = vst [vmem:[#allocation118_spill] sm:$0xff] %v5484_v43  ;;  %v5486_v44 = vpop.permute.xlu0 %834  ;;  %v8049_v43 = vld [vmem:[#allocation66_spill] sm:$0xff] }
 0x106   : > { %8001 = vst [vmem:[#allocation119_spill] sm:$0xff] %v5486_v44  ;;  %1072 = vrot.lane.b32.xlu1 %v5026_v49, %s4713_s28 }
 0x107   : > { %1078 = vrot.lane.b32.xlu0 %v5030_v50, %s4713_s28 }
 0x108   : > { %v5492_v45 = vpop.permute.xlu1 %832 }
 0x109   : > { %8002 = vst [vmem:[#allocation120_spill] sm:$0xff] %v5492_v45  ;;  %v5494_v46 = vpop.permute.xlu0 %838  ;;  %v8042_v45 = vld [vmem:[#allocation60_spill] sm:$0xff] }
 0x10a   : > { %8003 = vst [vmem:[#allocation121_spill] sm:$0xff] %v5494_v46  ;;  %1076 = vrot.lane.b32.xlu1 %v5034_v51, %s4713_s28 }
 0x10b   : > { %1082 = vrot.lane.b32.xlu0 %v5038_v52, %s4713_s28 }
 0x10c   : > { %v5500_v47 = vpop.permute.xlu1 %836 }
 0x10d   : > { %8004 = vst [vmem:[#allocation122_spill] sm:$0xff] %v5500_v47  ;;  %v5502_v48 = vpop.permute.xlu0 %842  ;;  %v8039_v47 = vld [vmem:[#allocation56_spill] sm:$0xff] }
 0x10e   : > { %8005 = vst [vmem:[#allocation123_spill] sm:$0xff] %v5502_v48  ;;  %1080 = vrot.lane.b32.xlu1 %v5042_v53, %s4713_s28 }
 0x10f   : > { %1086 = vrot.lane.b32.xlu0 %v5046_v54, %s4713_s28 }
 0x110   : > { %v5508_v49 = vpop.permute.xlu1 %840 }
 0x111   : > { %8006 = vst [vmem:[#allocation124_spill] sm:$0xff] %v5508_v49  ;;  %v5510_v50 = vpop.permute.xlu0 %846 }
 0x112   : > { %8007 = vst [vmem:[#allocation125_spill] sm:$0xff] %v5510_v50  ;;  %1084 = vrot.lane.b32.xlu1 %v5050_v55, %s4713_s28 }
 0x113   : > { %1090 = vrot.lane.b32.xlu0 %v5054_v56, %s4713_s28  ;;  %v5534_v56 = vld [vmem:[#allocation2 + $0x181] sm:$0xff] }
 0x114   : > { %v5516_v51 = vpop.permute.xlu1 %844 }
 0x115   : > { %8008 = vst [vmem:[#allocation126_spill] sm:$0xff] %v5516_v51  ;;  %v5518_v52 = vpop.permute.xlu0 %914 }
 0x116   : > { %1088 = vrot.lane.b32.xlu1 %v5058_v57, %s4713_s28 }
 0x117   : > { %1094 = vrot.lane.b32.xlu0 %v5067_v59, %s4713_s28 }
 0x118   : > { %v5524_v53 = vpop.permute.xlu1 %848 }
 0x119   : > { %8009 = vst [vmem:[#allocation127_spill] sm:$0xff] %v5524_v53  ;;  %v5526_v54 = vpop.permute.xlu0 %918 }
 0x11a   : > { %1092 = vrot.lane.b32.xlu1 %v5071_v60, %s4713_s28  ;;  %v5548_v60 = vld [vmem:[#allocation2 + $0x189] sm:$0xff] }
 0x11b   : > { %1098 = vrot.lane.b32.xlu0 %v5075_v61, %s4713_s28 }
 0x11c   : > { %v5532_v55 = vpop.permute.xlu1 %916 }
 0x11d   : > { %v5536_v50 = vpop.permute.xlu0 %922 }
 0x11e   : > { %1096 = vrot.lane.b32.xlu1 %v5084_v63, %s4713_s28 }
 0x11f   : > { %1102 = vrot.lane.b32.xlu0 %v5534_v56, %s4713_s28 }
 0x120   : > { %v5542_v57 = vpop.permute.xlu1 %920 }
 0x121   : > { %v5544_v59 = vpop.permute.xlu0 %926 }
 0x122   : > { %1100 = vrot.lane.b32.xlu1 %v5090_v7, %s4713_s28 }
 0x123   : > { %1170 = vrot.lane.b32.xlu0 %v5093_v8, %s4714_s29 }
 0x124   : > { %v5552_v61 = vpop.permute.xlu1 %924 }
 0x125   : > { %v5554_v53 = vpop.permute.xlu0 %930 }
 0x126   : > { %1104 = vrot.lane.b32.xlu1 %v5548_v60, %s4713_s28 }
 0x127   : > { %1174 = vrot.lane.b32.xlu0 %v5099_v62, %s4714_s29 }
 0x128   : > { %v5560_v63 = vpop.permute.xlu1 %928 }
 0x129   : > { %v5562_v51 = vpop.permute.xlu0 %934 }
 0x12a   : > { %1172 = vrot.lane.b32.xlu1 %v5102_v36, %s4714_s29 }
 0x12b   : > { %1178 = vrot.lane.b32.xlu0 %v5106_v39, %s4714_s29 }
 0x12c   : > { %v5568_v7 = vpop.permute.xlu1 %932 }
 0x12d   : > { %v5570_v8 = vpop.permute.xlu0 %938 }
 0x12e   : > { %8010 = vst [vmem:[#allocation128_spill] sm:$0xff] %v5570_v8  ;;  %1176 = vrot.lane.b32.xlu1 %v5110_v0, %s4714_s29  ;;  %v582_v8 = vld [vmem:[#allocation2 + $0x121] sm:$0xff] }
 0x12f   : > { %1182 = vrot.lane.b32.xlu0 %v5114_v34, %s4714_s29 }
 0x130   : > { %v5576_v62 = vpop.permute.xlu1 %936 }
 0x131   : > { %8011 = vst [vmem:[#allocation129_spill] sm:$0xff] %v5576_v62  ;;  %v5578_v48 = vpop.permute.xlu0 %942 }
 0x132   : > { %8012 = vst [vmem:[#allocation130_spill] sm:$0xff] %v5578_v48  ;;  %1180 = vrot.lane.b32.xlu1 %v5118_v58, %s4714_s29 }
 0x133   : > { %1186 = vrot.lane.b32.xlu0 %v5122_v37, %s4714_s29 }
 0x134   : > { %v5584_v36 = vpop.permute.xlu1 %940 }
 0x135   : > { %8013 = vst [vmem:[#allocation131_spill] sm:$0xff] %v5584_v36  ;;  %v5586_v39 = vpop.permute.xlu0 %946 }
 0x136   : > { %8014 = vst [vmem:[#allocation132_spill] sm:$0xff] %v5586_v39  ;;  %1184 = vrot.lane.b32.xlu1 %v5126_v29, %s4714_s29  ;;  %v595_v39 = vld [vmem:[#allocation2 + $0x3a] sm:$0xff] }
 0x137   : > { %1190 = vrot.lane.b32.xlu0 %v5130_v35, %s4714_s29 }
 0x138   : > { %v5592_v34 = vpop.permute.xlu1 %944 }
 0x139   : > { %8015 = vst [vmem:[#allocation133_spill] sm:$0xff] %v5592_v34  ;;  %v5594_v0 = vpop.permute.xlu0 %950  ;;  %v598_v34 = vld [vmem:[#allocation2 + $0x62] sm:$0xff] }
 0x13a   : > { %8016 = vst [vmem:[#allocation134_spill] sm:$0xff] %v5594_v0  ;;  %1188 = vrot.lane.b32.xlu1 %v5134_v24, %s4714_s29 }
 0x13b   : > { %1194 = vrot.lane.b32.xlu0 %v5138_v33, %s4714_s29 }
 0x13c   : > { %v5600_v37 = vpop.permute.xlu1 %948 }
 0x13d   : > { %8017 = vst [vmem:[#allocation135_spill] sm:$0xff] %v5600_v37  ;;  %v5602_v58 = vpop.permute.xlu0 %954 }
 0x13e   : > { %8018 = vst [vmem:[#allocation136_spill] sm:$0xff] %v5602_v58  ;;  %1192 = vrot.lane.b32.xlu1 %v5142_v22, %s4714_s29 }
 0x13f   : > { %1198 = vrot.lane.b32.xlu0 %v5146_v28, %s4714_s29 }
 0x140   : > { %v5608_v29 = vpop.permute.xlu1 %952 }
 0x141   : > { %8019 = vst [vmem:[#allocation137_spill] sm:$0xff] %v5608_v29  ;;  %v5610_v35 = vpop.permute.xlu0 %958 }
 0x142   : > { %8020 = vst [vmem:[#allocation138_spill] sm:$0xff] %v5610_v35  ;;  %1196 = vrot.lane.b32.xlu1 %v5150_v20, %s4714_s29 }
 0x143   : > { %1202 = vrot.lane.b32.xlu0 %v5154_v23, %s4714_s29 }
 0x144   : > { %v5616_v24 = vpop.permute.xlu1 %956 }
 0x145   : > { %8021 = vst [vmem:[#allocation139_spill] sm:$0xff] %v5616_v24  ;;  %v5618_v33 = vpop.permute.xlu0 %962 }
 0x146   : > { %8022 = vst [vmem:[#allocation140_spill] sm:$0xff] %v5618_v33  ;;  %1200 = vrot.lane.b32.xlu1 %v5158_v18, %s4714_s29 }
 0x147   : > { %1206 = vrot.lane.b32.xlu0 %v5162_v21, %s4714_s29 }
 0x148   : > { %v5624_v22 = vpop.permute.xlu1 %960 }
 0x149   : > { %8023 = vst [vmem:[#allocation141_spill] sm:$0xff] %v5624_v22  ;;  %v5626_v28 = vpop.permute.xlu0 %966  ;;  %v8041_v22 = vld [vmem:[#allocation58_spill] sm:$0xff] }
 0x14a   : > { %8024 = vst [vmem:[#allocation142_spill] sm:$0xff] %v5626_v28  ;;  %1204 = vrot.lane.b32.xlu1 %v5166_v16, %s4714_s29 }
 0x14b   : > { %1210 = vrot.lane.b32.xlu0 %v5170_v19, %s4714_s29 }
 0x14c   : > { %v5632_v20 = vpop.permute.xlu1 %964 }
 0x14d   : > { %8025 = vst [vmem:[#allocation143_spill] sm:$0xff] %v5632_v20  ;;  %v5634_v23 = vpop.permute.xlu0 %970 }
 0x14e   : > { %8026 = vst [vmem:[#allocation144_spill] sm:$0xff] %v5634_v23  ;;  %1208 = vrot.lane.b32.xlu1 %v5174_v14, %s4714_s29 }
 0x14f   : > { %1214 = vrot.lane.b32.xlu0 %v5178_v17, %s4714_s29 }
 0x150   : > { %v5640_v18 = vpop.permute.xlu1 %968 }
 0x151   : > { %8027 = vst [vmem:[#allocation145_spill] sm:$0xff] %v5640_v18  ;;  %v5642_v21 = vpop.permute.xlu0 %974  ;;  %v8035_v18 = vld [vmem:[#allocation48_spill] sm:$0xff] }
 0x152   : > { %8028 = vst [vmem:[#allocation146_spill] sm:$0xff] %v5642_v21  ;;  %1212 = vrot.lane.b32.xlu1 %v5182_v12, %s4714_s29  ;;  %v8031_v21 = vld [vmem:[#allocation37_spill] sm:$0xff]  ;;  %v8032_v12 = vld [vmem:[#allocation39_spill] sm:$0xff] }
 0x153   : > { %1218 = vrot.lane.b32.xlu0 %v5186_v15, %s4714_s29 }
 0x154   : > { %v5648_v16 = vpop.permute.xlu1 %972 }
 0x155   : > { %8029 = vst [vmem:[#allocation147_spill] sm:$0xff] %v5648_v16  ;;  %v5650_v19 = vpop.permute.xlu0 %1042  ;;  %v5666_v16 = vld [vmem:[#allocation2 + $0x182] sm:$0xff] }
 0x156   : > { %1216 = vrot.lane.b32.xlu1 %v5192_v13, %s4714_s29  ;;  %v8033_v13 = vld [vmem:[#allocation41_spill] sm:$0xff] }
 0x157   : > { %1222 = vrot.lane.b32.xlu0 %v5196_v6, %s4714_s29 }
 0x158   : > { %v5656_v14 = vpop.permute.xlu1 %976 }
 0x159   : > { %8030 = vst [vmem:[#allocation148_spill] sm:$0xff] %v5656_v14  ;;  %v5658_v17 = vpop.permute.xlu0 %1046 }
 0x15a   : > { %1220 = vrot.lane.b32.xlu1 %v8031_v21, %s4714_s29  ;;  %v8034_v21 = vld [vmem:[#allocation45_spill] sm:$0xff] }
 0x15b   : > { %1226 = vrot.lane.b32.xlu0 %v8032_v12, %s4714_s29  ;;  %v5680_v12 = vld [vmem:[#allocation2 + $0x18a] sm:$0xff] }
 0x15c   : > { %v5664_v15 = vpop.permute.xlu1 %1044 }
 0x15d   : > { %v5668_v23 = vpop.permute.xlu0 %1050 }
 0x15e   : > { %1224 = vrot.lane.b32.xlu1 %v8033_v13, %s4714_s29  ;;  %v8036_v13 = vld [vmem:[#allocation52_spill] sm:$0xff] }
 0x15f   : > { %1230 = vrot.lane.b32.xlu0 %v5666_v16, %s4714_s29 }
 0x160   : > { %v5674_v6 = vpop.permute.xlu1 %1048 }
 0x161   : > { %v5676_v14 = vpop.permute.xlu0 %1054 }
 0x162   : > { %1228 = vrot.lane.b32.xlu1 %v8034_v21, %s4714_s29  ;;  %v8038_v21 = vld [vmem:[#allocation54_spill] sm:$0xff] }
 0x163   : > { %1298 = vrot.lane.b32.xlu0 %v8035_v18, %s4715_s30 }
 0x164   : > { %v5684_v49 = vpop.permute.xlu1 %1052 }
 0x165   : > { %v5686_v28 = vpop.permute.xlu0 %1058 }
 0x166   : > { %1232 = vrot.lane.b32.xlu1 %v5680_v12, %s4714_s29 }
 0x167   : > { %1302 = vrot.lane.b32.xlu0 %v8036_v13, %s4715_s30 }
 0x168   : > { %v5692_v46 = vpop.permute.xlu1 %1056 }
 0x169   : > { %v5694_v20 = vpop.permute.xlu0 %1062 }
 0x16a   : > { %8037 = vst [vmem:[#allocation37_spill] sm:$0xff] %v5694_v20  ;;  %1300 = vrot.lane.b32.xlu1 %v8038_v21, %s4715_s30  ;;  %v8046_v21 = vld [vmem:[#allocation64_spill] sm:$0xff] }
 0x16b   : > { %1306 = vrot.lane.b32.xlu0 %v8039_v47, %s4715_s30  ;;  %v8137_v20 = vld [vmem:[#allocation100_spill] sm:$0xff] }
 0x16c   : > { %v5700_v33 = vpop.permute.xlu1 %1060 }
 0x16d   : > { %v5702_v44 = vpop.permute.xlu0 %1066 }
 0x16e   : > { %8040 = vst [vmem:[#allocation39_spill] sm:$0xff] %v5702_v44  ;;  %1304 = vrot.lane.b32.xlu1 %v8041_v22, %s4715_s30  ;;  %v8050_v22 = vld [vmem:[#allocation68_spill] sm:$0xff]  ;;  %v612_v44 = vld [vmem:[#allocation2 + $0x10a] sm:$0xff] }
 0x16f   : > { %1310 = vrot.lane.b32.xlu0 %v8042_v45, %s4715_s30 }
 0x170   : > { %v5708_v13 = vpop.permute.xlu1 %1064 }
 0x171   : > { %8043 = vst [vmem:[#allocation41_spill] sm:$0xff] %v5708_v13  ;;  %v5710_v35 = vpop.permute.xlu0 %1070 }
 0x172   : > { %8044 = vst [vmem:[#allocation45_spill] sm:$0xff] %v5710_v35  ;;  %1308 = vrot.lane.b32.xlu1 %v8045_v42, %s4715_s30  ;;  %v8054_v42 = vld [vmem:[#allocation72_spill] sm:$0xff] }
 0x173   : > { %1314 = vrot.lane.b32.xlu0 %v8046_v21, %s4715_s30  ;;  %v568_v35 = vld [vmem:[#allocation2 + $0x79] sm:$0xff] }
 0x174   : > { %v5716_v47 = vpop.permute.xlu1 %1068 }
 0x175   : > { %8047 = vst [vmem:[#allocation48_spill] sm:$0xff] %v5716_v47  ;;  %v5718_v24 = vpop.permute.xlu0 %1074 }
 0x176   : > { %8048 = vst [vmem:[#allocation52_spill] sm:$0xff] %v5718_v24  ;;  %1312 = vrot.lane.b32.xlu1 %v8049_v43, %s4715_s30  ;;  %v8058_v43 = vld [vmem:[#allocation76_spill] sm:$0xff] }
 0x177   : > { %1318 = vrot.lane.b32.xlu0 %v8050_v22, %s4715_s30 }
 0x178   : > { %v5724_v45 = vpop.permute.xlu1 %1072 }
 0x179   : > { %8051 = vst [vmem:[#allocation54_spill] sm:$0xff] %v5724_v45  ;;  %v5726_v58 = vpop.permute.xlu0 %1078 }
 0x17a   : > { %8052 = vst [vmem:[#allocation56_spill] sm:$0xff] %v5726_v58  ;;  %1316 = vrot.lane.b32.xlu1 %v8053_v40, %s4715_s30  ;;  %v8061_v58 = vld [vmem:[#allocation78_spill] sm:$0xff]  ;;  %v8062_v40 = vld [vmem:[#allocation80_spill] sm:$0xff] }
 0x17b   : > { %1322 = vrot.lane.b32.xlu0 %v8054_v42, %s4715_s30 }
 0x17c   : > { %v5732_v21 = vpop.permute.xlu1 %1076 }
 0x17d   : > { %8055 = vst [vmem:[#allocation58_spill] sm:$0xff] %v5732_v21  ;;  %v5734_v29 = vpop.permute.xlu0 %1082 }
 0x17e   : > { %8056 = vst [vmem:[#allocation60_spill] sm:$0xff] %v5734_v29  ;;  %1320 = vrot.lane.b32.xlu1 %v8057_v41, %s4715_s30  ;;  %v8065_v29 = vld [vmem:[#allocation82_spill] sm:$0xff]  ;;  %v8066_v41 = vld [vmem:[#allocation84_spill] sm:$0xff] }
 0x17f   : > { %1326 = vrot.lane.b32.xlu0 %v8058_v43, %s4715_s30 }
 0x180   : > { %v5740_v22 = vpop.permute.xlu1 %1080 }
 0x181   : > { %8059 = vst [vmem:[#allocation62_spill] sm:$0xff] %v5740_v22  ;;  %v5742_v0 = vpop.permute.xlu0 %1086 }
 0x182   : > { %8060 = vst [vmem:[#allocation64_spill] sm:$0xff] %v5742_v0  ;;  %1324 = vrot.lane.b32.xlu1 %v8061_v58, %s4715_s30  ;;  %v8069_v0 = vld [vmem:[#allocation86_spill] sm:$0xff]  ;;  %v8070_v58 = vld [vmem:[#allocation88_spill] sm:$0xff] }
 0x183   : > { %1330 = vrot.lane.b32.xlu0 %v8062_v40, %s4715_s30 }
 0x184   : > { %v5748_v42 = vpop.permute.xlu1 %1084 }
 0x185   : > { %8063 = vst [vmem:[#allocation66_spill] sm:$0xff] %v5748_v42  ;;  %v5750_v21 = vpop.permute.xlu0 %1090 }
 0x186   : > { %8064 = vst [vmem:[#allocation68_spill] sm:$0xff] %v5750_v21  ;;  %1328 = vrot.lane.b32.xlu1 %v8065_v29, %s4715_s30  ;;  %v8073_v21 = vld [vmem:[#allocation90_spill] sm:$0xff]  ;;  %v8074_v29 = vld [vmem:[#allocation92_spill] sm:$0xff] }
 0x187   : > { %1334 = vrot.lane.b32.xlu0 %v8066_v41, %s4715_s30 }
 0x188   : > { %v5756_v43 = vpop.permute.xlu1 %1088 }
 0x189   : > { %8067 = vst [vmem:[#allocation70_spill] sm:$0xff] %v5756_v43  ;;  %v5758_v22 = vpop.permute.xlu0 %1094 }
 0x18a   : > { %8068 = vst [vmem:[#allocation72_spill] sm:$0xff] %v5758_v22  ;;  %1332 = vrot.lane.b32.xlu1 %v8069_v0, %s4715_s30  ;;  %v8077_v22 = vld [vmem:[#allocation94_spill] sm:$0xff]  ;;  %v8078_v0 = vld [vmem:[#allocation96_spill] sm:$0xff] }
 0x18b   : > { %1338 = vrot.lane.b32.xlu0 %v8070_v58, %s4715_s30 }
 0x18c   : > { %v5764_v40 = vpop.permute.xlu1 %1092 }
 0x18d   : > { %8071 = vst [vmem:[#allocation74_spill] sm:$0xff] %v5764_v40  ;;  %v5766_v42 = vpop.permute.xlu0 %1098 }
 0x18e   : > { %8072 = vst [vmem:[#allocation76_spill] sm:$0xff] %v5766_v42  ;;  %1336 = vrot.lane.b32.xlu1 %v8073_v21, %s4715_s30  ;;  %v8080_v42 = vld [vmem:[#allocation98_spill] sm:$0xff] }
 0x18f   : > { %1342 = vrot.lane.b32.xlu0 %v8074_v29, %s4715_s30 }
 0x190   : > { %v5772_v41 = vpop.permute.xlu1 %1096 }
 0x191   : > { %8075 = vst [vmem:[#allocation78_spill] sm:$0xff] %v5772_v41  ;;  %v5774_v43 = vpop.permute.xlu0 %1102  ;;  %v562_v41 = vld [vmem:[#allocation2 + $0x31] sm:$0xff] }
 0x192   : > { %8076 = vst [vmem:[#allocation80_spill] sm:$0xff] %v5774_v43  ;;  %1340 = vrot.lane.b32.xlu1 %v8077_v22, %s4715_s30  ;;  %v8082_v43 = vld [vmem:[#allocation101_spill] sm:$0xff] }
 0x193   : > { %1346 = vrot.lane.b32.xlu0 %v8078_v0, %s4715_s30  ;;  %v332_v22 = vld [vmem:[%s7806_s1] sm:$0xff]  ;;  %v333_v0 = vld [vmem:[%s7806_s1 + $0x8] sm:$0xff] }
 0x194   : > { %v5780_v58 = vpop.permute.xlu1 %1100 }
 0x195   : > { %8079 = vst [vmem:[#allocation82_spill] sm:$0xff] %v5780_v58  ;;  %v5782_v40 = vpop.permute.xlu0 %1170  ;;  %v4636_v58 = vpack.c.bf16 %v333_v0, %v332_v22  ;;  %v335_v22 = vld [vmem:[%s7806_s1 + $0x18] sm:$0xff] }
 0x196   : > { %1344 = vrot.lane.b32.xlu1 %v8080_v42, %s4715_s30  ;;  %v560_v42 = vld [vmem:[#allocation2 + $0x198] sm:$0xff] }
 0x197   : > { %1350 = vrot.lane.b32.xlu0 %v5392_v5, %s4715_s30  ;;  %4637 = vmatprep.subr.bf16.mxu0 %v4636_v58 }
 0x198   : > { %v5788_v21 = vpop.permute.xlu1 %1104  ;;  %4639 = vmatpush3.bf16.msra.mxu0 %v4636_v58 }
 0x199   : > { %8081 = vst [vmem:[#allocation84_spill] sm:$0xff] %v5788_v21  ;;  %v5790_v29 = vpop.permute.xlu0 %1174 }
 0x19a   : > { %1348 = vrot.lane.b32.xlu1 %v8082_v43, %s4715_s30  ;;  %v334_v43 = vld [vmem:[%s7806_s1 + $0x10] sm:$0xff] }
 0x19b   : > { %1354 = vrot.lane.b32.xlu0 %v5400_v10, %s4715_s30  ;;  %v4640_v0 = vpack.c.bf16 %v335_v22, %v334_v43  ;;  %v564_v43 = vld [vmem:[#allocation2 + $0x49] sm:$0xff] }
 0x19c   : > { %v5802_v5 = vpop.permute.xlu1 %1172 }
 0x19d   : > { %v5804_v21 = vpop.permute.xlu0 %1178  ;;  %4641 = vmatprep.subr.bf16.mxu0 %v4640_v0 }
 0x19e   : > { %1352 = vrot.lane.b32.xlu1 %v5410_v2, %s4715_s30  ;;  %4643 = vmatpush3.bf16.msra.mxu0 %v4640_v0  ;;  %v561_v2 = vld [vmem:[#allocation2 + $0x1a0] sm:$0xff] }
 0x19f   : > { %1358 = vrot.lane.b32.xlu0 %v560_v42, %s4715_s30  ;;  %v336_v42 = vld [vmem:[%s7806_s1 + $0x20] sm:$0xf] }
 0x1a0   : > { %v5815_v10 = vpop.permute.xlu1 %1176  ;;  %4528 = vmatprep.subr.msk.mxu0 %vm2017_vm3, %v336_v42  ;;  %v566_v0 = vld [vmem:[#allocation2 + $0x61] sm:$0xff] }
 0x1a1   : > { %v5817_v32 = vpop.permute.xlu0 %1182 }
 0x1a2   : > { %1356 = vrot.lane.b32.xlu1 %v5416_v4, %s4715_s30  ;;  %4529 = vmatpush3.msk.msra.mxu0 %vm2017_vm3, %v336_v42  ;;  %v563_v4 = vld [vmem:[#allocation2 + $0x39] sm:$0xff] }
 0x1a3   : > { %1426 = vrot.lane.b32.xlu0 %v562_v41, %s4716_s14 }
 0x1a4   : > { %v5822_v58 = vpop.permute.xlu1 %1180 }
 0x1a5   : > { %v5828_v22 = vpop.permute.xlu0 %1186 }
 0x1a6   : > { %1360 = vrot.lane.b32.xlu1 %v561_v2, %s4715_s30  ;;  %v594_v2 = vld [vmem:[#allocation2 + $0x32] sm:$0xff] }
 0x1a7   : > { %1430 = vrot.lane.b32.xlu0 %v564_v43, %s4716_s14  ;;  %v597_v43 = vld [vmem:[#allocation2 + $0x52] sm:$0xff] }
 0x1a8   : > { %v5833_v41 = vpop.permute.xlu1 %1184 }
 0x1a9   : > { %v5835_v37 = vpop.permute.xlu0 %1190 }
 0x1aa   : > { %8083 = vst [vmem:[#allocation86_spill] sm:$0xff] %v5835_v37  ;;  %1428 = vrot.lane.b32.xlu1 %v563_v4, %s4716_s14  ;;  %v596_v4 = vld [vmem:[#allocation2 + $0x4a] sm:$0xff] }
 0x1ab   : > { %1434 = vrot.lane.b32.xlu0 %v566_v0, %s4716_s14  ;;  %v8134_v37 = vld [vmem:[#allocation95_spill] sm:$0xff] }
 0x1ac   : > { %v5839_v24 = vpop.permute.xlu1 %1188 }
 0x1ad   : > { %8084 = vst [vmem:[#allocation88_spill] sm:$0xff] %v5839_v24  ;;  %v5841_v45 = vpop.permute.xlu0 %1194 }
 0x1ae   : > { %8085 = vst [vmem:[#allocation90_spill] sm:$0xff] %v5841_v45  ;;  %1432 = vrot.lane.b32.xlu1 %v565_v38, %s4716_s14  ;;  %v567_v38 = vld [vmem:[#allocation2 + $0x69] sm:$0xff] }
 0x1af   : > { %1556 = vrot.lane.b32.xlu0 %v595_v39, %s4717_s17 }
 0x1b0   : > { %v5845_v42 = vpop.permute.xlu1 %1192 }
 0x1b1   : > { %8086 = vst [vmem:[#allocation92_spill] sm:$0xff] %v5845_v42  ;;  %v5847_v30 = vpop.permute.xlu0 %1198 }
 0x1b2   : > { %8087 = vst [vmem:[#allocation94_spill] sm:$0xff] %v5847_v30  ;;  %1554 = vrot.lane.b32.xlu1 %v594_v2, %s4717_s17  ;;  %v599_v2 = vld [vmem:[#allocation2 + $0x6a] sm:$0xff]  ;;  %v600_v30 = vld [vmem:[#allocation2 + $0x7a] sm:$0xff] }
 0x1b3   : > { %1560 = vrot.lane.b32.xlu0 %v597_v43, %s4717_s17 }
 0x1b4   : > { %v5851_v0 = vpop.permute.xlu1 %1196 }
 0x1b5   : > { %8088 = vst [vmem:[#allocation96_spill] sm:$0xff] %v5851_v0  ;;  %v5853_v31 = vpop.permute.xlu0 %1202 }
 0x1b6   : > { %8089 = vst [vmem:[#allocation98_spill] sm:$0xff] %v5853_v31  ;;  %1558 = vrot.lane.b32.xlu1 %v596_v4, %s4717_s17  ;;  %v569_v4 = vld [vmem:[#allocation2 + $0x81] sm:$0xff]  ;;  %v570_v31 = vld [vmem:[#allocation2 + $0x91] sm:$0xff] }
 0x1b7   : > { %1562 = vrot.lane.b32.xlu0 %v598_v34, %s4717_s17 }
 0x1b8   : > { %v5857_v39 = vpop.permute.xlu1 %1200 }
 0x1b9   : > { %8090 = vst [vmem:[#allocation101_spill] sm:$0xff] %v5857_v39  ;;  %v5859_v48 = vpop.permute.xlu0 %1206 }
 0x1ba   : > { %8091 = vst [vmem:[#allocation149_spill] sm:$0xff] %v5859_v48  ;;  %1436 = vrot.lane.b32.xlu1 %v567_v38, %s4716_s14  ;;  %v601_v38 = vld [vmem:[#allocation2 + $0x82] sm:$0xff]  ;;  %v602_v48 = vld [vmem:[#allocation2 + $0x92] sm:$0xff] }
 0x1bb   : > { %1438 = vrot.lane.b32.xlu0 %v568_v35, %s4716_s14 }
 0x1bc   : > { %v5863_v43 = vpop.permute.xlu1 %1204 }
 0x1bd   : > { %8092 = vst [vmem:[#allocation150_spill] sm:$0xff] %v5863_v43  ;;  %v5865_v0 = vpop.permute.xlu0 %1210 }
 0x1be   : > { %8093 = vst [vmem:[#allocation151_spill] sm:$0xff] %v5865_v0  ;;  %1564 = vrot.lane.b32.xlu1 %v599_v2, %s4717_s17  ;;  %v571_v2 = vld [vmem:[#allocation2 + $0x99] sm:$0xff]  ;;  %v572_v0 = vld [vmem:[#allocation2 + $0xa9] sm:$0xff] }
 0x1bf   : > { %1566 = vrot.lane.b32.xlu0 %v600_v30, %s4717_s17 }
 0x1c0   : > { %v5869_v34 = vpop.permute.xlu1 %1208 }
 0x1c1   : > { %8094 = vst [vmem:[#allocation152_spill] sm:$0xff] %v5869_v34  ;;  %v5871_v39 = vpop.permute.xlu0 %1214 }
 0x1c2   : > { %8095 = vst [vmem:[#allocation153_spill] sm:$0xff] %v5871_v39  ;;  %1440 = vrot.lane.b32.xlu1 %v569_v4, %s4716_s14  ;;  %v603_v4 = vld [vmem:[#allocation2 + $0x9a] sm:$0xff]  ;;  %v604_v39 = vld [vmem:[#allocation2 + $0xaa] sm:$0xff] }
 0x1c3   : > { %1442 = vrot.lane.b32.xlu0 %v570_v31, %s4716_s14 }
 0x1c4   : > { %v5875_v35 = vpop.permute.xlu1 %1212 }
 0x1c5   : > { %8096 = vst [vmem:[#allocation154_spill] sm:$0xff] %v5875_v35  ;;  %v5877_v43 = vpop.permute.xlu0 %1218 }
 0x1c6   : > { %8097 = vst [vmem:[#allocation155_spill] sm:$0xff] %v5877_v43  ;;  %1568 = vrot.lane.b32.xlu1 %v601_v38, %s4717_s17  ;;  %v573_v38 = vld [vmem:[#allocation2 + $0xb1] sm:$0xff]  ;;  %v574_v43 = vld [vmem:[#allocation2 + $0xc1] sm:$0xff] }
 0x1c7   : > { %1570 = vrot.lane.b32.xlu0 %v602_v48, %s4717_s17 }
 0x1c8   : > { %v5881_v30 = vpop.permute.xlu1 %1216 }
 0x1c9   : > { %8098 = vst [vmem:[#allocation156_spill] sm:$0xff] %v5881_v30  ;;  %v5883_v34 = vpop.permute.xlu0 %1222 }
 0x1ca   : > { %8099 = vst [vmem:[#allocation157_spill] sm:$0xff] %v5883_v34  ;;  %1444 = vrot.lane.b32.xlu1 %v571_v2, %s4716_s14  ;;  %v605_v2 = vld [vmem:[#allocation2 + $0xb2] sm:$0xff]  ;;  %v606_v34 = vld [vmem:[#allocation2 + $0xc2] sm:$0xff] }
 0x1cb   : > { %1446 = vrot.lane.b32.xlu0 %v572_v0, %s4716_s14 }
 0x1cc   : > { %v5887_v31 = vpop.permute.xlu1 %1220 }
 0x1cd   : > { %8100 = vst [vmem:[#allocation158_spill] sm:$0xff] %v5887_v31  ;;  %v5889_v35 = vpop.permute.xlu0 %1226 }
 0x1ce   : > { %8101 = vst [vmem:[#allocation159_spill] sm:$0xff] %v5889_v35  ;;  %1572 = vrot.lane.b32.xlu1 %v603_v4, %s4717_s17  ;;  %v575_v4 = vld [vmem:[#allocation2 + $0xc9] sm:$0xff]  ;;  %v576_v35 = vld [vmem:[#allocation2 + $0xd9] sm:$0xff] }
 0x1cf   : > { %1574 = vrot.lane.b32.xlu0 %v604_v39, %s4717_s17 }
 0x1d0   : > { %v5893_v48 = vpop.permute.xlu1 %1224 }
 0x1d1   : > { %8102 = vst [vmem:[#allocation160_spill] sm:$0xff] %v5893_v48  ;;  %v5895_v30 = vpop.permute.xlu0 %1230 }
 0x1d2   : > { %8103 = vst [vmem:[#allocation161_spill] sm:$0xff] %v5895_v30  ;;  %1448 = vrot.lane.b32.xlu1 %v573_v38, %s4716_s14  ;;  %v607_v38 = vld [vmem:[#allocation2 + $0xca] sm:$0xff]  ;;  %v608_v30 = vld [vmem:[#allocation2 + $0xda] sm:$0xff] }
 0x1d3   : > { %1450 = vrot.lane.b32.xlu0 %v574_v43, %s4716_s14 }
 0x1d4   : > { %v5899_v0 = vpop.permute.xlu1 %1228 }
 0x1d5   : > { %8104 = vst [vmem:[#allocation162_spill] sm:$0xff] %v5899_v0  ;;  %v5901_v31 = vpop.permute.xlu0 %1298 }
 0x1d6   : > { %1576 = vrot.lane.b32.xlu1 %v605_v2, %s4717_s17  ;;  %v577_v2 = vld [vmem:[#allocation2 + $0xe1] sm:$0xff] }
 0x1d7   : > { %1578 = vrot.lane.b32.xlu0 %v606_v34, %s4717_s17 }
 0x1d8   : > { %v5905_v39 = vpop.permute.xlu1 %1232 }
 0x1d9   : > { %8105 = vst [vmem:[#allocation163_spill] sm:$0xff] %v5905_v39  ;;  %v5907_v48 = vpop.permute.xlu0 %1302  ;;  %v578_v39 = vld [vmem:[#allocation2 + $0xf1] sm:$0xff] }
 0x1da   : > { %1452 = vrot.lane.b32.xlu1 %v575_v4, %s4716_s14  ;;  %v609_v4 = vld [vmem:[#allocation2 + $0xe2] sm:$0xff] }
 0x1db   : > { %1454 = vrot.lane.b32.xlu0 %v576_v35, %s4716_s14 }
 0x1dc   : > { %v5911_v43 = vpop.permute.xlu1 %1300 }
 0x1dd   : > { %v5913_v0 = vpop.permute.xlu0 %1306 }
 0x1de   : > { %1580 = vrot.lane.b32.xlu1 %v607_v38, %s4717_s17  ;;  %v579_v38 = vld [vmem:[#allocation2 + $0xf9] sm:$0xff] }
 0x1df   : > { %1582 = vrot.lane.b32.xlu0 %v608_v30, %s4717_s17 }
 0x1e0   : > { %v5917_v34 = vpop.permute.xlu1 %1304 }
 0x1e1   : > { %v5919_v47 = vpop.permute.xlu0 %1310 }
 0x1e2   : > { %1456 = vrot.lane.b32.xlu1 %v577_v2, %s4716_s14  ;;  %v611_v2 = vld [vmem:[#allocation2 + $0xfa] sm:$0xff] }
 0x1e3   : > { %1458 = vrot.lane.b32.xlu0 %v578_v39, %s4716_s14 }
 0x1e4   : > { %v5923_v35 = vpop.permute.xlu1 %1308 }
 0x1e5   : > { %v5925_v36 = vpop.permute.xlu0 %1314 }
 0x1e6   : > { %1584 = vrot.lane.b32.xlu1 %v609_v4, %s4717_s17  ;;  %v581_v4 = vld [vmem:[#allocation2 + $0x111] sm:$0xff] }
 0x1e7   : > { %1586 = vrot.lane.b32.xlu0 %v610_v9, %s4717_s17 }
 0x1e8   : > { %v5929_v30 = vpop.permute.xlu1 %1312 }
 0x1e9   : > { %v5931_v45 = vpop.permute.xlu0 %1318 }
 0x1ea   : > { %8106 = vst [vmem:[#allocation164_spill] sm:$0xff] %v5931_v45  ;;  %1460 = vrot.lane.b32.xlu1 %v579_v38, %s4716_s14  ;;  %v613_v38 = vld [vmem:[#allocation2 + $0x112] sm:$0xff] }
 0x1eb   : > { %1462 = vrot.lane.b32.xlu0 %v580_v27, %s4716_s14  ;;  %v8133_v45 = vld [vmem:[#allocation40_spill] sm:$0xff] }
 0x1ec   : > { %v5935_v39 = vpop.permute.xlu1 %1316 }
 0x1ed   : > { %8107 = vst [vmem:[#allocation165_spill] sm:$0xff] %v5935_v39  ;;  %v5937_v42 = vpop.permute.xlu0 %1322 }
 0x1ee   : > { %8108 = vst [vmem:[#allocation166_spill] sm:$0xff] %v5937_v42  ;;  %1588 = vrot.lane.b32.xlu1 %v611_v2, %s4717_s17  ;;  %v583_v2 = vld [vmem:[#allocation2 + $0x129] sm:$0xff]  ;;  %v584_v42 = vld [vmem:[#allocation2 + $0x139] sm:$0xff] }
 0x1ef   : > { %1590 = vrot.lane.b32.xlu0 %v612_v44, %s4717_s17 }
 0x1f0   : > { %v5941_v9 = vpop.permute.xlu1 %1320 }
 0x1f1   : > { %8109 = vst [vmem:[#allocation167_spill] sm:$0xff] %v5941_v9  ;;  %v5943_v13 = vpop.permute.xlu0 %1326 }
 0x1f2   : > { %8110 = vst [vmem:[#allocation168_spill] sm:$0xff] %v5943_v13  ;;  %1464 = vrot.lane.b32.xlu1 %v581_v4, %s4716_s14  ;;  %v615_v4 = vld [vmem:[#allocation2 + $0x12a] sm:$0xff]  ;;  %v616_v13 = vld [vmem:[#allocation2 + $0x13a] sm:$0xff] }
 0x1f3   : > { %1466 = vrot.lane.b32.xlu0 %v582_v8, %s4716_s14 }
 0x1f4   : > { %v5947_v27 = vpop.permute.xlu1 %1324 }
 0x1f5   : > { %8111 = vst [vmem:[#allocation169_spill] sm:$0xff] %v5947_v27  ;;  %v5949_v62 = vpop.permute.xlu0 %1330 }
 0x1f6   : > { %8112 = vst [vmem:[#allocation170_spill] sm:$0xff] %v5949_v62  ;;  %1592 = vrot.lane.b32.xlu1 %v613_v38, %s4717_s17  ;;  %v585_v38 = vld [vmem:[#allocation2 + $0x141] sm:$0xff]  ;;  %v586_v62 = vld [vmem:[#allocation2 + $0x151] sm:$0xff] }
 0x1f7   : > { %1594 = vrot.lane.b32.xlu0 %v614_v3, %s4717_s17 }
 0x1f8   : > { %v5953_v44 = vpop.permute.xlu1 %1328 }
 0x1f9   : > { %8113 = vst [vmem:[#allocation171_spill] sm:$0xff] %v5953_v44  ;;  %v5955_v9 = vpop.permute.xlu0 %1334 }
 0x1fa   : > { %8114 = vst [vmem:[#allocation172_spill] sm:$0xff] %v5955_v9  ;;  %1468 = vrot.lane.b32.xlu1 %v583_v2, %s4716_s14  ;;  %v617_v2 = vld [vmem:[#allocation2 + $0x142] sm:$0xff]  ;;  %v618_v9 = vld [vmem:[#allocation2 + $0x152] sm:$0xff] }
 0x1fb   : > { %1470 = vrot.lane.b32.xlu0 %v584_v42, %s4716_s14 }
 0x1fc   : > { %v5959_v8 = vpop.permute.xlu1 %1332 }
 0x1fd   : > { %8115 = vst [vmem:[#allocation173_spill] sm:$0xff] %v5959_v8  ;;  %v5961_v27 = vpop.permute.xlu0 %1338 }
 0x1fe   : > { %8116 = vst [vmem:[#allocation174_spill] sm:$0xff] %v5961_v27  ;;  %1596 = vrot.lane.b32.xlu1 %v615_v4, %s4717_s17  ;;  %v587_v4 = vld [vmem:[#allocation2 + $0x159] sm:$0xff]  ;;  %v588_v27 = vld [vmem:[#allocation2 + $0x169] sm:$0xff] }
 0x1ff   : > { %1598 = vrot.lane.b32.xlu0 %v616_v13, %s4717_s17 }
 0x200   : > { %v5965_v3 = vpop.permute.xlu1 %1336 }
 0x201   : > { %8117 = vst [vmem:[#allocation175_spill] sm:$0xff] %v5965_v3  ;;  %v5967_v44 = vpop.permute.xlu0 %1342 }
 0x202   : > { %8118 = vst [vmem:[#allocation176_spill] sm:$0xff] %v5967_v44  ;;  %1472 = vrot.lane.b32.xlu1 %v585_v38, %s4716_s14  ;;  %v619_v38 = vld [vmem:[#allocation2 + $0x15a] sm:$0xff]  ;;  %v620_v44 = vld [vmem:[#allocation2 + $0x16a] sm:$0xff] }
 0x203   : > { %1474 = vrot.lane.b32.xlu0 %v586_v62, %s4716_s14 }
 0x204   : > { %v5971_v42 = vpop.permute.xlu1 %1340 }
 0x205   : > { %8119 = vst [vmem:[#allocation177_spill] sm:$0xff] %v5971_v42  ;;  %v5973_v8 = vpop.permute.xlu0 %1346 }
 0x206   : > { %8120 = vst [vmem:[#allocation178_spill] sm:$0xff] %v5973_v8  ;;  %1600 = vrot.lane.b32.xlu1 %v617_v2, %s4717_s17  ;;  %v589_v2 = vld [vmem:[#allocation2 + $0x171] sm:$0xff] }
 0x207   : > { %1602 = vrot.lane.b32.xlu0 %v618_v9, %s4717_s17 }
 0x208   : > { %v5977_v13 = vpop.permute.xlu1 %1344 }
 0x209   : > { %8121 = vst [vmem:[#allocation179_spill] sm:$0xff] %v5977_v13  ;;  %v5979_v3 = vpop.permute.xlu0 %1350  ;;  %v8132_v13 = vld [vmem:[#allocation44_spill] sm:$0xff] }
 0x20a   : > { %8122 = vst [vmem:[#allocation180_spill] sm:$0xff] %v5979_v3  ;;  %1476 = vrot.lane.b32.xlu1 %v587_v4, %s4716_s14  ;;  %v621_v4 = vld [vmem:[#allocation2 + $0x172] sm:$0xff] }
 0x20b   : > { %1478 = vrot.lane.b32.xlu0 %v588_v27, %s4716_s14 }
 0x20c   : > { %v5983_v62 = vpop.permute.xlu1 %1348 }
 0x20d   : > { %8123 = vst [vmem:[#allocation181_spill] sm:$0xff] %v5983_v62  ;;  %v5985_v42 = vpop.permute.xlu0 %1354  ;;  %v8130_v62 = vld [vmem:[#allocation36_spill] sm:$0xff] }
 0x20e   : > { %8124 = vst [vmem:[#allocation182_spill] sm:$0xff] %v5985_v42  ;;  %1604 = vrot.lane.b32.xlu1 %v619_v38, %s4717_s17 }
 0x20f   : > { %1606 = vrot.lane.b32.xlu0 %v620_v44, %s4717_s17  ;;  %v592_v44 = vld [vmem:[#allocation2 + $0x199] sm:$0xff] }
 0x210   : > { %v5989_v9 = vpop.permute.xlu1 %1352 }
 0x211   : > { %8125 = vst [vmem:[#allocation183_spill] sm:$0xff] %v5989_v9  ;;  %v5991_v8 = vpop.permute.xlu0 %1358  ;;  %v8129_v9 = vld [vmem:[#allocation35_spill] sm:$0xff] }
 0x212   : > { %8126 = vst [vmem:[#allocation184_spill] sm:$0xff] %v5991_v8  ;;  %1480 = vrot.lane.b32.xlu1 %v589_v2, %s4716_s14  ;;  %v337_v2 = vld [vmem:[#allocation2] sm:$0xff]  ;;  %v338_v8 = vld [vmem:[#allocation2 + $0x8] sm:$0xff] }
 0x213   : > { %1482 = vrot.lane.b32.xlu0 %v5534_v56, %s4716_s14 }
 0x214   : > { %v5996_v27 = vpop.permute.xlu1 %1356 }
 0x215   : > { %8127 = vst [vmem:[#allocation185_spill] sm:$0xff] %v5996_v27  ;;  %v1427_v3 = vpop.permute.xlu0 %1426  ;;  %v624_v27 = vld [vmem:[#allocation2 + $0x19a] sm:$0xff] }
 0x216   : > { %1608 = vrot.lane.b32.xlu1 %v621_v4, %s4717_s17  ;;  %v1650_v4 = vsel %vm257_vm0, %v337_v2, %v8129_v9  ;;  %v593_v9 = vld [vmem:[#allocation2 + $0x1a1] sm:$0xff] }
 0x217   : > { %1610 = vrot.lane.b32.xlu0 %v5666_v16, %s4717_s17  ;;  %v1651_v16 = vsel %vm257_vm0, %v338_v8, %v8130_v62  ;;  %v1683_v39 = vsel %vm1682_vm4, %v1650_v4, %v8134_v37  ;;  %v8135_v2 = vld [vmem:[#allocation42_spill] sm:$0xff] }
 0x218   : > { %v6001_v38 = vpop.permute.xlu1 %1360  ;;  %v8136_v8 = vld [vmem:[#allocation50_spill] sm:$0xff]  ;;  %v1716_v24 = vsel %vm1715_vm5, %v1683_v39, %v5518_v52 }
 0x219   : > { %8128 = vst [vmem:[#allocation186_spill] sm:$0xff] %v6001_v38  ;;  %v1431_v42 = vpop.permute.xlu0 %1430  ;;  %v1653_v62 = vsel %vm257_vm0, %v8136_v8, %v8135_v2  ;;  %v1749_v4 = vsel %vm1748_vm6, %v1716_v24, %v5650_v19  ;;  %v625_v19 = vld [vmem:[#allocation2 + $0x1a2] sm:$0xff] }
 0x21a   : > { %1484 = vrot.lane.b32.xlu1 %v5548_v60, %s4716_s14  ;;  %v8131_v60 = vld [vmem:[#allocation38_spill] sm:$0xff] }
 0x21b   : > { %1486 = vrot.lane.b32.xlu0 %v592_v44, %s4716_s14  ;;  %v1652_v26 = vsel %vm257_vm0, %v8132_v13, %v8131_v60  ;;  %v1654_v44 = vsel %vm257_vm0, %v8035_v18, %v8133_v45  ;;  %v8138_v18 = vld [vmem:[#allocation99_spill] sm:$0xff]  ;;  %v8139_v60 = vld [vmem:[#allocation102_spill] sm:$0xff] }
 0x21c   : > { %v1429_v56 = vpop.permute.xlu1 %1428  ;;  %v1685_v45 = vsel %vm1682_vm4, %v1652_v26, %v8138_v18 }
 0x21d   : > { %v1435_v38 = vpop.permute.xlu0 %1434 }
 0x21e   : > { %1612 = vrot.lane.b32.xlu1 %v5680_v12, %s4717_s17  ;;  %v1684_v12 = vsel %vm1682_vm4, %v1651_v16, %v8137_v20  ;;  %v1687_v20 = vsel %vm1682_vm4, %v1654_v44, %v8139_v60  ;;  %v8140_v16 = vld [vmem:[#allocation103_spill] sm:$0xff]  ;;  %v1718_v44 = vsel %vm1715_vm5, %v1685_v45, %v5526_v54 }
 0x21f   : > { %1614 = vrot.lane.b32.xlu0 %v624_v27, %s4717_s17  ;;  %v1717_v37 = vsel %vm1715_vm5, %v1684_v12, %v5532_v55  ;;  %v1686_v52 = vsel %vm1682_vm4, %v1653_v62, %v8140_v16  ;;  %v1782_v27 = vsel %vm1781_vm7, %v1749_v4, %v5782_v40  ;;  %v8143_v16 = vld [vmem:[#allocation43_spill] sm:$0xff] }
 0x220   : > { %v1433_v13 = vpop.permute.xlu1 %1432  ;;  %v1750_v39 = vsel %vm1748_vm6, %v1717_v37, %v5664_v15  ;;  %v1815_v24 = vsel %vm1814_vm8, %v1782_v27, %v5901_v31  ;;  %v1720_v15 = vsel %vm1715_vm5, %v1687_v20, %v5536_v50  ;;  %v1751_v31 = vsel %vm1748_vm6, %v1718_v44, %v5658_v17  ;;  %v4669_v37 = vld [vmem:[#allocation2 + $0x38] sm:$0xff] }
 0x221   : > { %v1557_v26 = vpop.permute.xlu0 %1556  ;;  %v1783_v55 = vsel %vm1781_vm7, %v1750_v39, %v5802_v5  ;;  %v1719_v5 = vsel %vm1715_vm5, %v1686_v52, %v5542_v57  ;;  %v1784_v50 = vsel %vm1781_vm7, %v1751_v31, %v5790_v29  ;;  %v1753_v57 = vsel %vm1748_vm6, %v1720_v15, %v5668_v23  ;;  %v8144_v27 = vld [vmem:[#allocation104_spill] sm:$0xff] }
 0x222   : > { %1488 = vrot.lane.b32.xlu1 %v593_v9, %s4716_s14  ;;  %v1816_v40 = vsel %vm1814_vm8, %v1783_v55, %v5911_v43  ;;  %v1848_v9 = vsel %vm1847_vm9, %v1815_v24, %v1427_v3  ;;  %v1752_v54 = vsel %vm1748_vm6, %v1719_v5, %v5674_v6  ;;  %v1786_v6 = vsel %vm1781_vm7, %v1753_v57, %v5804_v21  ;;  %v4671_v5 = vld [vmem:[#allocation2 + $0x50] sm:$0xff] }
 0x223   : > { %v1849_v8 = vsel %vm1847_vm9, %v1816_v40, %v1429_v56  ;;  %v1785_v17 = vsel %vm1781_vm7, %v1752_v54, %v5815_v10  ;;  %v1817_v56 = vsel %vm1814_vm8, %v1784_v50, %v5907_v48  ;;  %v1819_v23 = vsel %vm1814_vm8, %v1786_v6, %v5913_v0  ;;  %v8141_v48 = vld [vmem:[#allocation46_spill] sm:$0xff]  ;;  %v8146_v54 = vld [vmem:[#allocation47_spill] sm:$0xff] }
 0x224   : > { %v1555_v2 = vpop.permute.xlu1 %1554  ;;  %v1882_v43 = vsel %vm1880_vm10, %v1849_v8, %v1557_v26  ;;  %v1818_v29 = vsel %vm1814_vm8, %v1785_v17, %v5917_v34  ;;  %v1850_v12 = vsel %vm1847_vm9, %v1817_v56, %v1431_v42  ;;  %v1655_v4 = vsel %vm257_vm0, %v4669_v37, %v8141_v48  ;;  %v8142_v34 = vld [vmem:[#allocation105_spill] sm:$0xff]  ;;  %v4674_v48 = vld [vmem:[#allocation2 + $0x78] sm:$0xff] }
 0x225   : > { %v1881_v62 = vsel %vm1880_vm10, %v1848_v9, %v1555_v2  ;;  %v1561_v3 = vpop.permute.xlu0 %1560  ;;  %v1851_v45 = vsel %vm1847_vm9, %v1818_v29, %v1433_v13  ;;  %v1852_v60 = vsel %vm1847_vm9, %v1819_v23, %v1435_v38  ;;  %v1688_v42 = vsel %vm1682_vm4, %v1655_v4, %v8142_v34  ;;  %v4670_v13 = vld [vmem:[#allocation2 + $0x48] sm:$0xff]  ;;  %v8149_v4 = vld [vmem:[#allocation51_spill] sm:$0xff] }
 0x226   : > { %1616 = vrot.lane.b32.xlu1 %v625_v19, %s4717_s17  ;;  %4530 = vmatprep.mubr.msk.f32.mxu0 %vm1920_vm11, %v1881_v62  ;;  %v1884_v21 = vsel %vm1880_vm10, %v1851_v45, %v1561_v3  ;;  %v1656_v52 = vsel %vm257_vm0, %v4670_v13, %v8143_v16  ;;  %v1721_v39 = vsel %vm1715_vm5, %v1688_v42, %v5552_v61  ;;  %v4672_v62 = vld [vmem:[#allocation2 + $0x60] sm:$0xff]  ;;  %v8147_v3 = vld [vmem:[#allocation106_spill] sm:$0xff]  ;;  %v8150_v42 = vld [vmem:[#allocation88_spill] sm:$0xff] }
 0x227   : > { %4531 = vmatmul.mubr.msk.f32.vlgmr.msra.gmra.mrb[0].mxu0 %vm1920_vm11, %v1882_v43  ;;  %v1689_v26 = vsel %vm1682_vm4, %v1656_v52, %v8144_v27  ;;  %v1754_v55 = vsel %vm1748_vm6, %v1721_v39, %v5684_v49  ;;  %v4673_v45 = vld [vmem:[#allocation2 + $0x68] sm:$0xff]  ;;  %v8151_v16 = vld [vmem:[#allocation37_spill] sm:$0xff] }
 0x228   : > { %v1559_v18 = vpop.permute.xlu1 %1558  ;;  %v1722_v24 = vsel %vm1715_vm5, %v1689_v26, %v5544_v59  ;;  %v1787_v19 = vsel %vm1781_vm7, %v1754_v55, %v5822_v58  ;;  %v8145_v58 = vld [vmem:[#allocation49_spill] sm:$0xff] }
 0x229   : > { %v1883_v10 = vsel %vm1880_vm10, %v1850_v12, %v1559_v18  ;;  %v1563_v20 = vpop.permute.xlu0 %1562  ;;  %v1755_v15 = vsel %vm1748_vm6, %v1722_v24, %v5676_v14  ;;  %v1820_v61 = vsel %vm1814_vm8, %v1787_v19, %v5923_v35  ;;  %v1657_v31 = vsel %vm257_vm0, %v4671_v5, %v8145_v58  ;;  %v4675_v24 = vld [vmem:[#allocation2 + $0x80] sm:$0xff] }
 0x22a   : > { %4533 = vmatprep.mubr.msk.f32.mxu0 %vm1920_vm11, %v1883_v10  ;;  %v1885_v0 = vsel %vm1880_vm10, %v1852_v60, %v1563_v20  ;;  %v1788_v40 = vsel %vm1781_vm7, %v1755_v15, %v5817_v32  ;;  %v1690_v32 = vsel %vm1682_vm4, %v1657_v31, %v5428_v1  ;;  %v8155_v19 = vld [vmem:[#allocation57_spill] sm:$0xff] }
 0x22b   : > { %4534 = vmatmul.mubr.msk.f32.gmra.mrb[2].mxu0 %vm1920_vm11, %v1884_v21  ;;  %v1821_v49 = vsel %vm1814_vm8, %v1788_v40, %v5919_v47  ;;  %v1658_v47 = vsel %vm257_vm0, %v4672_v62, %v8146_v54  ;;  %v1723_v50 = vsel %vm1715_vm5, %v1690_v32, %v5560_v63  ;;  %v8156_v40 = vld [vmem:[#allocation108_spill] sm:$0xff]  ;;  %v8158_v58 = vld [vmem:[#allocation129_spill] sm:$0xff] }
 0x22c   : > { %v1437_v38 = vpop.permute.xlu1 %1436  ;;  %4536 = vmatprep.mubr.msk.f32.mxu0 %vm1920_vm11, %v1885_v0  ;;  %v1691_v57 = vsel %vm1682_vm4, %v1658_v47, %v8147_v3  ;;  %v1756_v17 = vsel %vm1748_vm6, %v1723_v50, %v5692_v46  ;;  %v8161_v54 = vld [vmem:[#allocation128_spill] sm:$0xff] }
 0x22d   : > { %v1439_v44 = vpop.permute.xlu0 %1438  ;;  %v1853_v9 = vsel %vm1847_vm9, %v1820_v61, %v1437_v38  ;;  %v1724_v1 = vsel %vm1715_vm5, %v1691_v57, %v5554_v53  ;;  %v1789_v56 = vsel %vm1781_vm7, %v1756_v17, %v5833_v41  ;;  %v8148_v41 = vld [vmem:[#allocation53_spill] sm:$0xff]  ;;  %v8153_v38 = vld [vmem:[#allocation86_spill] sm:$0xff]  ;;  %v8162_v50 = vld [vmem:[#allocation92_spill] sm:$0xff] }
 0x22e   : > { %v1854_v14 = vsel %vm1847_vm9, %v1821_v49, %v1439_v44  ;;  %v1757_v29 = vsel %vm1748_vm6, %v1724_v1, %v5686_v28  ;;  %v1822_v63 = vsel %vm1814_vm8, %v1789_v56, %v5929_v30  ;;  %v1659_v10 = vsel %vm257_vm0, %v4673_v45, %v8148_v41  ;;  %v4676_v49 = vld [vmem:[#allocation2 + $0x90] sm:$0xff]  ;;  %v8167_v45 = vld [vmem:[#allocation61_spill] sm:$0xff] }
 0x22f   : > { %v1790_v12 = vsel %vm1781_vm7, %v1757_v29, %v5828_v22  ;;  %v1692_v22 = vsel %vm1682_vm4, %v1659_v10, %v5436_v25  ;;  %v1661_v44 = vsel %vm257_vm0, %v4675_v24, %v8155_v19  ;;  %v8163_v57 = vld [vmem:[#allocation39_spill] sm:$0xff]  ;;  %v8178_v19 = vld [vmem:[#allocation168_spill] sm:$0xff] }
 0x230   : > { %v1565_v2 = vpop.permute.xlu1 %1564  ;;  %v1823_v46 = vsel %vm1814_vm8, %v1790_v12, %v5925_v36  ;;  %v1660_v36 = vsel %vm257_vm0, %v4674_v48, %v8149_v4  ;;  %v1725_v60 = vsel %vm1715_vm5, %v1692_v22, %v5568_v7  ;;  %v8152_v7 = vld [vmem:[#allocation165_spill] sm:$0xff]  ;;  %v8164_v1 = vld [vmem:[#allocation167_spill] sm:$0xff]  ;;  %v4678_v48 = vld [vmem:[#allocation2 + $0xa8] sm:$0xff] }
 0x231   : > { %v1886_v59 = vsel %vm1880_vm10, %v1853_v9, %v1565_v2  ;;  %v1567_v8 = vpop.permute.xlu0 %1566  ;;  %v1693_v20 = vsel %vm1682_vm4, %v1660_v36, %v5430_v11  ;;  %v1758_v34 = vsel %vm1748_vm6, %v1725_v60, %v5700_v33  ;;  %v8154_v33 = vld [vmem:[#allocation164_spill] sm:$0xff]  ;;  %v1694_v9 = vsel %vm1682_vm4, %v1661_v44, %v8156_v40  ;;  %v8169_v4 = vld [vmem:[#allocation59_spill] sm:$0xff]  ;;  %v8179_v40 = vld [vmem:[#allocation65_spill] sm:$0xff] }
 0x232   : > { %4537 = vmatmul.mubr.msk.f32.gmra.mrb[4].mxu0 %vm1920_vm11, %v1886_v59  ;;  %v1887_v35 = vsel %vm1880_vm10, %v1854_v14, %v1567_v8  ;;  %v1726_v25 = vsel %vm1715_vm5, %v1693_v20, %v5562_v51  ;;  %v1791_v0 = vsel %vm1781_vm7, %v1758_v34, %v8150_v42  ;;  %v8157_v59 = vld [vmem:[#allocation55_spill] sm:$0xff]  ;;  %v1727_v31 = vsel %vm1715_vm5, %v1694_v9, %v8158_v58  ;;  %v8171_v34 = vld [vmem:[#allocation109_spill] sm:$0xff]  ;;  %v8172_v42 = vld [vmem:[#allocation48_spill] sm:$0xff] }
 0x233   : > { %4539 = vmatprep.mubr.msk.f32.mxu0 %vm1920_vm11, %v1887_v35  ;;  %v1759_v52 = vsel %vm1748_vm6, %v1726_v25, %v8151_v16  ;;  %v1824_v39 = vsel %vm1814_vm8, %v1791_v0, %v8152_v7  ;;  %v1662_v5 = vsel %vm257_vm0, %v4676_v49, %v8157_v59  ;;  %v8159_v8 = vld [vmem:[#allocation107_spill] sm:$0xff]  ;;  %v8160_v35 = vld [vmem:[#allocation41_spill] sm:$0xff]  ;;  %v1664_v36 = vsel %vm257_vm0, %v4678_v48, %v8169_v4  ;;  %v8180_v59 = vld [vmem:[#allocation112_spill] sm:$0xff] }
 0x234   : > { %v1441_v43 = vpop.permute.xlu1 %1440  ;;  %v1792_v27 = vsel %vm1781_vm7, %v1759_v52, %v8153_v38  ;;  %v1695_v32 = vsel %vm1682_vm4, %v1662_v5, %v8159_v8  ;;  %v1760_v62 = vsel %vm1748_vm6, %v1727_v31, %v8160_v35  ;;  %v8170_v60 = vld [vmem:[#allocation131_spill] sm:$0xff]  ;;  %v1697_v25 = vsel %vm1682_vm4, %v1664_v36, %v8171_v34  ;;  %v8174_v52 = vld [vmem:[#allocation96_spill] sm:$0xff]  ;;  %v8175_v38 = vld [vmem:[#allocation45_spill] sm:$0xff] }
 0x235   : > { %v1443_v6 = vpop.permute.xlu0 %1442  ;;  %v1855_v18 = vsel %vm1847_vm9, %v1822_v63, %v1441_v43  ;;  %v1825_v55 = vsel %vm1814_vm8, %v1792_v27, %v8154_v33  ;;  %v1728_v47 = vsel %vm1715_vm5, %v1695_v32, %v8161_v54  ;;  %v1793_v43 = vsel %vm1781_vm7, %v1760_v62, %v8162_v50  ;;  %v8177_v33 = vld [vmem:[#allocation94_spill] sm:$0xff]  ;;  %v4680_v31 = vld [vmem:[#allocation2 + $0xc0] sm:$0xff]  ;;  %v8183_v54 = vld [vmem:[#allocation111_spill] sm:$0xff] }
 0x236   : > { %v1856_v28 = vsel %vm1847_vm9, %v1823_v46, %v1443_v6  ;;  %v1761_v17 = vsel %vm1748_vm6, %v1728_v47, %v8163_v57  ;;  %v1826_v56 = vsel %vm1814_vm8, %v1793_v43, %v8164_v1  ;;  %v8165_v6 = vld [vmem:[#allocation90_spill] sm:$0xff]  ;;  %v8182_v32 = vld [vmem:[#allocation133_spill] sm:$0xff] }
 0x237   : > { %v1794_v29 = vsel %vm1781_vm7, %v1761_v17, %v8165_v6  ;;  %v8184_v50 = vld [vmem:[#allocation54_spill] sm:$0xff]  ;;  %v8186_v17 = vld [vmem:[#allocation101_spill] sm:$0xff]  ;;  %v8187_v6 = vld [vmem:[#allocation52_spill] sm:$0xff] }
 0x238   : > { %v1569_v23 = vpop.permute.xlu1 %1568  ;;  %v8192_v4 = vld [vmem:[#allocation114_spill] sm:$0xff] }
 0x239   : > { %v1888_v53 = vsel %vm1880_vm10, %v1855_v18, %v1569_v23  ;;  %v1571_v37 = vpop.permute.xlu0 %1570  ;;  %v8166_v18 = vld [vmem:[#allocation166_spill] sm:$0xff] }
 0x23a   : > { %4540 = vmatmul.mubr.msk.f32.gmra.mrb[6].mxu0 %vm1920_vm11, %v1888_v53  ;;  %v1889_v30 = vsel %vm1880_vm10, %v1856_v28, %v1571_v37  ;;  %v1827_v23 = vsel %vm1814_vm8, %v1794_v29, %v8166_v18  ;;  %v4677_v53 = vld [vmem:[#allocation2 + $0x98] sm:$0xff]  ;;  %v8168_v37 = vld [vmem:[#allocation110_spill] sm:$0xff] }
 0x23b   : > { %4542 = vmatprep.mubr.msk.f32.mxu0 %vm1920_vm11, %v1889_v30  ;;  %v1663_v41 = vsel %vm257_vm0, %v4677_v53, %v8167_v45  ;;  %v8189_v18 = vld [vmem:[#allocation98_spill] sm:$0xff] }
 0x23c   : > { %v1445_v21 = vpop.permute.xlu1 %1444  ;;  %v1696_v22 = vsel %vm1682_vm4, %v1663_v41, %v8168_v37  ;;  %v8190_v45 = vld [vmem:[#allocation170_spill] sm:$0xff]  ;;  %v8191_v37 = vld [vmem:[#allocation69_spill] sm:$0xff] }
 0x23d   : > { %v1447_v13 = vpop.permute.xlu0 %1446  ;;  %v1857_v11 = vsel %vm1847_vm9, %v1824_v39, %v1445_v21  ;;  %v1729_v21 = vsel %vm1715_vm5, %v1696_v22, %v8170_v60 }
 0x23e   : > { %v1858_v15 = vsel %vm1847_vm9, %v1825_v55, %v1447_v13  ;;  %v1762_v0 = vsel %vm1748_vm6, %v1729_v21, %v8172_v42  ;;  %v8173_v13 = vld [vmem:[#allocation130_spill] sm:$0xff]  ;;  %v4682_v21 = vld [vmem:[#allocation2 + $0xd8] sm:$0xff] }
 0x23f   : > { %v1730_v16 = vsel %vm1715_vm5, %v1697_v25, %v8173_v13  ;;  %v1795_v7 = vsel %vm1781_vm7, %v1762_v0, %v8174_v52  ;;  %v8194_v25 = vld [vmem:[#allocation135_spill] sm:$0xff]  ;;  %v8195_v13 = vld [vmem:[#allocation113_spill] sm:$0xff]  ;;  %v8196_v52 = vld [vmem:[#allocation58_spill] sm:$0xff] }
 0x240   : > { %v1573_v26 = vpop.permute.xlu1 %1572  ;;  %v1763_v27 = vsel %vm1748_vm6, %v1730_v16, %v8175_v38 }
 0x241   : > { %v1890_v51 = vsel %vm1880_vm10, %v1857_v11, %v1573_v26  ;;  %v1575_v61 = vpop.permute.xlu0 %1574  ;;  %v8176_v11 = vld [vmem:[#allocation169_spill] sm:$0xff]  ;;  %v1796_v55 = vsel %vm1781_vm7, %v1763_v27, %v8177_v33  ;;  %v8198_v27 = vld [vmem:[#allocation150_spill] sm:$0xff]  ;;  %v8199_v33 = vld [vmem:[#allocation56_spill] sm:$0xff] }
 0x242   : > { %4543 = vmatmul.mubr.msk.f32.gmra.mrb[8].mxu0 %vm1920_vm11, %v1890_v51  ;;  %v1891_v2 = vsel %vm1880_vm10, %v1858_v15, %v1575_v61  ;;  %v1828_v26 = vsel %vm1814_vm8, %v1795_v7, %v8176_v11  ;;  %v1829_v44 = vsel %vm1814_vm8, %v1796_v55, %v8178_v19  ;;  %v4679_v61 = vld [vmem:[#allocation2 + $0xb0] sm:$0xff]  ;;  %v8201_v19 = vld [vmem:[#allocation149_spill] sm:$0xff] }
 0x243   : > { %4545 = vmatprep.mubr.msk.f32.mxu0 %vm1920_vm11, %v1891_v2  ;;  %v1665_v9 = vsel %vm257_vm0, %v4679_v61, %v8179_v40  ;;  %v8202_v40 = vld [vmem:[#allocation172_spill] sm:$0xff] }
 0x244   : > { %v1449_v14 = vpop.permute.xlu1 %1448  ;;  %v1698_v5 = vsel %vm1682_vm4, %v1665_v9, %v8180_v59  ;;  %v8203_v59 = vld [vmem:[#allocation73_spill] sm:$0xff] }
 0x245   : > { %v1451_v3 = vpop.permute.xlu0 %1450  ;;  %v1859_v63 = vsel %vm1847_vm9, %v1826_v56, %v1449_v14  ;;  %v8181_v14 = vld [vmem:[#allocation63_spill] sm:$0xff]  ;;  %v1731_v35 = vsel %vm1715_vm5, %v1698_v5, %v8182_v32 }
 0x246   : > { %v1860_v10 = vsel %vm1847_vm9, %v1827_v23, %v1451_v3  ;;  %v1666_v8 = vsel %vm257_vm0, %v4680_v31, %v8181_v14  ;;  %v1764_v43 = vsel %vm1748_vm6, %v1731_v35, %v8184_v50  ;;  %v8185_v3 = vld [vmem:[#allocation132_spill] sm:$0xff]  ;;  %v4684_v35 = vld [vmem:[#allocation2 + $0xf0] sm:$0xff] }
 0x247   : > { %v1699_v47 = vsel %vm1682_vm4, %v1666_v8, %v8183_v54  ;;  %v1797_v1 = vsel %vm1781_vm7, %v1764_v43, %v8186_v17  ;;  %v8204_v14 = vld [vmem:[#allocation116_spill] sm:$0xff]  ;;  %v8208_v17 = vld [vmem:[#allocation62_spill] sm:$0xff] }
 0x248   : > { %v1577_v12 = vpop.permute.xlu1 %1576  ;;  %v1732_v57 = vsel %vm1715_vm5, %v1699_v47, %v8185_v3  ;;  %v8206_v47 = vld [vmem:[#allocation137_spill] sm:$0xff]  ;;  %v8207_v3 = vld [vmem:[#allocation115_spill] sm:$0xff] }
 0x249   : > { %v1892_v46 = vsel %vm1880_vm10, %v1859_v63, %v1577_v12  ;;  %v1579_v28 = vpop.permute.xlu0 %1578  ;;  %v1765_v29 = vsel %vm1748_vm6, %v1732_v57, %v8187_v6  ;;  %v8188_v63 = vld [vmem:[#allocation171_spill] sm:$0xff] }
 0x24a   : > { %4546 = vmatmul.mubr.msk.f32.gmra.mrb[10].mxu0 %vm1920_vm11, %v1892_v46  ;;  %v1893_v30 = vsel %vm1880_vm10, %v1860_v10, %v1579_v28  ;;  %v1830_v12 = vsel %vm1814_vm8, %v1797_v1, %v8188_v63  ;;  %v1798_v23 = vsel %vm1781_vm7, %v1765_v29, %v8189_v18  ;;  %v4681_v28 = vld [vmem:[#allocation2 + $0xc8] sm:$0xff]  ;;  %v8210_v29 = vld [vmem:[#allocation152_spill] sm:$0xff] }
 0x24b   : > { %4548 = vmatprep.mubr.msk.f32.mxu0 %vm1920_vm11, %v1893_v30  ;;  %v1831_v41 = vsel %vm1814_vm8, %v1798_v23, %v8190_v45  ;;  %v1667_v22 = vsel %vm257_vm0, %v4681_v28, %v8191_v37  ;;  %v8211_v18 = vld [vmem:[#allocation60_spill] sm:$0xff]  ;;  %v8213_v45 = vld [vmem:[#allocation151_spill] sm:$0xff]  ;;  %v8214_v37 = vld [vmem:[#allocation174_spill] sm:$0xff] }
 0x24c   : > { %v1453_v20 = vpop.permute.xlu1 %1452  ;;  %v1700_v36 = vsel %vm1682_vm4, %v1667_v22, %v8192_v4  ;;  %v8215_v4 = vld [vmem:[#allocation77_spill] sm:$0xff] }
 0x24d   : > { %v1455_v39 = vpop.permute.xlu0 %1454  ;;  %v1861_v51 = vsel %vm1847_vm9, %v1828_v26, %v1453_v20  ;;  %v8193_v20 = vld [vmem:[#allocation67_spill] sm:$0xff]  ;;  %v1733_v42 = vsel %vm1715_vm5, %v1700_v36, %v8194_v25 }
 0x24e   : > { %v1862_v2 = vsel %vm1847_vm9, %v1829_v44, %v1455_v39  ;;  %v1668_v34 = vsel %vm257_vm0, %v4682_v21, %v8193_v20  ;;  %v1766_v7 = vsel %vm1748_vm6, %v1733_v42, %v8196_v52  ;;  %v8197_v39 = vld [vmem:[#allocation134_spill] sm:$0xff] }
 0x24f   : > { %v1701_v16 = vsel %vm1682_vm4, %v1668_v34, %v8195_v13  ;;  %v1799_v11 = vsel %vm1781_vm7, %v1766_v7, %v8198_v27  ;;  %v8216_v20 = vld [vmem:[#allocation118_spill] sm:$0xff] }
 0x250   : > { %v1581_v24 = vpop.permute.xlu1 %1580  ;;  %v1734_v38 = vsel %vm1715_vm5, %v1701_v16, %v8197_v39  ;;  %v4686_v42 = vld [vmem:[#allocation2 + $0x108] sm:$0xff]  ;;  %v8218_v16 = vld [vmem:[#allocation139_spill] sm:$0xff]  ;;  %v8219_v39 = vld [vmem:[#allocation117_spill] sm:$0xff] }
 0x251   : > { %v1894_v15 = vsel %vm1880_vm10, %v1861_v51, %v1581_v24  ;;  %v1583_v49 = vpop.permute.xlu0 %1582  ;;  %v1767_v55 = vsel %vm1748_vm6, %v1734_v38, %v8199_v33  ;;  %v8200_v51 = vld [vmem:[#allocation173_spill] sm:$0xff]  ;;  %v8220_v27 = vld [vmem:[#allocation66_spill] sm:$0xff] }
 0x252   : > { %4549 = vmatmul.mubr.msk.f32.gmra.mrb[12].mxu0 %vm1920_vm11, %v1894_v15  ;;  %v1895_v58 = vsel %vm1880_vm10, %v1862_v2, %v1583_v49  ;;  %v1832_v24 = vsel %vm1814_vm8, %v1799_v11, %v8200_v51  ;;  %v1800_v44 = vsel %vm1781_vm7, %v1767_v55, %v8201_v19  ;;  %v4683_v49 = vld [vmem:[#allocation2 + $0xe0] sm:$0xff]  ;;  %v8222_v55 = vld [vmem:[#allocation154_spill] sm:$0xff]  ;;  %v8223_v19 = vld [vmem:[#allocation64_spill] sm:$0xff] }
 0x253   : > { %4551 = vmatprep.mubr.msk.f32.mxu0 %vm1920_vm11, %v1895_v58  ;;  %v1833_v9 = vsel %vm1814_vm8, %v1800_v44, %v8202_v40  ;;  %v1669_v5 = vsel %vm257_vm0, %v4683_v49, %v8203_v59  ;;  %v8225_v40 = vld [vmem:[#allocation153_spill] sm:$0xff]  ;;  %v8226_v59 = vld [vmem:[#allocation176_spill] sm:$0xff] }
 0x254   : > { %v1457_v62 = vpop.permute.xlu1 %1456  ;;  %v1702_v8 = vsel %vm1682_vm4, %v1669_v5, %v8204_v14  ;;  %v8227_v14 = vld [vmem:[#allocation81_spill] sm:$0xff] }
 0x255   : > { %v1459_v56 = vpop.permute.xlu0 %1458  ;;  %v1863_v46 = vsel %vm1847_vm9, %v1830_v12, %v1457_v62  ;;  %v8205_v62 = vld [vmem:[#allocation71_spill] sm:$0xff]  ;;  %v1735_v50 = vsel %vm1715_vm5, %v1702_v8, %v8206_v47 }
 0x256   : > { %v1864_v30 = vsel %vm1847_vm9, %v1831_v41, %v1459_v56  ;;  %v1670_v54 = vsel %vm257_vm0, %v4684_v35, %v8205_v62  ;;  %v1768_v1 = vsel %vm1748_vm6, %v1735_v50, %v8208_v17  ;;  %v8209_v56 = vld [vmem:[#allocation136_spill] sm:$0xff]  ;;  %v4688_v50 = vld [vmem:[#allocation2 + $0x120] sm:$0xff] }
 0x257   : > { %v1703_v57 = vsel %vm1682_vm4, %v1670_v54, %v8207_v3  ;;  %v1801_v63 = vsel %vm1781_vm7, %v1768_v1, %v8210_v29  ;;  %v8228_v62 = vld [vmem:[#allocation120_spill] sm:$0xff]  ;;  %v8232_v29 = vld [vmem:[#allocation70_spill] sm:$0xff] }
 0x258   : > { %v1585_v53 = vpop.permute.xlu1 %1584  ;;  %v1736_v6 = vsel %vm1715_vm5, %v1703_v57, %v8209_v56  ;;  %v8230_v57 = vld [vmem:[#allocation141_spill] sm:$0xff]  ;;  %v8231_v56 = vld [vmem:[#allocation119_spill] sm:$0xff] }
 0x259   : > { %v1896_v10 = vsel %vm1880_vm10, %v1863_v46, %v1585_v53  ;;  %v1587_v48 = vpop.permute.xlu0 %1586  ;;  %v1769_v23 = vsel %vm1748_vm6, %v1736_v6, %v8211_v18  ;;  %v8212_v46 = vld [vmem:[#allocation175_spill] sm:$0xff] }
 0x25a   : > { %4552 = vmatmul.mubr.msk.f32.gmra.mrb[14].mxu0 %vm1920_vm11, %v1896_v10  ;;  %v1897_v60 = vsel %vm1880_vm10, %v1864_v30, %v1587_v48  ;;  %v1834_v53 = vsel %vm1814_vm8, %v1801_v63, %v8212_v46  ;;  %v1802_v41 = vsel %vm1781_vm7, %v1769_v23, %v8213_v45  ;;  %v4685_v48 = vld [vmem:[#allocation2 + $0xf8] sm:$0xff] }
 0x25b   : > { %4554 = vmatprep.mubr.msk.f32.mxu0 %vm1920_vm11, %v1897_v60  ;;  %v1835_v22 = vsel %vm1814_vm8, %v1802_v41, %v8214_v37  ;;  %v1671_v36 = vsel %vm257_vm0, %v4685_v48, %v8215_v4  ;;  %v8234_v23 = vld [vmem:[#allocation156_spill] sm:$0xff]  ;;  %v8237_v37 = vld [vmem:[#allocation155_spill] sm:$0xff]  ;;  %v8238_v4 = vld [vmem:[#allocation178_spill] sm:$0xff] }
 0x25c   : > { %v1461_v0 = vpop.permute.xlu1 %1460  ;;  %v1704_v34 = vsel %vm1682_vm4, %v1671_v36, %v8216_v20  ;;  %v8235_v45 = vld [vmem:[#allocation68_spill] sm:$0xff]  ;;  %v8239_v20 = vld [vmem:[#allocation85_spill] sm:$0xff] }
 0x25d   : > { %v1463_v26 = vpop.permute.xlu0 %1462  ;;  %v1865_v15 = vsel %vm1847_vm9, %v1832_v24, %v1461_v0  ;;  %v8217_v0 = vld [vmem:[#allocation75_spill] sm:$0xff]  ;;  %v1737_v52 = vsel %vm1715_vm5, %v1704_v34, %v8218_v16 }
 0x25e   : > { %v1866_v58 = vsel %vm1847_vm9, %v1833_v9, %v1463_v26  ;;  %v1672_v13 = vsel %vm257_vm0, %v4686_v42, %v8217_v0  ;;  %v1770_v11 = vsel %vm1748_vm6, %v1737_v52, %v8220_v27  ;;  %v8221_v26 = vld [vmem:[#allocation138_spill] sm:$0xff]  ;;  %v4690_v52 = vld [vmem:[#allocation2 + $0x138] sm:$0xff] }
 0x25f   : > { %v1705_v38 = vsel %vm1682_vm4, %v1672_v13, %v8219_v39  ;;  %v1803_v51 = vsel %vm1781_vm7, %v1770_v11, %v8222_v55  ;;  %v8240_v0 = vld [vmem:[#allocation122_spill] sm:$0xff] }
 0x260   : > { %v1589_v61 = vpop.permute.xlu1 %1588  ;;  %v1738_v33 = vsel %vm1715_vm5, %v1705_v38, %v8221_v26  ;;  %v8242_v38 = vld [vmem:[#allocation143_spill] sm:$0xff]  ;;  %v8243_v26 = vld [vmem:[#allocation121_spill] sm:$0xff]  ;;  %v8244_v55 = vld [vmem:[#allocation74_spill] sm:$0xff] }
 0x261   : > { %v1898_v2 = vsel %vm1880_vm10, %v1865_v15, %v1589_v61  ;;  %v1591_v31 = vpop.permute.xlu0 %1590  ;;  %v1771_v44 = vsel %vm1748_vm6, %v1738_v33, %v8223_v19  ;;  %v8224_v15 = vld [vmem:[#allocation177_spill] sm:$0xff] }
 0x262   : > { %4555 = vmatmul.mubr.msk.f32.gmra.mrb[16].mxu0 %vm1920_vm11, %v1898_v2  ;;  %v1899_v32 = vsel %vm1880_vm10, %v1866_v58, %v1591_v31  ;;  %v1836_v61 = vsel %vm1814_vm8, %v1803_v51, %v8224_v15  ;;  %v1804_v9 = vsel %vm1781_vm7, %v1771_v44, %v8225_v40  ;;  %v4687_v31 = vld [vmem:[#allocation2 + $0x110] sm:$0xff]  ;;  %v8246_v44 = vld [vmem:[#allocation158_spill] sm:$0xff]  ;;  %v8247_v40 = vld [vmem:[#allocation72_spill] sm:$0xff] }
 0x263   : > { %4557 = vmatprep.mubr.msk.f32.mxu0 %vm1920_vm11, %v1899_v32  ;;  %v1837_v5 = vsel %vm1814_vm8, %v1804_v9, %v8226_v59  ;;  %v1673_v8 = vsel %vm257_vm0, %v4687_v31, %v8227_v14  ;;  %v8249_v59 = vld [vmem:[#allocation157_spill] sm:$0xff]  ;;  %v8250_v14 = vld [vmem:[#allocation180_spill] sm:$0xff] }
 0x264   : > { %v1465_v43 = vpop.permute.xlu1 %1464  ;;  %v1706_v54 = vsel %vm1682_vm4, %v1673_v8, %v8228_v62  ;;  %v8251_v62 = vld [vmem:[#allocation89_spill] sm:$0xff] }
 0x265   : > { %v1467_v12 = vpop.permute.xlu0 %1466  ;;  %v1867_v10 = vsel %vm1847_vm9, %v1834_v53, %v1465_v43  ;;  %v8229_v43 = vld [vmem:[#allocation79_spill] sm:$0xff]  ;;  %v1739_v17 = vsel %vm1715_vm5, %v1706_v54, %v8230_v57 }
 0x266   : > { %v1868_v60 = vsel %vm1847_vm9, %v1835_v22, %v1467_v12  ;;  %v1674_v3 = vsel %vm257_vm0, %v4688_v50, %v8229_v43  ;;  %v1772_v63 = vsel %vm1748_vm6, %v1739_v17, %v8232_v29  ;;  %v8233_v12 = vld [vmem:[#allocation140_spill] sm:$0xff]  ;;  %v2348_v43 = vld [vmem:[#allocation2 + $0x9] sm:$0xff] }
 0x267   : > { %v1707_v6 = vsel %vm1682_vm4, %v1674_v3, %v8231_v56  ;;  %v1805_v46 = vsel %vm1781_vm7, %v1772_v63, %v8234_v23  ;;  %v8252_v3 = vld [vmem:[#allocation124_spill] sm:$0xff]  ;;  %2637 = vrot.lane.b32.xlu1 %v2348_v43, %s4710_s25  ;;  %v4692_v56 = vld [vmem:[#allocation2 + $0x150] sm:$0xff]  ;;  %v8254_v63 = vld [vmem:[#allocation145_spill] sm:$0xff] }
 0x268   : > { %v1593_v28 = vpop.permute.xlu1 %1592  ;;  %v1740_v18 = vsel %vm1715_vm5, %v1707_v6, %v8233_v12  ;;  %v8253_v6 = vld [vmem:[#allocation87_spill] sm:$0xff] }
 0x269   : > { %v1900_v30 = vsel %vm1880_vm10, %v1867_v10, %v1593_v28  ;;  %v1595_v21 = vpop.permute.xlu0 %1594  ;;  %v1773_v41 = vsel %vm1748_vm6, %v1740_v18, %v8235_v45  ;;  %v8236_v10 = vld [vmem:[#allocation179_spill] sm:$0xff]  ;;  %v1678_v29 = vsel %vm257_vm0, %v4692_v56, %v8253_v6 }
 0x26a   : > { %4558 = vmatmul.mubr.msk.f32.gmra.mrb[18].mxu0 %vm1920_vm11, %v1900_v30  ;;  %v1901_v25 = vsel %vm1880_vm10, %v1868_v60, %v1595_v21  ;;  %v1838_v28 = vsel %vm1814_vm8, %v1805_v46, %v8236_v10  ;;  %v1806_v22 = vsel %vm1781_vm7, %v1773_v41, %v8237_v37  ;;  %v4689_v21 = vld [vmem:[#allocation2 + $0x128] sm:$0xff]  ;;  %v8255_v23 = vld [vmem:[#allocation123_spill] sm:$0xff]  ;;  %v8257_v41 = vld [vmem:[#allocation144_spill] sm:$0xff] }
 0x26b   : > { %4560 = vmatprep.mubr.msk.f32.mxu0 %vm1920_vm11, %v1901_v25  ;;  %v1839_v36 = vsel %vm1814_vm8, %v1806_v22, %v8238_v4  ;;  %v1675_v34 = vsel %vm257_vm0, %v4689_v21, %v8239_v20  ;;  %v1711_v46 = vsel %vm1682_vm4, %v1678_v29, %v8255_v23  ;;  %v8260_v4 = vld [vmem:[#allocation183_spill] sm:$0xff] }
 0x26c   : > { %v1469_v7 = vpop.permute.xlu1 %1468  ;;  %v1708_v13 = vsel %vm1682_vm4, %v1675_v34, %v8240_v0  ;;  %v1744_v10 = vsel %vm1715_vm5, %v1711_v46, %v8257_v41  ;;  %v8276_v6 = vld [vmem:[#allocation127_spill] sm:$0xff]  ;;  %v8278_v46 = vld [vmem:[#allocation84_spill] sm:$0xff] }
 0x26d   : > { %v1471_v24 = vpop.permute.xlu0 %1470  ;;  %v1869_v2 = vsel %vm1847_vm9, %v1836_v61, %v1469_v7  ;;  %v8241_v7 = vld [vmem:[#allocation83_spill] sm:$0xff]  ;;  %v1741_v27 = vsel %vm1715_vm5, %v1708_v13, %v8242_v38  ;;  %v4693_v13 = vld [vmem:[#allocation2 + $0x158] sm:$0xff]  ;;  %v8264_v38 = vld [vmem:[#allocation126_spill] sm:$0xff] }
 0x26e   : > { %v1870_v32 = vsel %vm1847_vm9, %v1837_v5, %v1471_v24  ;;  %v1676_v39 = vsel %vm257_vm0, %v4690_v52, %v8241_v7  ;;  %v1774_v51 = vsel %vm1748_vm6, %v1741_v27, %v8244_v55  ;;  %v8245_v24 = vld [vmem:[#allocation142_spill] sm:$0xff] }
 0x26f   : > { %v1709_v33 = vsel %vm1682_vm4, %v1676_v39, %v8243_v26  ;;  %v1807_v15 = vsel %vm1781_vm7, %v1774_v51, %v8246_v44  ;;  %v4694_v26 = vld [vmem:[#allocation2 + $0x168] sm:$0xff]  ;;  %v8266_v51 = vld [vmem:[#allocation147_spill] sm:$0xff]  ;;  %v8267_v44 = vld [vmem:[#allocation125_spill] sm:$0xff] }
 0x270   : > { %v1597_v49 = vpop.permute.xlu1 %1596  ;;  %v1742_v19 = vsel %vm1715_vm5, %v1709_v33, %v8245_v24  ;;  %v8265_v33 = vld [vmem:[#allocation91_spill] sm:$0xff] }
 0x271   : > { %v1902_v58 = vsel %vm1880_vm10, %v1869_v2, %v1597_v49  ;;  %v1599_v35 = vpop.permute.xlu0 %1598  ;;  %v1775_v9 = vsel %vm1748_vm6, %v1742_v19, %v8247_v40  ;;  %v8248_v2 = vld [vmem:[#allocation181_spill] sm:$0xff]  ;;  %v1680_v55 = vsel %vm257_vm0, %v4694_v26, %v8265_v33 }
 0x272   : > { %4561 = vmatmul.mubr.msk.f32.gmra.mrb[20].mxu0 %vm1920_vm11, %v1902_v58  ;;  %v1903_v47 = vsel %vm1880_vm10, %v1870_v32, %v1599_v35  ;;  %v1840_v49 = vsel %vm1814_vm8, %v1807_v15, %v8248_v2  ;;  %v1808_v5 = vsel %vm1781_vm7, %v1775_v9, %v8249_v59  ;;  %v4691_v35 = vld [vmem:[#allocation2 + $0x140] sm:$0xff]  ;;  %v1713_v15 = vsel %vm1682_vm4, %v1680_v55, %v8267_v44  ;;  %v8269_v9 = vld [vmem:[#allocation146_spill] sm:$0xff] }
 0x273   : > { %4563 = vmatprep.mubr.msk.f32.mxu0 %vm1920_vm11, %v1903_v47  ;;  %v1841_v8 = vsel %vm1814_vm8, %v1808_v5, %v8250_v14  ;;  %v1677_v54 = vsel %vm257_vm0, %v4691_v35, %v8251_v62  ;;  %v1746_v2 = vsel %vm1715_vm5, %v1713_v15, %v8269_v9  ;;  %v8272_v14 = vld [vmem:[#allocation185_spill] sm:$0xff] }
 0x274   : > { %v1473_v1 = vpop.permute.xlu1 %1472  ;;  %v1710_v57 = vsel %vm1682_vm4, %v1677_v54, %v8252_v3  ;;  %v4695_v3 = vld [vmem:[#allocation2 + $0x170] sm:$0xff] }
 0x275   : > { %v1475_v53 = vpop.permute.xlu0 %1474  ;;  %v1871_v30 = vsel %vm1847_vm9, %v1838_v28, %v1473_v1  ;;  %v2347_v1 = vld [vmem:[#allocation2 + $0x1] sm:$0xff]  ;;  %v1743_v12 = vsel %vm1715_vm5, %v1710_v57, %v8254_v63  ;;  %v8258_v28 = vld [vmem:[#allocation160_spill] sm:$0xff] }
 0x276   : > { %v1872_v25 = vsel %vm1847_vm9, %v1839_v36, %v1475_v53  ;;  %2635 = vrot.lane.b32.xlu0 %v2347_v1, %s4710_s25  ;;  %v8256_v53 = vld [vmem:[#allocation78_spill] sm:$0xff]  ;;  %v8275_v57 = vld [vmem:[#allocation97_spill] sm:$0xff] }
 0x277   : > { %v1776_v45 = vsel %vm1748_vm6, %v1743_v12, %v8256_v53  ;;  %v8277_v12 = vld [vmem:[#allocation148_spill] sm:$0xff] }
 0x278   : > { %v1601_v48 = vpop.permute.xlu1 %1600  ;;  %v1809_v37 = vsel %vm1781_vm7, %v1776_v45, %v8258_v28  ;;  %v8279_v45 = vld [vmem:[#allocation163_spill] sm:$0xff] }
 0x279   : > { %v1904_v60 = vsel %vm1880_vm10, %v1871_v30, %v1601_v48  ;;  %v1603_v42 = vpop.permute.xlu0 %1602  ;;  %v8259_v30 = vld [vmem:[#allocation76_spill] sm:$0xff]  ;;  %v1842_v36 = vsel %vm1814_vm8, %v1809_v37, %v8260_v4 }
 0x27a   : > { %4564 = vmatmul.mubr.msk.f32.gmra.mrb[22].mxu0 %vm1920_vm11, %v1904_v60  ;;  %v1905_v16 = vsel %vm1880_vm10, %v1872_v25, %v1603_v42  ;;  %v1777_v48 = vsel %vm1748_vm6, %v1744_v10, %v8259_v30  ;;  %v8261_v60 = vld [vmem:[#allocation159_spill] sm:$0xff]  ;;  %v8262_v25 = vld [vmem:[#allocation182_spill] sm:$0xff] }
 0x27b   : > { %4566 = vmatprep.mubr.msk.f32.mxu0 %vm1920_vm11, %v1905_v16  ;;  %v1810_v21 = vsel %vm1781_vm7, %v1777_v48, %v8261_v60  ;;  %v8263_v16 = vld [vmem:[#allocation93_spill] sm:$0xff]  ;;  %v8280_v10 = vld [vmem:[#allocation186_spill] sm:$0xff] }
 0x27c   : > { %v1477_v11 = vpop.permute.xlu1 %1476  ;;  %v1843_v42 = vsel %vm1814_vm8, %v1810_v21, %v8262_v25  ;;  %v1679_v52 = vsel %vm257_vm0, %v4693_v13, %v8263_v16  ;;  %v6499_v48 = vld [vmem:[%s7807_s2] ss:$0 sm:$0xff] }
 0x27d   : > { %v1479_v61 = vpop.permute.xlu0 %1478  ;;  %v1873_v58 = vsel %vm1847_vm9, %v1840_v49, %v1477_v11  ;;  %v1712_v27 = vsel %vm1682_vm4, %v1679_v52, %v8264_v38  ;;  %v8270_v49 = vld [vmem:[#allocation162_spill] sm:$0xff] }
 0x27e   : > { %v1874_v47 = vsel %vm1847_vm9, %v1841_v8, %v1479_v61  ;;  %v1745_v24 = vsel %vm1715_vm5, %v1712_v27, %v8266_v51  ;;  %v8268_v61 = vld [vmem:[#allocation82_spill] sm:$0xff] }
 0x27f   : > { %v1778_v40 = vsel %vm1748_vm6, %v1745_v24, %v8268_v61 }
 0x280   : > { %v1605_v31 = vpop.permute.xlu1 %1604  ;;  %v1811_v59 = vsel %vm1781_vm7, %v1778_v40, %v8270_v49 }
 0x281   : > { %v1906_v32 = vsel %vm1880_vm10, %v1873_v58, %v1605_v31  ;;  %v1607_v50 = vpop.permute.xlu0 %1606  ;;  %v8271_v58 = vld [vmem:[#allocation80_spill] sm:$0xff]  ;;  %v1844_v8 = vsel %vm1814_vm8, %v1811_v59, %v8272_v14 }
 0x282   : > { %4567 = vmatmul.mubr.msk.f32.gmra.mrb[24].mxu0 %vm1920_vm11, %v1906_v32  ;;  %v1907_v17 = vsel %vm1880_vm10, %v1874_v47, %v1607_v50  ;;  %v1779_v31 = vsel %vm1748_vm6, %v1746_v2, %v8271_v58  ;;  %v8273_v32 = vld [vmem:[#allocation161_spill] sm:$0xff]  ;;  %v8274_v47 = vld [vmem:[#allocation184_spill] sm:$0xff] }
 0x283   : > { %4569 = vmatprep.mubr.msk.f32.mxu0 %vm1920_vm11, %v1907_v17  ;;  %v1812_v35 = vsel %vm1781_vm7, %v1779_v31, %v8273_v32  ;;  %v1681_v17 = vsel %vm257_vm0, %v4695_v3, %v8275_v57 }
 0x284   : > { %v1481_v18 = vpop.permute.xlu1 %1480  ;;  %v1845_v50 = vsel %vm1814_vm8, %v1812_v35, %v8274_v47  ;;  %v1714_v29 = vsel %vm1682_vm4, %v1681_v17, %v8276_v6 }
 0x285   : > { %v1483_v22 = vpop.permute.xlu0 %1482  ;;  %v1875_v20 = vsel %vm1847_vm9, %v1842_v36, %v1481_v18  ;;  %v1747_v18 = vsel %vm1715_vm5, %v1714_v29, %v8277_v12 }
 0x286   : > { %v1876_v7 = vsel %vm1847_vm9, %v1843_v42, %v1483_v22  ;;  %v1780_v53 = vsel %vm1748_vm6, %v1747_v18, %v8278_v46 }
 0x287   : > { %v1813_v41 = vsel %vm1781_vm7, %v1780_v53, %v8279_v45 }
 0x288   : > { %v1609_v34 = vpop.permute.xlu1 %1608  ;;  %v1846_v28 = vsel %vm1814_vm8, %v1813_v41, %v8280_v10 }
 0x289   : > { %v1908_v0 = vsel %vm1880_vm10, %v1875_v20, %v1609_v34  ;;  %v1611_v39 = vpop.permute.xlu0 %1610 }
 0x28a   : > { %4570 = vmatmul.mubr.msk.f32.gmra.mrb[26].mxu0 %vm1920_vm11, %v1908_v0  ;;  %v1909_v11 = vsel %vm1880_vm10, %v1876_v7, %v1611_v39 }
 0x28b   : > { %4572 = vmatprep.mubr.msk.f32.mxu0 %vm1920_vm11, %v1909_v11 }
 0x28c   : > { %v1485_v19 = vpop.permute.xlu1 %1484 }
 0x28d   : > { %v1487_v5 = vpop.permute.xlu0 %1486  ;;  %v1877_v62 = vsel %vm1847_vm9, %v1844_v8, %v1485_v19 }
 0x28e   : > { %v1878_v1 = vsel %vm1847_vm9, %v1845_v50, %v1487_v5 }
 0x290   : > { %v1613_v54 = vpop.permute.xlu1 %1612 }
 0x291   : > { %v1910_v43 = vsel %vm1880_vm10, %v1877_v62, %v1613_v54  ;;  %v1615_v56 = vpop.permute.xlu0 %1614 }
 0x292   : > { %4573 = vmatmul.mubr.msk.f32.gmra.mrb[28].mxu0 %vm1920_vm11, %v1910_v43  ;;  %v1911_v63 = vsel %vm1880_vm10, %v1878_v1, %v1615_v56 }
 0x293   : > { %4575 = vmatprep.mubr.msk.f32.mxu0 %vm1920_vm11, %v1911_v63 }
 0x294   : > { %v1489_v23 = vpop.permute.xlu1 %1488 }
 0x295   : > { %v1879_v37 = vsel %vm1847_vm9, %v1846_v28, %v1489_v23 }
 0x298   : > { %v1617_v22 = vpop.permute.xlu1 %1616 }
 0x299   : > { %v1912_v30 = vsel %vm1880_vm10, %v1879_v37, %v1617_v22 }
 0x29a   : > { %4576 = vmatmul.mubr.msk.f32.gmra.mrb[30].mxu0 %vm1920_vm11, %v1912_v30 }
 0x2fa   : > { %v4532_v4 = vpop.f32.mrb[0].mxu0 }
 0x2fb   : > { %v2093_v36 = vadd.f32 %v4532_v4, %v6499_v48  ;;  %v2087_v60 = vpop.f32.mrb[1].mxu0 }
 0x2fc   : > { %v2088_v21 = vadd.f32 %v6499_v48, %v2087_v60 }
 0x2fd   : > { %v2247_v20 = vmax.f32 %v2093_v36, 0.0 }
 0x2fe   : > { %v2246_v34 = vmax.f32 %v2088_v21, 0.0  ;;  %v4535_v25 = vpop.f32.mrb[2].mxu0 }
 0x2ff   : > { %2279 = vst.msk [vmem:[#allocation2 + $0x21] sm:$0xff] %vm257_vm0, %v2247_v20  ;;  %v2103_v42 = vadd.f32 %v4535_v25, %v6499_v48  ;;  %v2097_v0 = vpop.f32.mrb[3].mxu0 }
 0x300   : > { %2278 = vst.msk [vmem:[#allocation2 + $0x19] sm:$0xff] %vm257_vm0, %v2246_v34  ;;  %v2098_v13 = vadd.f32 %v6499_v48, %v2097_v0 }
 0x301   : > { %v2249_v16 = vmax.f32 %v2103_v42, 0.0 }
 0x302   : > { %v2248_v52 = vmax.f32 %v2098_v13, 0.0 }
 0x303   : > { %2281 = vst.msk [vmem:[#allocation2 + $0x39] sm:$0xff] %vm257_vm0, %v2249_v16 }
 0x304   : > { %2280 = vst.msk [vmem:[#allocation2 + $0x31] sm:$0xff] %vm257_vm0, %v2248_v52 }
 0x305   : > { %v4538_v7 = vpop.f32.mrb[4].mxu0 }
 0x306   : > { %v2113_v39 = vadd.f32 %v4538_v7, %v6499_v48  ;;  %v2107_v38 = vpop.f32.mrb[5].mxu0  ;;  %v6510_v27 = vld [vmem:[#allocation2 + $0x21] sm:$0xff] }
 0x307   : > { %v2108_v11 = vadd.f32 %v6499_v48, %v2107_v38  ;;  %2641 = vrot.lane.b32.xlu1 %v6510_v27, %s4710_s25  ;;  %v6515_v26 = vld [vmem:[#allocation2 + $0x19] sm:$0xff] }
 0x308   : > { %v2251_v33 = vmax.f32 %v2113_v39, 0.0  ;;  %2639 = vrot.lane.b32.xlu0 %v6515_v26, %s4710_s25 }
 0x309   : > { %v2250_v55 = vmax.f32 %v2108_v11, 0.0 }
 0x30a   : > { %2283 = vst.msk [vmem:[#allocation2 + $0x51] sm:$0xff] %vm257_vm0, %v2251_v33  ;;  %v6520_v51 = vld [vmem:[#allocation2 + $0x39] sm:$0xff] }
 0x30b   : > { %2282 = vst.msk [vmem:[#allocation2 + $0x49] sm:$0xff] %vm257_vm0, %v2250_v55  ;;  %2645 = vrot.lane.b32.xlu1 %v6520_v51, %s4710_s25  ;;  %v6525_v24 = vld [vmem:[#allocation2 + $0x31] sm:$0xff] }
 0x30c   : > { %2643 = vrot.lane.b32.xlu0 %v6525_v24, %s4710_s25 }
 0x30d   : > { %v4541_v19 = vpop.f32.mrb[6].mxu0 }
 0x30e   : > { %v2123_v44 = vadd.f32 %v4541_v19, %v6499_v48  ;;  %v2117_v15 = vpop.f32.mrb[7].mxu0 }
 0x30f   : > { %v2118_v61 = vadd.f32 %v6499_v48, %v2117_v15 }
 0x310   : > { %v2253_v40 = vmax.f32 %v2123_v44, 0.0 }
 0x311   : > { %v2252_v9 = vmax.f32 %v2118_v61, 0.0  ;;  %v6531_v2 = vld [vmem:[#allocation2 + $0x51] sm:$0xff] }
 0x312   : > { %2285 = vst.msk [vmem:[#allocation2 + $0x69] sm:$0xff] %vm257_vm0, %v2253_v40  ;;  %2649 = vrot.lane.b32.xlu1 %v6531_v2, %s4710_s25  ;;  %v6536_v49 = vld [vmem:[#allocation2 + $0x49] sm:$0xff] }
 0x313   : > { %2284 = vst.msk [vmem:[#allocation2 + $0x61] sm:$0xff] %vm257_vm0, %v2252_v9  ;;  %2647 = vrot.lane.b32.xlu0 %v6536_v49, %s4710_s25 }
 0x315   : > { %v4544_v59 = vpop.f32.mrb[8].mxu0 }
 0x316   : > { %v2133_v5 = vadd.f32 %v4544_v59, %v6499_v48  ;;  %v2127_v58 = vpop.f32.mrb[9].mxu0 }
 0x317   : > { %v2128_v31 = vadd.f32 %v6499_v48, %v2127_v58 }
 0x318   : > { %v2255_v14 = vmax.f32 %v2133_v5, 0.0 }
 0x319   : > { %v2254_v8 = vmax.f32 %v2128_v31, 0.0  ;;  %v6543_v32 = vld [vmem:[#allocation2 + $0x69] sm:$0xff] }
 0x31a   : > { %2287 = vst.msk [vmem:[#allocation2 + $0x81] sm:$0xff] %vm257_vm0, %v2255_v14  ;;  %2653 = vrot.lane.b32.xlu1 %v6543_v32, %s4710_s25  ;;  %v6548_v35 = vld [vmem:[#allocation2 + $0x61] sm:$0xff] }
 0x31b   : > { %2286 = vst.msk [vmem:[#allocation2 + $0x79] sm:$0xff] %vm257_vm0, %v2254_v8  ;;  %2651 = vrot.lane.b32.xlu0 %v6548_v35, %s4710_s25 }
 0x31d   : > { %v4547_v62 = vpop.f32.mrb[10].mxu0 }
 0x31e   : > { %v2143_v54 = vadd.f32 %v4547_v62, %v6499_v48  ;;  %v2137_v47 = vpop.f32.mrb[11].mxu0 }
 0x31f   : > { %v2138_v50 = vadd.f32 %v6499_v48, %v2137_v47 }
 0x320   : > { %v2257_v43 = vmax.f32 %v2143_v54, 0.0 }
 0x321   : > { %v2256_v3 = vmax.f32 %v2138_v50, 0.0  ;;  %v6555_v57 = vld [vmem:[#allocation2 + $0x81] sm:$0xff] }
 0x322   : > { %2289 = vst.msk [vmem:[#allocation2 + $0x99] sm:$0xff] %vm257_vm0, %v2257_v43  ;;  %2657 = vrot.lane.b32.xlu1 %v6555_v57, %s4710_s25  ;;  %v6560_v17 = vld [vmem:[#allocation2 + $0x79] sm:$0xff] }
 0x323   : > { %2288 = vst.msk [vmem:[#allocation2 + $0x91] sm:$0xff] %vm257_vm0, %v2256_v3  ;;  %2655 = vrot.lane.b32.xlu0 %v6560_v17, %s4710_s25 }
 0x325   : > { %v4550_v1 = vpop.f32.mrb[12].mxu0 }
 0x326   : > { %v2153_v56 = vadd.f32 %v4550_v1, %v6499_v48  ;;  %v2147_v6 = vpop.f32.mrb[13].mxu0 }
 0x327   : > { %v2148_v29 = vadd.f32 %v6499_v48, %v2147_v6 }
 0x328   : > { %v2259_v63 = vmax.f32 %v2153_v56, 0.0 }
 0x329   : > { %v2258_v12 = vmax.f32 %v2148_v29, 0.0  ;;  %v6567_v18 = vld [vmem:[#allocation2 + $0x99] sm:$0xff] }
 0x32a   : > { %2291 = vst.msk [vmem:[#allocation2 + $0xb1] sm:$0xff] %vm257_vm0, %v2259_v63  ;;  %2661 = vrot.lane.b32.xlu1 %v6567_v18, %s4710_s25  ;;  %v6572_v23 = vld [vmem:[#allocation2 + $0x91] sm:$0xff] }
 0x32b   : > { %2290 = vst.msk [vmem:[#allocation2 + $0xa9] sm:$0xff] %vm257_vm0, %v2258_v12  ;;  %2659 = vrot.lane.b32.xlu0 %v6572_v23, %s4710_s25 }
 0x32d   : > { %v4553_v46 = vpop.f32.mrb[14].mxu0 }
 0x32e   : > { %v2163_v53 = vadd.f32 %v4553_v46, %v6499_v48  ;;  %v2157_v45 = vpop.f32.mrb[15].mxu0 }
 0x32f   : > { %v2158_v41 = vadd.f32 %v6499_v48, %v2157_v45 }
 0x330   : > { %v2261_v10 = vmax.f32 %v2163_v53, 0.0 }
 0x331   : > { %v2260_v28 = vmax.f32 %v2158_v41, 0.0  ;;  %v2362_v37 = vld [vmem:[#allocation2 + $0xb1] sm:$0xff] }
 0x332   : > { %2293 = vst.msk [vmem:[#allocation2 + $0xc9] sm:$0xff] %vm257_vm0, %v2261_v10  ;;  %2665 = vrot.lane.b32.xlu1 %v2362_v37, %s4710_s25  ;;  %v2361_v22 = vld [vmem:[#allocation2 + $0xa9] sm:$0xff] }
 0x333   : > { %2292 = vst.msk [vmem:[#allocation2 + $0xc1] sm:$0xff] %vm257_vm0, %v2260_v28  ;;  %2663 = vrot.lane.b32.xlu0 %v2361_v22, %s4710_s25 }
 0x335   : > { %v4556_v30 = vpop.f32.mrb[16].mxu0 }
 0x336   : > { %v2173_v4 = vadd.f32 %v4556_v30, %v6499_v48  ;;  %v2167_v36 = vpop.f32.mrb[17].mxu0 }
 0x337   : > { %v2168_v60 = vadd.f32 %v6499_v48, %v2167_v36 }
 0x338   : > { %v2263_v21 = vmax.f32 %v2173_v4, 0.0 }
 0x339   : > { %v2262_v20 = vmax.f32 %v2168_v60, 0.0  ;;  %v2364_v34 = vld [vmem:[#allocation2 + $0xc9] sm:$0xff] }
 0x33a   : > { %2295 = vst.msk [vmem:[#allocation2 + $0xe1] sm:$0xff] %vm257_vm0, %v2263_v21  ;;  %2669 = vrot.lane.b32.xlu1 %v2364_v34, %s4710_s25  ;;  %v2363_v25 = vld [vmem:[#allocation2 + $0xc1] sm:$0xff] }
 0x33b   : > { %2294 = vst.msk [vmem:[#allocation2 + $0xd9] sm:$0xff] %vm257_vm0, %v2262_v20  ;;  %2667 = vrot.lane.b32.xlu0 %v2363_v25, %s4710_s25 }
 0x33d   : > { %v4559_v42 = vpop.f32.mrb[18].mxu0 }
 0x33e   : > { %v2183_v0 = vadd.f32 %v4559_v42, %v6499_v48  ;;  %v2177_v13 = vpop.f32.mrb[19].mxu0 }
 0x33f   : > { %v2178_v16 = vadd.f32 %v6499_v48, %v2177_v13 }
 0x340   : > { %v2265_v52 = vmax.f32 %v2183_v0, 0.0 }
 0x341   : > { %v2264_v7 = vmax.f32 %v2178_v16, 0.0  ;;  %v2366_v39 = vld [vmem:[#allocation2 + $0xe1] sm:$0xff] }
 0x342   : > { %2297 = vst.msk [vmem:[#allocation2 + $0xf9] sm:$0xff] %vm257_vm0, %v2265_v52  ;;  %2673 = vrot.lane.b32.xlu1 %v2366_v39, %s4710_s25  ;;  %v2365_v38 = vld [vmem:[#allocation2 + $0xd9] sm:$0xff]  ;;  %v2379_v39 = vld [vmem:[#allocation2 + $0x2] sm:$0xff] }
 0x343   : > { %2296 = vst.msk [vmem:[#allocation2 + $0xf1] sm:$0xff] %vm257_vm0, %v2264_v7  ;;  %2671 = vrot.lane.b32.xlu0 %v2365_v38, %s4710_s25  ;;  %v2380_v7 = vld [vmem:[#allocation2 + $0xa] sm:$0xff]  ;;  %v6633_v38 = vld [vmem:[#allocation2 + $0x22] sm:$0xff] }
 0x345   : > { %v4562_v11 = vpop.f32.mrb[20].mxu0 }
 0x346   : > { %v2193_v33 = vadd.f32 %v4562_v11, %v6499_v48  ;;  %v2187_v55 = vpop.f32.mrb[21].mxu0  ;;  %v6641_v11 = vld [vmem:[#allocation2 + $0x3a] sm:$0xff] }
 0x347   : > { %v2188_v19 = vadd.f32 %v6499_v48, %v2187_v55  ;;  %v6649_v55 = vld [vmem:[#allocation2 + $0x52] sm:$0xff] }
 0x348   : > { %v2267_v44 = vmax.f32 %v2193_v33, 0.0  ;;  %v6645_v33 = vld [vmem:[#allocation2 + $0x32] sm:$0xff] }
 0x349   : > { %v2266_v15 = vmax.f32 %v2188_v19, 0.0  ;;  %v2368_v61 = vld [vmem:[#allocation2 + $0xf9] sm:$0xff]  ;;  %v6653_v19 = vld [vmem:[#allocation2 + $0x4a] sm:$0xff] }
 0x34a   : > { %2299 = vst.msk [vmem:[#allocation2 + $0x111] sm:$0xff] %vm257_vm0, %v2267_v44  ;;  %2677 = vrot.lane.b32.xlu1 %v2368_v61, %s4710_s25  ;;  %v2367_v40 = vld [vmem:[#allocation2 + $0xf1] sm:$0xff]  ;;  %v6665_v61 = vld [vmem:[#allocation2 + $0x82] sm:$0xff] }
 0x34b   : > { %2298 = vst.msk [vmem:[#allocation2 + $0x109] sm:$0xff] %vm257_vm0, %v2266_v15  ;;  %2675 = vrot.lane.b32.xlu0 %v2367_v40, %s4710_s25  ;;  %v6657_v44 = vld [vmem:[#allocation2 + $0x6a] sm:$0xff]  ;;  %v6661_v15 = vld [vmem:[#allocation2 + $0x62] sm:$0xff]  ;;  %v6669_v40 = vld [vmem:[#allocation2 + $0x7a] sm:$0xff] }
 0x34d   : > { %v4565_v9 = vpop.f32.mrb[22].mxu0 }
 0x34e   : > { %v2203_v59 = vadd.f32 %v4565_v9, %v6499_v48  ;;  %v2197_v5 = vpop.f32.mrb[23].mxu0  ;;  %v6673_v9 = vld [vmem:[#allocation2 + $0x9a] sm:$0xff] }
 0x34f   : > { %v2198_v58 = vadd.f32 %v6499_v48, %v2197_v5  ;;  %v6681_v5 = vld [vmem:[#allocation2 + $0xb2] sm:$0xff] }
 0x350   : > { %v2269_v31 = vmax.f32 %v2203_v59, 0.0  ;;  %v6677_v59 = vld [vmem:[#allocation2 + $0x92] sm:$0xff] }
 0x351   : > { %v2268_v14 = vmax.f32 %v2198_v58, 0.0  ;;  %v2370_v8 = vld [vmem:[#allocation2 + $0x111] sm:$0xff] }
 0x352   : > { %2301 = vst.msk [vmem:[#allocation2 + $0x129] sm:$0xff] %vm257_vm0, %v2269_v31  ;;  %2681 = vrot.lane.b32.xlu1 %v2370_v8, %s4710_s25  ;;  %v2369_v62 = vld [vmem:[#allocation2 + $0x109] sm:$0xff] }
 0x353   : > { %2300 = vst.msk [vmem:[#allocation2 + $0x121] sm:$0xff] %vm257_vm0, %v2268_v14  ;;  %2679 = vrot.lane.b32.xlu0 %v2369_v62, %s4710_s25  ;;  %v6685_v58 = vld [vmem:[#allocation2 + $0xaa] sm:$0xff]  ;;  %v6693_v14 = vld [vmem:[#allocation2 + $0xc2] sm:$0xff]  ;;  %v6701_v62 = vld [vmem:[#allocation2 + $0xda] sm:$0xff] }
 0x354   : > { %v6689_v31 = vld [vmem:[#allocation2 + $0xca] sm:$0xff]  ;;  %v6697_v8 = vld [vmem:[#allocation2 + $0xe2] sm:$0xff] }
 0x355   : > { %v4568_v54 = vpop.f32.mrb[24].mxu0 }
 0x356   : > { %v2213_v47 = vadd.f32 %v4568_v54, %v6499_v48  ;;  %v2207_v50 = vpop.f32.mrb[25].mxu0  ;;  %v6705_v54 = vld [vmem:[#allocation2 + $0xfa] sm:$0xff] }
 0x357   : > { %v2208_v43 = vadd.f32 %v6499_v48, %v2207_v50  ;;  %8281 = vst [vmem:[#allocation35_spill] sm:$0xff] %v6705_v54  ;;  %v2402_v50 = vld [vmem:[#allocation2 + $0x112] sm:$0xff] }
 0x358   : > { %v2271_v3 = vmax.f32 %v2213_v47, 0.0  ;;  %v6709_v47 = vld [vmem:[#allocation2 + $0xf2] sm:$0xff] }
 0x359   : > { %v2270_v1 = vmax.f32 %v2208_v43, 0.0  ;;  %v2372_v56 = vld [vmem:[#allocation2 + $0x129] sm:$0xff] }
 0x35a   : > { %2303 = vst.msk [vmem:[#allocation2 + $0x141] sm:$0xff] %vm257_vm0, %v2271_v3  ;;  %2685 = vrot.lane.b32.xlu1 %v2372_v56, %s4710_s25  ;;  %v2371_v6 = vld [vmem:[#allocation2 + $0x121] sm:$0xff]  ;;  %v2401_v43 = vld [vmem:[#allocation2 + $0x10a] sm:$0xff]  ;;  %v6715_v3 = vpop.permute.xlu1 %2637 }
 0x35b   : > { %2302 = vst.msk [vmem:[#allocation2 + $0x139] sm:$0xff] %vm257_vm0, %v2270_v1  ;;  %2683 = vrot.lane.b32.xlu0 %v2371_v6, %s4710_s25  ;;  %v6717_v1 = vpop.permute.xlu0 %2635  ;;  %v2404_v56 = vld [vmem:[#allocation2 + $0x12a] sm:$0xff]  ;;  %v2403_v6 = vld [vmem:[#allocation2 + $0x122] sm:$0xff] }
 0x35d   : > { %v4571_v29 = vpop.f32.mrb[26].mxu0 }
 0x35e   : > { %v2223_v63 = vadd.f32 %v4571_v29, %v6499_v48  ;;  %v2217_v12 = vpop.f32.mrb[27].mxu0 }
 0x35f   : > { %v2218_v46 = vadd.f32 %v6499_v48, %v2217_v12 }
 0x360   : > { %v2273_v53 = vmax.f32 %v2223_v63, 0.0 }
 0x361   : > { %v2272_v45 = vmax.f32 %v2218_v46, 0.0  ;;  %v2374_v41 = vld [vmem:[#allocation2 + $0x141] sm:$0xff] }
 0x362   : > { %2305 = vst.msk [vmem:[#allocation2 + $0x159] sm:$0xff] %vm257_vm0, %v2273_v53  ;;  %2689 = vrot.lane.b32.xlu1 %v2374_v41, %s4710_s25  ;;  %v2373_v10 = vld [vmem:[#allocation2 + $0x139] sm:$0xff]  ;;  %v2406_v29 = vld [vmem:[#allocation2 + $0x142] sm:$0xff] }
 0x363   : > { %2304 = vst.msk [vmem:[#allocation2 + $0x151] sm:$0xff] %vm257_vm0, %v2272_v45  ;;  %2687 = vrot.lane.b32.xlu0 %v2373_v10, %s4710_s25  ;;  %v2405_v12 = vld [vmem:[#allocation2 + $0x13a] sm:$0xff] }
 0x365   : > { %v4574_v28 = vpop.f32.mrb[28].mxu0 }
 0x366   : > { %v2233_v37 = vadd.f32 %v4574_v28, %v6499_v48  ;;  %v2227_v22 = vpop.f32.mrb[29].mxu0 }
 0x367   : > { %v2228_v30 = vadd.f32 %v6499_v48, %v2227_v22 }
 0x368   : > { %v2275_v4 = vmax.f32 %v2233_v37, 0.0 }
 0x369   : > { %v2274_v36 = vmax.f32 %v2228_v30, 0.0  ;;  %v2376_v60 = vld [vmem:[#allocation2 + $0x159] sm:$0xff] }
 0x36a   : > { %2307 = vst.msk [vmem:[#allocation2 + $0x171] sm:$0xff] %vm257_vm0, %v2275_v4  ;;  %2693 = vrot.lane.b32.xlu1 %v2376_v60, %s4710_s25  ;;  %v2375_v21 = vld [vmem:[#allocation2 + $0x151] sm:$0xff]  ;;  %v2408_v53 = vld [vmem:[#allocation2 + $0x15a] sm:$0xff] }
 0x36b   : > { %2306 = vst.msk [vmem:[#allocation2 + $0x169] sm:$0xff] %vm257_vm0, %v2274_v36  ;;  %2691 = vrot.lane.b32.xlu0 %v2375_v21, %s4710_s25  ;;  %v2407_v45 = vld [vmem:[#allocation2 + $0x152] sm:$0xff]  ;;  %v6737_v30 = vld [vmem:[#allocation2 + $0x20] sm:$0xff] }
 0x36c   : > { %v6741_v36 = vld [vmem:[#allocation2 + $0x18] sm:$0xff] }
 0x36d   : > { %v4577_v20 = vpop.f32.mrb[30].mxu0  ;;  %v6749_v21 = vld [vmem:[#allocation2 + $0x38] sm:$0xff] }
 0x36e   : > { %v2243_v34 = vadd.f32 %v4577_v20, %v6499_v48  ;;  %v2237_v25 = vpop.f32.mrb[31].mxu0 }
 0x36f   : > { %v2238_v42 = vadd.f32 %v6499_v48, %v2237_v25  ;;  %v6637_v48 = vld [vmem:[#allocation2 + $0x1a] sm:$0xff] }
 0x370   : > { %v2277_v0 = vmax.f32 %v2243_v34, 0.0  ;;  %v6753_v34 = vld [vmem:[#allocation2 + $0x30] sm:$0xff] }
 0x371   : > { %v2276_v13 = vmax.f32 %v2238_v42, 0.0  ;;  %v2378_v16 = vld [vmem:[#allocation2 + $0x171] sm:$0xff] }
 0x372   : > { %2309 = vst.msk [vmem:[#allocation2 + $0x189] sm:$0xff] %vm257_vm0, %v2277_v0  ;;  %2697 = vrot.lane.b32.xlu1 %v2378_v16, %s4710_s25  ;;  %v2377_v52 = vld [vmem:[#allocation2 + $0x169] sm:$0xff]  ;;  %v2410_v28 = vld [vmem:[#allocation2 + $0x172] sm:$0xff] }
 0x373   : > { %2308 = vst.msk [vmem:[#allocation2 + $0x181] sm:$0xff] %vm257_vm0, %v2276_v13  ;;  %2695 = vrot.lane.b32.xlu0 %v2377_v52, %s4710_s25  ;;  %v2409_v37 = vld [vmem:[#allocation2 + $0x16a] sm:$0xff] }
 0x374   : > { %v6761_v42 = vld [vmem:[#allocation2 + $0x50] sm:$0xff]  ;;  %v6765_v13 = vld [vmem:[#allocation2 + $0x48] sm:$0xff] }
 0x375   : > { %v6773_v52 = vld [vmem:[#allocation2 + $0x68] sm:$0xff] }
 0x376   : > { %2765 = vrot.lane.b32.xlu1 %v2380_v7, %s4711_s26 }
 0x377   : > { %2763 = vrot.lane.b32.xlu0 %v2379_v39, %s4711_s26  ;;  %v6777_v39 = vld [vmem:[#allocation2 + $0x60] sm:$0xff] }
 0x379   : > { %v6721_v63 = vpop.permute.xlu1 %2641 }
 0x37a   : > { %2769 = vrot.lane.b32.xlu1 %v6633_v38, %s4711_s26  ;;  %v6724_v46 = vpop.permute.xlu0 %2639 }
 0x37b   : > { %2767 = vrot.lane.b32.xlu0 %v6637_v48, %s4711_s26 }
 0x37d   : > { %v6729_v41 = vpop.permute.xlu1 %2645 }
 0x37e   : > { %2773 = vrot.lane.b32.xlu1 %v6641_v11, %s4711_s26  ;;  %v6731_v10 = vpop.permute.xlu0 %2643 }
 0x37f   : > { %2771 = vrot.lane.b32.xlu0 %v6645_v33, %s4711_s26 }
 0x382   : > { %2777 = vrot.lane.b32.xlu1 %v6649_v55, %s4711_s26 }
 0x383   : > { %2775 = vrot.lane.b32.xlu0 %v6653_v19, %s4711_s26 }
 0x384   : > { %v6735_v22 = vpop.permute.xlu1 %2649 }
 0x385   : > { %8282 = vst [vmem:[#allocation36_spill] sm:$0xff] %v6735_v22  ;;  %v6739_v4 = vpop.permute.xlu0 %2647  ;;  %v6859_v22 = vld [vmem:[#allocation2 + $0x108] sm:$0xff] }
 0x386   : > { %2781 = vrot.lane.b32.xlu1 %v6657_v44, %s4711_s26  ;;  %8283 = vst [vmem:[#allocation38_spill] sm:$0xff] %v6739_v4 }
 0x387   : > { %2779 = vrot.lane.b32.xlu0 %v6661_v15, %s4711_s26 }
 0x38a   : > { %2785 = vrot.lane.b32.xlu1 %v6665_v61, %s4711_s26 }
 0x38b   : > { %2783 = vrot.lane.b32.xlu0 %v6669_v40, %s4711_s26 }
 0x38c   : > { %v6747_v60 = vpop.permute.xlu1 %2653 }
 0x38d   : > { %8284 = vst [vmem:[#allocation44_spill] sm:$0xff] %v6747_v60  ;;  %v6751_v20 = vpop.permute.xlu0 %2651 }
 0x38e   : > { %2789 = vrot.lane.b32.xlu1 %v6673_v9, %s4711_s26  ;;  %8285 = vst [vmem:[#allocation40_spill] sm:$0xff] %v6751_v20  ;;  %v6849_v20 = vld [vmem:[#allocation2 + $0xf0] sm:$0xff] }
 0x38f   : > { %2787 = vrot.lane.b32.xlu0 %v6677_v59, %s4711_s26 }
 0x392   : > { %2793 = vrot.lane.b32.xlu1 %v6681_v5, %s4711_s26 }
 0x393   : > { %2791 = vrot.lane.b32.xlu0 %v6685_v58, %s4711_s26 }
 0x394   : > { %v6759_v25 = vpop.permute.xlu1 %2657 }
 0x395   : > { %8286 = vst [vmem:[#allocation95_spill] sm:$0xff] %v6759_v25  ;;  %v6763_v0 = vpop.permute.xlu0 %2655 }
 0x396   : > { %2797 = vrot.lane.b32.xlu1 %v6689_v31, %s4711_s26  ;;  %8287 = vst [vmem:[#allocation42_spill] sm:$0xff] %v6763_v0  ;;  %v6837_v0 = vld [vmem:[#allocation2 + $0xd8] sm:$0xff] }
 0x397   : > { %2795 = vrot.lane.b32.xlu0 %v6693_v14, %s4711_s26 }
 0x39a   : > { %2801 = vrot.lane.b32.xlu1 %v6697_v8, %s4711_s26 }
 0x39b   : > { %2799 = vrot.lane.b32.xlu0 %v6701_v62, %s4711_s26 }
 0x39c   : > { %v6771_v16 = vpop.permute.xlu1 %2661 }
 0x39d   : > { %8288 = vst [vmem:[#allocation50_spill] sm:$0xff] %v6771_v16  ;;  %v6775_v7 = vpop.permute.xlu0 %2659 }
 0x39e   : > { %2805 = vrot.lane.b32.xlu1 %v6705_v54, %s4711_s26  ;;  %8289 = vst [vmem:[#allocation100_spill] sm:$0xff] %v6775_v7  ;;  %v6825_v7 = vld [vmem:[#allocation2 + $0xc0] sm:$0xff]  ;;  %v2313_v54 = vld [vmem:[%s7808_s3 + $0x18] sm:$0xff] }
 0x39f   : > { %2803 = vrot.lane.b32.xlu0 %v6709_v47, %s4711_s26  ;;  %8303 = vst [vmem:[#allocation37_spill] sm:$0xff] %v6825_v7 }
 0x3a2   : > { %2809 = vrot.lane.b32.xlu1 %v2402_v50, %s4711_s26 }
 0x3a3   : > { %2807 = vrot.lane.b32.xlu0 %v2401_v43, %s4711_s26  ;;  %v6785_v43 = vld [vmem:[#allocation2 + $0x80] sm:$0xff] }
 0x3a4   : > { %v6783_v50 = vpop.permute.xlu1 %2665  ;;  %8291 = vst [vmem:[#allocation102_spill] sm:$0xff] %v6785_v43 }
 0x3a5   : > { %8290 = vst [vmem:[#allocation99_spill] sm:$0xff] %v6783_v50 }
 0x3a6   : > { %2813 = vrot.lane.b32.xlu1 %v2404_v56, %s4711_s26  ;;  %v6787_v56 = vpop.permute.xlu0 %2663 }
 0x3a7   : > { %2811 = vrot.lane.b32.xlu0 %v2403_v6, %s4711_s26  ;;  %8292 = vst [vmem:[#allocation103_spill] sm:$0xff] %v6787_v56  ;;  %v6789_v6 = vld [vmem:[#allocation2 + $0x78] sm:$0xff]  ;;  %v6813_v56 = vld [vmem:[#allocation2 + $0xa8] sm:$0xff] }
 0x3a8   : > { %8300 = vst [vmem:[#allocation53_spill] sm:$0xff] %v6813_v56 }
 0x3aa   : > { %2817 = vrot.lane.b32.xlu1 %v2406_v29, %s4711_s26 }
 0x3ab   : > { %2815 = vrot.lane.b32.xlu0 %v2405_v12, %s4711_s26  ;;  %v6797_v12 = vld [vmem:[#allocation2 + $0x98] sm:$0xff] }
 0x3ac   : > { %v6795_v29 = vpop.permute.xlu1 %2669  ;;  %8294 = vst [vmem:[#allocation105_spill] sm:$0xff] %v6797_v12 }
 0x3ad   : > { %8293 = vst [vmem:[#allocation46_spill] sm:$0xff] %v6795_v29 }
 0x3ae   : > { %2821 = vrot.lane.b32.xlu1 %v2408_v53, %s4711_s26  ;;  %v6799_v53 = vpop.permute.xlu0 %2667 }
 0x3af   : > { %2819 = vrot.lane.b32.xlu0 %v2407_v45, %s4711_s26  ;;  %8295 = vst [vmem:[#allocation43_spill] sm:$0xff] %v6799_v53  ;;  %v6801_v45 = vld [vmem:[#allocation2 + $0x90] sm:$0xff]  ;;  %v6821_v53 = vld [vmem:[#allocation2 + $0xc8] sm:$0xff] }
 0x3b0   : > { %8296 = vst [vmem:[#allocation104_spill] sm:$0xff] %v6801_v45 }
 0x3b2   : > { %2825 = vrot.lane.b32.xlu1 %v2410_v28, %s4711_s26 }
 0x3b3   : > { %2823 = vrot.lane.b32.xlu0 %v2409_v37, %s4711_s26  ;;  %v6809_v37 = vld [vmem:[#allocation2 + $0xb0] sm:$0xff] }
 0x3b4   : > { %v6807_v28 = vpop.permute.xlu1 %2673  ;;  %8298 = vst [vmem:[#allocation47_spill] sm:$0xff] %v6809_v37 }
 0x3b5   : > { %8297 = vst [vmem:[#allocation49_spill] sm:$0xff] %v6807_v28  ;;  %v6811_v50 = vpop.permute.xlu0 %2671 }
 0x3b6   : > { %2893 = vrot.lane.b32.xlu1 %v6737_v30, %s4712_s27  ;;  %8299 = vst [vmem:[#allocation106_spill] sm:$0xff] %v6811_v50  ;;  %v6833_v50 = vld [vmem:[#allocation2 + $0xe0] sm:$0xff] }
 0x3b7   : > { %2891 = vrot.lane.b32.xlu0 %v6741_v36, %s4712_s27 }
 0x3ba   : > { %2897 = vrot.lane.b32.xlu1 %v6749_v21, %s4712_s27 }
 0x3bb   : > { %2895 = vrot.lane.b32.xlu0 %v6753_v34, %s4712_s27 }
 0x3bc   : > { %v6819_v29 = vpop.permute.xlu1 %2677 }
 0x3bd   : > { %8301 = vst [vmem:[#allocation51_spill] sm:$0xff] %v6819_v29  ;;  %v6823_v16 = vpop.permute.xlu0 %2675 }
 0x3be   : > { %2901 = vrot.lane.b32.xlu1 %v6761_v42, %s4712_s27  ;;  %8302 = vst [vmem:[#allocation88_spill] sm:$0xff] %v6823_v16  ;;  %v6845_v16 = vld [vmem:[#allocation2 + $0xf8] sm:$0xff] }
 0x3bf   : > { %2899 = vrot.lane.b32.xlu0 %v6765_v13, %s4712_s27 }
 0x3c2   : > { %2905 = vrot.lane.b32.xlu1 %v6773_v52, %s4712_s27 }
 0x3c3   : > { %2903 = vrot.lane.b32.xlu0 %v6777_v39, %s4712_s27 }
 0x3c4   : > { %v6831_v28 = vpop.permute.xlu1 %2681 }
 0x3c5   : > { %8304 = vst [vmem:[#allocation165_spill] sm:$0xff] %v6831_v28  ;;  %v6835_v25 = vpop.permute.xlu0 %2679 }
 0x3c6   : > { %2909 = vrot.lane.b32.xlu1 %v6785_v43, %s4712_s27  ;;  %8305 = vst [vmem:[#allocation86_spill] sm:$0xff] %v6835_v25 }
 0x3c7   : > { %2907 = vrot.lane.b32.xlu0 %v6789_v6, %s4712_s27 }
 0x3ca   : > { %2913 = vrot.lane.b32.xlu1 %v6797_v12, %s4712_s27 }
 0x3cb   : > { %2911 = vrot.lane.b32.xlu0 %v6801_v45, %s4712_s27 }
 0x3cc   : > { %v6843_v29 = vpop.permute.xlu1 %2685 }
 0x3cd   : > { %8306 = vst [vmem:[#allocation164_spill] sm:$0xff] %v6843_v29  ;;  %v6847_v60 = vpop.permute.xlu0 %2683  ;;  %v2310_v29 = vld [vmem:[%s7808_s3] sm:$0xff] }
 0x3ce   : > { %2917 = vrot.lane.b32.xlu1 %v6809_v37, %s4712_s27  ;;  %8307 = vst [vmem:[#allocation57_spill] sm:$0xff] %v6847_v60  ;;  %v2311_v60 = vld [vmem:[%s7808_s3 + $0x8] sm:$0xff] }
 0x3cf   : > { %2915 = vrot.lane.b32.xlu0 %v6813_v56, %s4712_s27  ;;  %v4644_v4 = vpack.c.bf16 %v2311_v60, %v2310_v29 }
 0x3d1   : > { %4645 = vmatprep.subr.bf16.mxu1 %v4644_v4 }
 0x3d2   : > { %2921 = vrot.lane.b32.xlu1 %v6821_v53, %s4712_s27  ;;  %4647 = vmatpush3.bf16.msra.mxu1 %v4644_v4 }
 0x3d3   : > { %2919 = vrot.lane.b32.xlu0 %v6825_v7, %s4712_s27 }
 0x3d4   : > { %v6855_v28 = vpop.permute.xlu1 %2689 }
 0x3d5   : > { %8308 = vst [vmem:[#allocation108_spill] sm:$0xff] %v6855_v28  ;;  %v6857_v25 = vpop.permute.xlu0 %2687 }
 0x3d6   : > { %2925 = vrot.lane.b32.xlu1 %v6833_v50, %s4712_s27  ;;  %8309 = vst [vmem:[#allocation55_spill] sm:$0xff] %v6857_v25 }
 0x3d7   : > { %2923 = vrot.lane.b32.xlu0 %v6837_v0, %s4712_s27 }
 0x3da   : > { %2929 = vrot.lane.b32.xlu1 %v6845_v16, %s4712_s27 }
 0x3db   : > { %2927 = vrot.lane.b32.xlu0 %v6849_v20, %s4712_s27 }
 0x3dc   : > { %v6871_v28 = vpop.permute.xlu1 %2693 }
 0x3dd   : > { %8310 = vst [vmem:[#allocation129_spill] sm:$0xff] %v6871_v28  ;;  %v6873_v25 = vpop.permute.xlu0 %2691 }
 0x3de   : > { %3019 = vrot.lane.b32.xlu1 %v6515_v26, %s4713_s28  ;;  %8311 = vst [vmem:[#allocation107_spill] sm:$0xff] %v6873_v25  ;;  %v2312_v26 = vld [vmem:[%s7808_s3 + $0x10] sm:$0xff] }
 0x3df   : > { %2931 = vrot.lane.b32.xlu0 %v6859_v22, %s4712_s27  ;;  %v4648_v60 = vpack.c.bf16 %v2313_v54, %v2312_v26 }
 0x3e1   : > { %4649 = vmatprep.subr.bf16.mxu1 %v4648_v60 }
 0x3e2   : > { %3147 = vrot.lane.b32.xlu1 %v6637_v48, %s4714_s29  ;;  %4651 = vmatpush3.bf16.msra.mxu1 %v4648_v60  ;;  %v2314_v48 = vld [vmem:[%s7808_s3 + $0x20] sm:$0xf] }
 0x3e3   : > { %3021 = vrot.lane.b32.xlu0 %v6510_v27, %s4713_s28  ;;  %4586 = vmatprep.subr.msk.mxu1 %vm2017_vm3, %v2314_v48 }
 0x3e4   : > { %v6885_v29 = vpop.permute.xlu1 %2697 }
 0x3e5   : > { %8312 = vst [vmem:[#allocation41_spill] sm:$0xff] %v6885_v29  ;;  %v6887_v28 = vpop.permute.xlu0 %2695 }
 0x3e6   : > { %8313 = vst [vmem:[#allocation128_spill] sm:$0xff] %v6887_v28  ;;  %3275 = vrot.lane.b32.xlu1 %v6753_v34, %s4715_s30  ;;  %4587 = vmatpush3.msk.msra.mxu1 %vm2017_vm3, %v2314_v48 }
 0x3e7   : > { %3149 = vrot.lane.b32.xlu0 %v6633_v38, %s4714_s29 }
 0x3e8   : > { %v6896_v4 = vpop.permute.xlu1 %2765 }
 0x3e9   : > { %v6899_v27 = vpop.permute.xlu0 %2763 }
 0x3ea   : > { %3403 = vrot.lane.b32.xlu1 %v6525_v24, %s4716_s14 }
 0x3eb   : > { %3277 = vrot.lane.b32.xlu0 %v6749_v21, %s4715_s30 }
 0x3ec   : > { %v6906_v54 = vpop.permute.xlu1 %2769 }
 0x3ed   : > { %v6908_v38 = vpop.permute.xlu0 %2767 }
 0x3ee   : > { %3405 = vrot.lane.b32.xlu1 %v6520_v51, %s4716_s14 }
 0x3ef   : > { %3023 = vrot.lane.b32.xlu0 %v6525_v24, %s4713_s28 }
 0x3f0   : > { %v6914_v26 = vpop.permute.xlu1 %2773 }
 0x3f1   : > { %v6916_v60 = vpop.permute.xlu0 %2771 }
 0x3f2   : > { %3025 = vrot.lane.b32.xlu1 %v6520_v51, %s4713_s28 }
 0x3f3   : > { %3531 = vrot.lane.b32.xlu0 %v6645_v33, %s4717_s17 }
 0x3f4   : > { %v6922_v48 = vpop.permute.xlu1 %2777 }
 0x3f5   : > { %v6924_v29 = vpop.permute.xlu0 %2775 }
 0x3f6   : > { %3533 = vrot.lane.b32.xlu1 %v6641_v11, %s4717_s17 }
 0x3f7   : > { %3151 = vrot.lane.b32.xlu0 %v6645_v33, %s4714_s29 }
 0x3f8   : > { %v6930_v24 = vpop.permute.xlu1 %2781 }
 0x3f9   : > { %8314 = vst [vmem:[#allocation92_spill] sm:$0xff] %v6930_v24  ;;  %v6932_v28 = vpop.permute.xlu0 %2779 }
 0x3fa   : > { %3279 = vrot.lane.b32.xlu1 %v6765_v13, %s4715_s30 }
 0x3fb   : > { %3153 = vrot.lane.b32.xlu0 %v6641_v11, %s4714_s29 }
 0x3fc   : > { %v6938_v51 = vpop.permute.xlu1 %2785 }
 0x3fd   : > { %8315 = vst [vmem:[#allocation39_spill] sm:$0xff] %v6938_v51  ;;  %v6940_v25 = vpop.permute.xlu0 %2783 }
 0x3fe   : > { %8316 = vst [vmem:[#allocation167_spill] sm:$0xff] %v6940_v25  ;;  %3407 = vrot.lane.b32.xlu1 %v6536_v49, %s4716_s14 }
 0x3ff   : > { %3281 = vrot.lane.b32.xlu0 %v6761_v42, %s4715_s30 }
 0x400   : > { %v6946_v33 = vpop.permute.xlu1 %2789 }
 0x401   : > { %8317 = vst [vmem:[#allocation90_spill] sm:$0xff] %v6946_v33  ;;  %v6948_v24 = vpop.permute.xlu0 %2787 }
 0x402   : > { %8318 = vst [vmem:[#allocation166_spill] sm:$0xff] %v6948_v24  ;;  %3409 = vrot.lane.b32.xlu1 %v6531_v2, %s4716_s14 }
 0x403   : > { %3027 = vrot.lane.b32.xlu0 %v6536_v49, %s4713_s28 }
 0x404   : > { %v6954_v11 = vpop.permute.xlu1 %2793 }
 0x405   : > { %8319 = vst [vmem:[#allocation61_spill] sm:$0xff] %v6954_v11  ;;  %v6956_v51 = vpop.permute.xlu0 %2791 }
 0x406   : > { %8320 = vst [vmem:[#allocation110_spill] sm:$0xff] %v6956_v51  ;;  %3029 = vrot.lane.b32.xlu1 %v6531_v2, %s4713_s28 }
 0x407   : > { %3535 = vrot.lane.b32.xlu0 %v6653_v19, %s4717_s17 }
 0x408   : > { %v6962_v25 = vpop.permute.xlu1 %2797 }
 0x409   : > { %8321 = vst [vmem:[#allocation59_spill] sm:$0xff] %v6962_v25  ;;  %v6964_v33 = vpop.permute.xlu0 %2795 }
 0x40a   : > { %8322 = vst [vmem:[#allocation131_spill] sm:$0xff] %v6964_v33  ;;  %3537 = vrot.lane.b32.xlu1 %v6649_v55, %s4717_s17 }
 0x40b   : > { %3155 = vrot.lane.b32.xlu0 %v6653_v19, %s4714_s29 }
 0x40c   : > { %v6970_v49 = vpop.permute.xlu1 %2801 }
 0x40d   : > { %8323 = vst [vmem:[#allocation109_spill] sm:$0xff] %v6970_v49  ;;  %v6972_v11 = vpop.permute.xlu0 %2799 }
 0x40e   : > { %8324 = vst [vmem:[#allocation48_spill] sm:$0xff] %v6972_v11  ;;  %3283 = vrot.lane.b32.xlu1 %v6777_v39, %s4715_s30 }
 0x40f   : > { %3157 = vrot.lane.b32.xlu0 %v6649_v55, %s4714_s29 }
 0x410   : > { %v6978_v2 = vpop.permute.xlu1 %2805 }
 0x411   : > { %8325 = vst [vmem:[#allocation130_spill] sm:$0xff] %v6978_v2  ;;  %v6980_v25 = vpop.permute.xlu0 %2803 }
 0x412   : > { %8326 = vst [vmem:[#allocation96_spill] sm:$0xff] %v6980_v25  ;;  %3411 = vrot.lane.b32.xlu1 %v6548_v35, %s4716_s14 }
 0x413   : > { %3285 = vrot.lane.b32.xlu0 %v6773_v52, %s4715_s30 }
 0x414   : > { %v6986_v19 = vpop.permute.xlu1 %2809 }
 0x415   : > { %8327 = vst [vmem:[#allocation45_spill] sm:$0xff] %v6986_v19  ;;  %v6988_v49 = vpop.permute.xlu0 %2807 }
 0x416   : > { %8328 = vst [vmem:[#allocation169_spill] sm:$0xff] %v6988_v49  ;;  %3413 = vrot.lane.b32.xlu1 %v6543_v32, %s4716_s14 }
 0x417   : > { %3031 = vrot.lane.b32.xlu0 %v6548_v35, %s4713_s28 }
 0x418   : > { %v6994_v55 = vpop.permute.xlu1 %2813 }
 0x419   : > { %8329 = vst [vmem:[#allocation94_spill] sm:$0xff] %v6994_v55  ;;  %v6996_v2 = vpop.permute.xlu0 %2811 }
 0x41a   : > { %8330 = vst [vmem:[#allocation168_spill] sm:$0xff] %v6996_v2  ;;  %3033 = vrot.lane.b32.xlu1 %v6543_v32, %s4713_s28 }
 0x41b   : > { %3539 = vrot.lane.b32.xlu0 %v6661_v15, %s4717_s17 }
 0x41c   : > { %v7002_v25 = vpop.permute.xlu1 %2817 }
 0x41d   : > { %8331 = vst [vmem:[#allocation65_spill] sm:$0xff] %v7002_v25  ;;  %v7004_v19 = vpop.permute.xlu0 %2815 }
 0x41e   : > { %8332 = vst [vmem:[#allocation112_spill] sm:$0xff] %v7004_v19  ;;  %3541 = vrot.lane.b32.xlu1 %v6657_v44, %s4717_s17 }
 0x41f   : > { %3159 = vrot.lane.b32.xlu0 %v6661_v15, %s4714_s29 }
 0x420   : > { %v7010_v35 = vpop.permute.xlu1 %2821 }
 0x421   : > { %8333 = vst [vmem:[#allocation63_spill] sm:$0xff] %v7010_v35  ;;  %v7012_v55 = vpop.permute.xlu0 %2819 }
 0x422   : > { %8334 = vst [vmem:[#allocation133_spill] sm:$0xff] %v7012_v55  ;;  %3287 = vrot.lane.b32.xlu1 %v6789_v6, %s4715_s30 }
 0x423   : > { %3161 = vrot.lane.b32.xlu0 %v6657_v44, %s4714_s29 }
 0x424   : > { %v7018_v32 = vpop.permute.xlu1 %2825 }
 0x425   : > { %8335 = vst [vmem:[#allocation111_spill] sm:$0xff] %v7018_v32  ;;  %v7020_v25 = vpop.permute.xlu0 %2823 }
 0x426   : > { %8336 = vst [vmem:[#allocation54_spill] sm:$0xff] %v7020_v25  ;;  %3415 = vrot.lane.b32.xlu1 %v6560_v17, %s4716_s14 }
 0x427   : > { %3289 = vrot.lane.b32.xlu0 %v6785_v43, %s4715_s30 }
 0x428   : > { %v7026_v15 = vpop.permute.xlu1 %2893 }
 0x429   : > { %v7028_v35 = vpop.permute.xlu0 %2891 }
 0x42a   : > { %3417 = vrot.lane.b32.xlu1 %v6555_v57, %s4716_s14 }
 0x42b   : > { %3035 = vrot.lane.b32.xlu0 %v6560_v17, %s4713_s28 }
 0x42c   : > { %v7034_v44 = vpop.permute.xlu1 %2897 }
 0x42d   : > { %v7036_v32 = vpop.permute.xlu0 %2895 }
 0x42e   : > { %3037 = vrot.lane.b32.xlu1 %v6555_v57, %s4713_s28 }
 0x42f   : > { %3543 = vrot.lane.b32.xlu0 %v6669_v40, %s4717_s17 }
 0x430   : > { %v7042_v25 = vpop.permute.xlu1 %2901 }
 0x431   : > { %v7044_v55 = vpop.permute.xlu0 %2899 }
 0x432   : > { %3545 = vrot.lane.b32.xlu1 %v6665_v61, %s4717_s17 }
 0x433   : > { %3163 = vrot.lane.b32.xlu0 %v6669_v40, %s4714_s29 }
 0x434   : > { %v7050_v17 = vpop.permute.xlu1 %2905 }
 0x435   : > { %v7052_v19 = vpop.permute.xlu0 %2903 }
 0x436   : > { %3291 = vrot.lane.b32.xlu1 %v6801_v45, %s4715_s30 }
 0x437   : > { %3165 = vrot.lane.b32.xlu0 %v6665_v61, %s4714_s29 }
 0x438   : > { %v7058_v57 = vpop.permute.xlu1 %2909 }
 0x439   : > { %v7060_v2 = vpop.permute.xlu0 %2907 }
 0x43a   : > { %3419 = vrot.lane.b32.xlu1 %v6572_v23, %s4716_s14 }
 0x43b   : > { %3293 = vrot.lane.b32.xlu0 %v6797_v12, %s4715_s30 }
 0x43c   : > { %v7066_v40 = vpop.permute.xlu1 %2913 }
 0x43d   : > { %8337 = vst [vmem:[#allocation132_spill] sm:$0xff] %v7066_v40  ;;  %v7068_v49 = vpop.permute.xlu0 %2911  ;;  %v2551_v40 = vld [vmem:[#allocation2 + $0xc1] sm:$0xff] }
 0x43e   : > { %3421 = vrot.lane.b32.xlu1 %v6567_v18, %s4716_s14 }
 0x43f   : > { %3039 = vrot.lane.b32.xlu0 %v6572_v23, %s4713_s28 }
 0x440   : > { %v7074_v61 = vpop.permute.xlu1 %2917 }
 0x441   : > { %8338 = vst [vmem:[#allocation101_spill] sm:$0xff] %v7074_v61  ;;  %v7076_v11 = vpop.permute.xlu0 %2915 }
 0x442   : > { %8339 = vst [vmem:[#allocation52_spill] sm:$0xff] %v7076_v11  ;;  %3041 = vrot.lane.b32.xlu1 %v6567_v18, %s4713_s28 }
 0x443   : > { %3547 = vrot.lane.b32.xlu0 %v6677_v59, %s4717_s17 }
 0x444   : > { %v7082_v33 = vpop.permute.xlu1 %2921 }
 0x445   : > { %8340 = vst [vmem:[#allocation171_spill] sm:$0xff] %v7082_v33  ;;  %v7084_v51 = vpop.permute.xlu0 %2919 }
 0x446   : > { %8341 = vst [vmem:[#allocation98_spill] sm:$0xff] %v7084_v51  ;;  %3549 = vrot.lane.b32.xlu1 %v6673_v9, %s4717_s17  ;;  %v2549_v51 = vld [vmem:[#allocation2 + $0xa9] sm:$0xff] }
 0x447   : > { %3167 = vrot.lane.b32.xlu0 %v6677_v59, %s4714_s29 }
 0x448   : > { %v7090_v23 = vpop.permute.xlu1 %2925 }
 0x449   : > { %8342 = vst [vmem:[#allocation170_spill] sm:$0xff] %v7090_v23  ;;  %v7092_v61 = vpop.permute.xlu0 %2923 }
 0x44a   : > { %8343 = vst [vmem:[#allocation69_spill] sm:$0xff] %v7092_v61  ;;  %3295 = vrot.lane.b32.xlu1 %v6813_v56, %s4715_s30  ;;  %v2550_v61 = vld [vmem:[#allocation2 + $0xb1] sm:$0xff] }
 0x44b   : > { %3169 = vrot.lane.b32.xlu0 %v6673_v9, %s4714_s29 }
 0x44c   : > { %v7098_v18 = vpop.permute.xlu1 %2929 }
 0x44d   : > { %8344 = vst [vmem:[#allocation114_spill] sm:$0xff] %v7098_v18  ;;  %v7100_v33 = vpop.permute.xlu0 %2927 }
 0x44e   : > { %8345 = vst [vmem:[#allocation67_spill] sm:$0xff] %v7100_v33  ;;  %3423 = vrot.lane.b32.xlu1 %v2549_v51, %s4716_s14 }
 0x44f   : > { %3297 = vrot.lane.b32.xlu0 %v6809_v37, %s4715_s30 }
 0x450   : > { %v3020_v59 = vpop.permute.xlu1 %3019 }
 0x451   : > { %v7105_v23 = vpop.permute.xlu0 %2931 }
 0x452   : > { %8346 = vst [vmem:[#allocation135_spill] sm:$0xff] %v7105_v23  ;;  %3425 = vrot.lane.b32.xlu1 %v2550_v61, %s4716_s14  ;;  %v2315_v23 = vld [vmem:[#allocation2] sm:$0xff] }
 0x453   : > { %3043 = vrot.lane.b32.xlu0 %v2549_v51, %s4713_s28  ;;  %v2316_v51 = vld [vmem:[#allocation2 + $0x8] sm:$0xff] }
 0x454   : > { %v3148_v56 = vpop.permute.xlu1 %3147  ;;  %v3628_v43 = vsel %vm257_vm0, %v2316_v51, %v6715_v3  ;;  %v2552_v51 = vld [vmem:[#allocation2 + $0xc9] sm:$0xff] }
 0x455   : > { %v3022_v9 = vpop.permute.xlu0 %3021 }
 0x456   : > { %3045 = vrot.lane.b32.xlu1 %v2550_v61, %s4713_s28  ;;  %v3627_v61 = vsel %vm257_vm0, %v2315_v23, %v6717_v1  ;;  %v3660_v1 = vsel %vm1682_vm4, %v3628_v43, %v6896_v4 }
 0x457   : > { %3551 = vrot.lane.b32.xlu0 %v6685_v58, %s4717_s17  ;;  %v3659_v11 = vsel %vm1682_vm4, %v3627_v61, %v6899_v27  ;;  %v3692_v27 = vsel %vm1715_vm5, %v3660_v1, %v7026_v15 }
 0x458   : > { %v3276_v18 = vpop.permute.xlu1 %3275  ;;  %v3724_v3 = vsel %vm1748_vm6, %v3692_v27, %v3022_v9 }
 0x459   : > { %v3150_v33 = vpop.permute.xlu0 %3149 }
 0x45a   : > { %3553 = vrot.lane.b32.xlu1 %v6681_v5, %s4717_s17  ;;  %v3756_v61 = vsel %vm1781_vm7, %v3724_v3, %v3150_v33 }
 0x45b   : > { %3171 = vrot.lane.b32.xlu0 %v6685_v58, %s4714_s29  ;;  %v3691_v58 = vsel %vm1715_vm5, %v3659_v11, %v7028_v35 }
 0x45c   : > { %v3404_v37 = vpop.permute.xlu1 %3403 }
 0x45d   : > { %v3278_v12 = vpop.permute.xlu0 %3277 }
 0x45e   : > { %3299 = vrot.lane.b32.xlu1 %v6825_v7, %s4715_s30  ;;  %v3723_v7 = vsel %vm1748_vm6, %v3691_v58, %v3020_v59  ;;  %v3788_v43 = vsel %vm1814_vm8, %v3756_v61, %v3278_v12 }
 0x45f   : > { %3173 = vrot.lane.b32.xlu0 %v6681_v5, %s4714_s29  ;;  %v3755_v5 = vsel %vm1781_vm7, %v3723_v7, %v3148_v56 }
 0x460   : > { %v3406_v24 = vpop.permute.xlu1 %3405  ;;  %v3787_v11 = vsel %vm1814_vm8, %v3755_v5, %v3276_v18  ;;  %v2553_v5 = vld [vmem:[#allocation2 + $0xd9] sm:$0xff] }
 0x461   : > { %v3024_v45 = vpop.permute.xlu0 %3023  ;;  %v3819_v23 = vsel %vm1847_vm9, %v3787_v11, %v3404_v37  ;;  %v3820_v56 = vsel %vm1847_vm9, %v3788_v43, %v3406_v24  ;;  %v2554_v11 = vld [vmem:[#allocation2 + $0xe1] sm:$0xff] }
 0x462   : > { %3427 = vrot.lane.b32.xlu1 %v2551_v40, %s4716_s14 }
 0x463   : > { %3301 = vrot.lane.b32.xlu0 %v6821_v53, %s4715_s30 }
 0x464   : > { %v3026_v35 = vpop.permute.xlu1 %3025 }
 0x465   : > { %v3532_v59 = vpop.permute.xlu0 %3531 }
 0x466   : > { %3429 = vrot.lane.b32.xlu1 %v2552_v51, %s4716_s14  ;;  %v3851_v7 = vsel %vm1880_vm10, %v3819_v23, %v3532_v59 }
 0x467   : > { %3047 = vrot.lane.b32.xlu0 %v2551_v40, %s4713_s28  ;;  %4588 = vmatprep.mubr.msk.f32.mxu1 %vm1920_vm11, %v3851_v7  ;;  %v3629_v40 = vsel %vm257_vm0, %v6741_v36, %v6724_v46 }
 0x468   : > { %v3534_v4 = vpop.permute.xlu1 %3533  ;;  %v3661_v9 = vsel %vm1682_vm4, %v3629_v40, %v6908_v38 }
 0x469   : > { %v3852_v15 = vsel %vm1880_vm10, %v3820_v56, %v3534_v4  ;;  %v3152_v37 = vpop.permute.xlu0 %3151  ;;  %v3693_v1 = vsel %vm1715_vm5, %v3661_v9, %v7036_v32  ;;  %v3631_v56 = vsel %vm257_vm0, %v6753_v34, %v6731_v10 }
 0x46a   : > { %3049 = vrot.lane.b32.xlu1 %v2552_v51, %s4713_s28  ;;  %4589 = vmatmul.mubr.msk.f32.vlgmr.msra.gmra.mrb[0].mxu1 %vm1920_vm11, %v3852_v15  ;;  %v3725_v27 = vsel %vm1748_vm6, %v3693_v1, %v3024_v45  ;;  %v3663_v4 = vsel %vm1682_vm4, %v3631_v56, %v6916_v60  ;;  %v2558_v56 = vld [vmem:[#allocation2 + $0x111] sm:$0xff] }
 0x46b   : > { %3555 = vrot.lane.b32.xlu0 %v6693_v14, %s4717_s17  ;;  %v3757_v46 = vsel %vm1781_vm7, %v3725_v27, %v3152_v37  ;;  %v3695_v37 = vsel %vm1715_vm5, %v3663_v4, %v7044_v55 }
 0x46c   : > { %v3280_v33 = vpop.permute.xlu1 %3279 }
 0x46d   : > { %v3154_v18 = vpop.permute.xlu0 %3153  ;;  %v3789_v38 = vsel %vm1814_vm8, %v3757_v46, %v3280_v33  ;;  %v2555_v33 = vld [vmem:[#allocation2 + $0xf1] sm:$0xff]  ;;  %v8348_v46 = vld [vmem:[#allocation38_spill] sm:$0xff] }
 0x46e   : > { %3557 = vrot.lane.b32.xlu1 %v6689_v31, %s4717_s17 }
 0x46f   : > { %3175 = vrot.lane.b32.xlu0 %v6693_v14, %s4714_s29 }
 0x470   : > { %v3408_v12 = vpop.permute.xlu1 %3407 }
 0x471   : > { %v3282_v24 = vpop.permute.xlu0 %3281 }
 0x472   : > { %3303 = vrot.lane.b32.xlu1 %v6837_v0, %s4715_s30  ;;  %v3630_v0 = vsel %vm257_vm0, %v6737_v30, %v6721_v63  ;;  %v3821_v30 = vsel %vm1847_vm9, %v3789_v38, %v3408_v12 }
 0x473   : > { %3177 = vrot.lane.b32.xlu0 %v6689_v31, %s4714_s29  ;;  %v3662_v31 = vsel %vm1682_vm4, %v3630_v0, %v6906_v54  ;;  %v8347_v0 = vld [vmem:[#allocation35_spill] sm:$0xff] }
 0x474   : > { %v3410_v58 = vpop.permute.xlu1 %3409  ;;  %v3694_v36 = vsel %vm1715_vm5, %v3662_v31, %v7034_v44 }
 0x475   : > { %v3028_v14 = vpop.permute.xlu0 %3027  ;;  %v3726_v63 = vsel %vm1748_vm6, %v3694_v36, %v3026_v35  ;;  %v3633_v36 = vsel %vm257_vm0, %v6765_v13, %v8348_v46 }
 0x476   : > { %3431 = vrot.lane.b32.xlu1 %v2553_v5, %s4716_s14  ;;  %v3758_v3 = vsel %vm1781_vm7, %v3726_v63, %v3154_v18  ;;  %v3727_v18 = vsel %vm1748_vm6, %v3695_v37, %v3028_v14  ;;  %v3665_v38 = vsel %vm1682_vm4, %v3633_v36, %v6924_v29 }
 0x477   : > { %3305 = vrot.lane.b32.xlu0 %v6833_v50, %s4715_s30  ;;  %v3790_v50 = vsel %vm1814_vm8, %v3758_v3, %v3282_v24  ;;  %v2556_v24 = vld [vmem:[#allocation2 + $0xf9] sm:$0xff]  ;;  %v3697_v63 = vsel %vm1715_vm5, %v3665_v38, %v7052_v19  ;;  %v2591_v38 = vld [vmem:[#allocation2 + $0x122] sm:$0xff] }
 0x478   : > { %v3030_v32 = vpop.permute.xlu1 %3029  ;;  %v3822_v44 = vsel %vm1847_vm9, %v3790_v50, %v3410_v58 }
 0x479   : > { %v3536_v45 = vpop.permute.xlu0 %3535 }
 0x47a   : > { %v3853_v54 = vsel %vm1880_vm10, %v3821_v30, %v3536_v45  ;;  %3433 = vrot.lane.b32.xlu1 %v2554_v11, %s4716_s14  ;;  %v2557_v30 = vld [vmem:[#allocation2 + $0x109] sm:$0xff]  ;;  %v8349_v45 = vld [vmem:[#allocation36_spill] sm:$0xff] }
 0x47b   : > { %3051 = vrot.lane.b32.xlu0 %v2553_v5, %s4713_s28  ;;  %4591 = vmatprep.mubr.msk.f32.mxu1 %vm1920_vm11, %v3853_v54 }
 0x47c   : > { %v3538_v23 = vpop.permute.xlu1 %3537 }
 0x47d   : > { %v3854_v35 = vsel %vm1880_vm10, %v3822_v44, %v3538_v23  ;;  %v3156_v59 = vpop.permute.xlu0 %3155 }
 0x47e   : > { %3053 = vrot.lane.b32.xlu1 %v2554_v11, %s4713_s28  ;;  %4592 = vmatmul.mubr.msk.f32.gmra.mrb[2].mxu1 %vm1920_vm11, %v3854_v35  ;;  %v3759_v10 = vsel %vm1781_vm7, %v3727_v18, %v3156_v59  ;;  %v7254_v11 = vld [vmem:[#allocation2 + $0x110] sm:$0xff] }
 0x47f   : > { %3559 = vrot.lane.b32.xlu0 %v6701_v62, %s4717_s17 }
 0x480   : > { %v3284_v51 = vpop.permute.xlu1 %3283 }
 0x481   : > { %v3158_v61 = vpop.permute.xlu0 %3157  ;;  %v3791_v60 = vsel %vm1814_vm8, %v3759_v10, %v3284_v51 }
 0x482   : > { %3561 = vrot.lane.b32.xlu1 %v6697_v8, %s4717_s17 }
 0x483   : > { %3179 = vrot.lane.b32.xlu0 %v6701_v62, %s4714_s29 }
 0x484   : > { %v3412_v7 = vpop.permute.xlu1 %3411 }
 0x485   : > { %v3286_v43 = vpop.permute.xlu0 %3285 }
 0x486   : > { %3307 = vrot.lane.b32.xlu1 %v6849_v20, %s4715_s30  ;;  %v3632_v20 = vsel %vm257_vm0, %v6749_v21, %v6729_v41  ;;  %v3823_v21 = vsel %vm1847_vm9, %v3791_v60, %v3412_v7 }
 0x487   : > { %3181 = vrot.lane.b32.xlu0 %v6697_v8, %s4714_s29  ;;  %v3664_v8 = vsel %vm1682_vm4, %v3632_v20, %v6914_v26  ;;  %v8350_v20 = vld [vmem:[#allocation40_spill] sm:$0xff] }
 0x488   : > { %v3414_v15 = vpop.permute.xlu1 %3413  ;;  %v3696_v34 = vsel %vm1715_vm5, %v3664_v8, %v7042_v25  ;;  %v3635_v18 = vsel %vm257_vm0, %v6777_v39, %v8350_v20  ;;  %v8352_v39 = vld [vmem:[#allocation92_spill] sm:$0xff] }
 0x489   : > { %v3032_v62 = vpop.permute.xlu0 %3031  ;;  %v3728_v41 = vsel %vm1748_vm6, %v3696_v34, %v3030_v32  ;;  %v3667_v8 = vsel %vm1682_vm4, %v3635_v18, %v6932_v28  ;;  %v7289_v34 = vld [vmem:[#allocation2 + $0x120] sm:$0xff] }
 0x48a   : > { %3435 = vrot.lane.b32.xlu1 %v2555_v33, %s4716_s14  ;;  %v3760_v40 = vsel %vm1781_vm7, %v3728_v41, %v3158_v61  ;;  %v3729_v13 = vsel %vm1748_vm6, %v3697_v63, %v3032_v62  ;;  %v3699_v60 = vsel %vm1715_vm5, %v3667_v8, %v7060_v2  ;;  %v8351_v41 = vld [vmem:[#allocation44_spill] sm:$0xff] }
 0x48b   : > { %3309 = vrot.lane.b32.xlu0 %v6845_v16, %s4715_s30  ;;  %v3792_v16 = vsel %vm1814_vm8, %v3760_v40, %v3286_v43  ;;  %v2589_v43 = vld [vmem:[#allocation2 + $0x10a] sm:$0xff]  ;;  %v2561_v8 = vld [vmem:[#allocation2 + $0x139] sm:$0xff] }
 0x48c   : > { %v3034_v55 = vpop.permute.xlu1 %3033  ;;  %v3824_v25 = vsel %vm1847_vm9, %v3792_v16, %v3414_v15 }
 0x48d   : > { %v3540_v12 = vpop.permute.xlu0 %3539 }
 0x48e   : > { %v3855_v26 = vsel %vm1880_vm10, %v3823_v21, %v3540_v12  ;;  %3437 = vrot.lane.b32.xlu1 %v2556_v24, %s4716_s14  ;;  %v3636_v21 = vsel %vm257_vm0, %v6773_v52, %v8351_v41 }
 0x48f   : > { %3055 = vrot.lane.b32.xlu0 %v2555_v33, %s4713_s28  ;;  %4594 = vmatprep.mubr.msk.f32.mxu1 %vm1920_vm11, %v3855_v26  ;;  %v2496_v33 = vld [vmem:[#allocation2 + $0x112] sm:$0xff] }
 0x490   : > { %v3542_v9 = vpop.permute.xlu1 %3541 }
 0x491   : > { %v3856_v58 = vsel %vm1880_vm10, %v3824_v25, %v3542_v9  ;;  %v3160_v1 = vpop.permute.xlu0 %3159  ;;  %v2559_v9 = vld [vmem:[#allocation2 + $0x121] sm:$0xff] }
 0x492   : > { %3057 = vrot.lane.b32.xlu1 %v2556_v24, %s4713_s28  ;;  %4595 = vmatmul.mubr.msk.f32.gmra.mrb[4].mxu1 %vm1920_vm11, %v3856_v58  ;;  %v3761_v29 = vsel %vm1781_vm7, %v3729_v13, %v3160_v1  ;;  %v3668_v24 = vsel %vm1682_vm4, %v3636_v21, %v8352_v39  ;;  %v7309_v58 = vld [vmem:[#allocation2 + $0x128] sm:$0xff] }
 0x493   : > { %3563 = vrot.lane.b32.xlu0 %v6709_v47, %s4717_s17  ;;  %v3700_v2 = vsel %vm1715_vm5, %v3668_v24, %v7058_v57  ;;  %v2562_v39 = vld [vmem:[#allocation2 + $0x141] sm:$0xff]  ;;  %v8359_v24 = vld [vmem:[#allocation100_spill] sm:$0xff] }
 0x494   : > { %v3288_v14 = vpop.permute.xlu1 %3287 }
 0x495   : > { %v3162_v5 = vpop.permute.xlu0 %3161  ;;  %v3793_v54 = vsel %vm1814_vm8, %v3761_v29, %v3288_v14 }
 0x496   : > { %3565 = vrot.lane.b32.xlu1 %v8347_v0, %s4717_s17 }
 0x497   : > { %3183 = vrot.lane.b32.xlu0 %v6709_v47, %s4714_s29 }
 0x498   : > { %v3416_v27 = vpop.permute.xlu1 %3415 }
 0x499   : > { %v3290_v31 = vpop.permute.xlu0 %3289  ;;  %v3825_v44 = vsel %vm1847_vm9, %v3793_v54, %v3416_v27  ;;  %v2498_v54 = vld [vmem:[#allocation2 + $0x12a] sm:$0xff] }
 0x49a   : > { %3311 = vrot.lane.b32.xlu1 %v6859_v22, %s4715_s30  ;;  %v3634_v22 = vsel %vm257_vm0, %v6761_v42, %v8349_v45 }
 0x49b   : > { %3185 = vrot.lane.b32.xlu0 %v8347_v0, %s4714_s29  ;;  %v3666_v3 = vsel %vm1682_vm4, %v3634_v22, %v6922_v48  ;;  %v8354_v22 = vld [vmem:[#allocation167_spill] sm:$0xff] }
 0x49c   : > { %v3418_v32 = vpop.permute.xlu1 %3417  ;;  %v3698_v19 = vsel %vm1715_vm5, %v3666_v3, %v7050_v17 }
 0x49d   : > { %v3036_v47 = vpop.permute.xlu0 %3035  ;;  %v3730_v50 = vsel %vm1748_vm6, %v3698_v19, %v3034_v55 }
 0x49e   : > { %3439 = vrot.lane.b32.xlu1 %v2557_v30, %s4716_s14  ;;  %v3762_v35 = vsel %vm1781_vm7, %v3730_v50, %v3162_v5  ;;  %v3731_v12 = vsel %vm1748_vm6, %v3699_v60, %v3036_v47  ;;  %v8356_v50 = vld [vmem:[#allocation102_spill] sm:$0xff] }
 0x49f   : > { %3313 = vrot.lane.b32.xlu0 %v7254_v11, %s4715_s30  ;;  %v3794_v59 = vsel %vm1814_vm8, %v3762_v35, %v3290_v31 }
 0x4a0   : > { %v3038_v42 = vpop.permute.xlu1 %3037  ;;  %v3826_v17 = vsel %vm1847_vm9, %v3794_v59, %v3418_v32  ;;  %v2560_v32 = vld [vmem:[#allocation2 + $0x129] sm:$0xff]  ;;  %v8358_v59 = vld [vmem:[#allocation132_spill] sm:$0xff] }
 0x4a1   : > { %v3544_v23 = vpop.permute.xlu0 %3543  ;;  %v3732_v52 = vsel %vm1748_vm6, %v3700_v2, %v3038_v42  ;;  %v8355_v42 = vld [vmem:[#allocation95_spill] sm:$0xff] }
 0x4a2   : > { %v3857_v48 = vsel %vm1880_vm10, %v3825_v44, %v3544_v23  ;;  %3059 = vrot.lane.b32.xlu1 %v2557_v30, %s4713_s28  ;;  %v8353_v30 = vld [vmem:[#allocation42_spill] sm:$0xff]  ;;  %v3638_v44 = vsel %vm257_vm0, %v8356_v50, %v8355_v42  ;;  %v2437_v50 = vld [vmem:[#allocation2 + $0x150] sm:$0xff] }
 0x4a3   : > { %2933 = vrot.lane.b32.xlu0 %v7254_v11, %s4712_s27  ;;  %4597 = vmatprep.mubr.msk.f32.mxu1 %vm1920_vm11, %v3857_v48  ;;  %v3637_v45 = vsel %vm257_vm0, %v6789_v6, %v8353_v30  ;;  %v8357_v6 = vld [vmem:[#allocation39_spill] sm:$0xff] }
 0x4a4   : > { %v3546_v51 = vpop.permute.xlu1 %3545  ;;  %v3669_v13 = vsel %vm1682_vm4, %v3637_v45, %v8354_v22  ;;  %v3670_v35 = vsel %vm1682_vm4, %v3638_v44, %v8357_v6  ;;  %v2500_v45 = vld [vmem:[#allocation2 + $0x142] sm:$0xff]  ;;  %v2563_v6 = vld [vmem:[#allocation2 + $0x151] sm:$0xff] }
 0x4a5   : > { %v3858_v61 = vsel %vm1880_vm10, %v3826_v17, %v3546_v51  ;;  %v3164_v7 = vpop.permute.xlu0 %3163  ;;  %v3701_v29 = vsel %vm1715_vm5, %v3669_v13, %v7068_v49  ;;  %v3702_v49 = vsel %vm1715_vm5, %v3670_v35, %v8358_v59  ;;  %v2532_v35 = vld [vmem:[#allocation2 + $0x158] sm:$0xff] }
 0x4a6   : > { %3567 = vrot.lane.b32.xlu1 %v2589_v43, %s4717_s17  ;;  %4598 = vmatmul.mubr.msk.f32.gmra.mrb[6].mxu1 %vm1920_vm11, %v3858_v61  ;;  %v3763_v28 = vsel %vm1781_vm7, %v3731_v12, %v3164_v7  ;;  %v7347_v61 = vld [vmem:[#allocation2 + $0x138] sm:$0xff] }
 0x4a7   : > { %3441 = vrot.lane.b32.xlu0 %v2558_v56, %s4716_s14  ;;  %v2593_v12 = vld [vmem:[#allocation2 + $0x13a] sm:$0xff] }
 0x4a8   : > { %v3292_v4 = vpop.permute.xlu1 %3291 }
 0x4a9   : > { %v3166_v15 = vpop.permute.xlu0 %3165  ;;  %v3795_v40 = vsel %vm1814_vm8, %v3763_v28, %v3292_v4  ;;  %v8360_v28 = vld [vmem:[#allocation104_spill] sm:$0xff] }
 0x4aa   : > { %3187 = vrot.lane.b32.xlu1 %v2589_v43, %s4714_s29  ;;  %v3764_v1 = vsel %vm1781_vm7, %v3732_v52, %v3166_v15  ;;  %v3639_v2 = vsel %vm257_vm0, %v8360_v28, %v8359_v24 }
 0x4ab   : > { %3061 = vrot.lane.b32.xlu0 %v2558_v56, %s4713_s28 }
 0x4ac   : > { %v3420_v37 = vpop.permute.xlu1 %3419 }
 0x4ad   : > { %v3294_v62 = vpop.permute.xlu0 %3293  ;;  %v3827_v16 = vsel %vm1847_vm9, %v3795_v40, %v3420_v37  ;;  %v8361_v40 = vld [vmem:[#allocation166_spill] sm:$0xff] }
 0x4ae   : > { %3189 = vrot.lane.b32.xlu1 %v2496_v33, %s4714_s29  ;;  %v3796_v5 = vsel %vm1814_vm8, %v3764_v1, %v3294_v62  ;;  %v8363_v1 = vld [vmem:[#allocation50_spill] sm:$0xff] }
 0x4af   : > { %3569 = vrot.lane.b32.xlu0 %v2496_v33, %s4717_s17 }
 0x4b0   : > { %v3422_v10 = vpop.permute.xlu1 %3421 }
 0x4b1   : > { %v3040_v55 = vpop.permute.xlu0 %3039  ;;  %v3828_v57 = vsel %vm1847_vm9, %v3796_v5, %v3422_v10  ;;  %v2530_v10 = vld [vmem:[#allocation2 + $0x140] sm:$0xff] }
 0x4b2   : > { %2935 = vrot.lane.b32.xlu1 %v7289_v34, %s4712_s27  ;;  %v3733_v23 = vsel %vm1748_vm6, %v3701_v29, %v3040_v55 }
 0x4b3   : > { %3315 = vrot.lane.b32.xlu0 %v7289_v34, %s4715_s30 }
 0x4b4   : > { %v3042_v26 = vpop.permute.xlu1 %3041 }
 0x4b5   : > { %v3548_v25 = vpop.permute.xlu0 %3547  ;;  %v3734_v7 = vsel %vm1748_vm6, %v3702_v49, %v3042_v26  ;;  %v3671_v26 = vsel %vm1682_vm4, %v3639_v2, %v8361_v40  ;;  %v8367_v49 = vld [vmem:[#allocation103_spill] sm:$0xff] }
 0x4b6   : > { %v3859_v14 = vsel %vm1880_vm10, %v3827_v16, %v3548_v25  ;;  %3443 = vrot.lane.b32.xlu1 %v2559_v9, %s4716_s14  ;;  %v8362_v16 = vld [vmem:[#allocation52_spill] sm:$0xff] }
 0x4b7   : > { %3317 = vrot.lane.b32.xlu0 %v7309_v58, %s4715_s30  ;;  %4600 = vmatprep.mubr.msk.f32.mxu1 %vm1920_vm11, %v3859_v14  ;;  %v3703_v25 = vsel %vm1715_vm5, %v3671_v26, %v8362_v16  ;;  %v8364_v14 = vld [vmem:[#allocation105_spill] sm:$0xff] }
 0x4b8   : > { %v3550_v0 = vpop.permute.xlu1 %3549  ;;  %v3640_v5 = vsel %vm257_vm0, %v8364_v14, %v8363_v1 }
 0x4b9   : > { %v3860_v27 = vsel %vm1880_vm10, %v3828_v57, %v3550_v0  ;;  %v3168_v31 = vpop.permute.xlu0 %3167  ;;  %v8365_v0 = vld [vmem:[#allocation90_spill] sm:$0xff] }
 0x4ba   : > { %3063 = vrot.lane.b32.xlu1 %v2559_v9, %s4713_s28  ;;  %4601 = vmatmul.mubr.msk.f32.gmra.mrb[8].mxu1 %vm1920_vm11, %v3860_v27  ;;  %v3765_v48 = vsel %vm1781_vm7, %v3733_v23, %v3168_v31  ;;  %v3672_v27 = vsel %vm1682_vm4, %v3640_v5, %v8365_v0  ;;  %v2502_v5 = vld [vmem:[#allocation2 + $0x15a] sm:$0xff] }
 0x4bb   : > { %2937 = vrot.lane.b32.xlu0 %v7309_v58, %s4712_s27 }
 0x4bc   : > { %v3296_v46 = vpop.permute.xlu1 %3295 }
 0x4bd   : > { %v3170_v36 = vpop.permute.xlu0 %3169  ;;  %v3797_v17 = vsel %vm1814_vm8, %v3765_v48, %v3296_v46  ;;  %v8366_v46 = vld [vmem:[#allocation101_spill] sm:$0xff] }
 0x4be   : > { %3571 = vrot.lane.b32.xlu1 %v2591_v38, %s4717_s17  ;;  %v3766_v4 = vsel %vm1781_vm7, %v3734_v7, %v3170_v36  ;;  %v3704_v36 = vsel %vm1715_vm5, %v3672_v27, %v8366_v46  ;;  %v8369_v7 = vld [vmem:[#allocation110_spill] sm:$0xff] }
 0x4bf   : > { %3445 = vrot.lane.b32.xlu0 %v2560_v32, %s4716_s14  ;;  %v2439_v27 = vld [vmem:[#allocation2 + $0x168] sm:$0xff] }
 0x4c0   : > { %v3424_v63 = vpop.permute.xlu1 %3423 }
 0x4c1   : > { %v3298_v47 = vpop.permute.xlu0 %3297  ;;  %v3829_v43 = vsel %vm1847_vm9, %v3797_v17, %v3424_v63  ;;  %v8368_v17 = vld [vmem:[#allocation53_spill] sm:$0xff] }
 0x4c2   : > { %3191 = vrot.lane.b32.xlu1 %v2591_v38, %s4714_s29  ;;  %v3798_v37 = vsel %vm1814_vm8, %v3766_v4, %v3298_v47  ;;  %v8370_v4 = vld [vmem:[#allocation98_spill] sm:$0xff] }
 0x4c3   : > { %3065 = vrot.lane.b32.xlu0 %v2560_v32, %s4713_s28 }
 0x4c4   : > { %v3426_v3 = vpop.permute.xlu1 %3425 }
 0x4c5   : > { %v3044_v19 = vpop.permute.xlu0 %3043  ;;  %v3830_v62 = vsel %vm1847_vm9, %v3798_v37, %v3426_v3 }
 0x4c6   : > { %3193 = vrot.lane.b32.xlu1 %v2498_v54, %s4714_s29  ;;  %v3735_v57 = vsel %vm1748_vm6, %v3703_v25, %v3044_v19 }
 0x4c7   : > { %3573 = vrot.lane.b32.xlu0 %v2498_v54, %s4717_s17 }
 0x4c8   : > { %v3046_v51 = vpop.permute.xlu1 %3045 }
 0x4c9   : > { %v3552_v56 = vpop.permute.xlu0 %3551  ;;  %v3736_v63 = vsel %vm1748_vm6, %v3704_v36, %v3046_v51  ;;  %v3641_v51 = vsel %vm257_vm0, %v8368_v17, %v8367_v49  ;;  %v2565_v36 = vld [vmem:[#allocation2 + $0x169] sm:$0xff] }
 0x4ca   : > { %v3861_v15 = vsel %vm1880_vm10, %v3829_v43, %v3552_v56  ;;  %2939 = vrot.lane.b32.xlu1 %v7347_v61, %s4712_s27  ;;  %v3673_v43 = vsel %vm1682_vm4, %v3641_v51, %v8369_v7  ;;  %v2597_v51 = vld [vmem:[#allocation2 + $0x16a] sm:$0xff] }
 0x4cb   : > { %3319 = vrot.lane.b32.xlu0 %v7347_v61, %s4715_s30  ;;  %4603 = vmatprep.mubr.msk.f32.mxu1 %vm1920_vm11, %v3861_v15  ;;  %v3705_v15 = vsel %vm1715_vm5, %v3673_v43, %v8370_v4 }
 0x4cc   : > { %v3554_v33 = vpop.permute.xlu1 %3553 }
 0x4cd   : > { %v3862_v20 = vsel %vm1880_vm10, %v3830_v62, %v3554_v33  ;;  %v3172_v18 = vpop.permute.xlu0 %3171  ;;  %v2595_v62 = vld [vmem:[#allocation2 + $0x152] sm:$0xff] }
 0x4ce   : > { %3447 = vrot.lane.b32.xlu1 %v2561_v8, %s4716_s14  ;;  %4604 = vmatmul.mubr.msk.f32.gmra.mrb[10].mxu1 %vm1920_vm11, %v3862_v20  ;;  %v3767_v31 = vsel %vm1781_vm7, %v3735_v57, %v3172_v18  ;;  %v8371_v33 = vld [vmem:[#allocation99_spill] sm:$0xff] }
 0x4cf   : > { %3321 = vrot.lane.b32.xlu0 %v2530_v10, %s4715_s30  ;;  %v8372_v20 = vld [vmem:[#allocation47_spill] sm:$0xff] }
 0x4d0   : > { %v3300_v60 = vpop.permute.xlu1 %3299  ;;  %v3642_v18 = vsel %vm257_vm0, %v8372_v20, %v8371_v33 }
 0x4d1   : > { %v3174_v55 = vpop.permute.xlu0 %3173  ;;  %v3799_v38 = vsel %vm1814_vm8, %v3767_v31, %v3300_v60  ;;  %v8373_v60 = vld [vmem:[#allocation61_spill] sm:$0xff] }
 0x4d2   : > { %3067 = vrot.lane.b32.xlu1 %v2561_v8, %s4713_s28  ;;  %v3768_v22 = vsel %vm1781_vm7, %v3736_v63, %v3174_v55  ;;  %v3674_v55 = vsel %vm1682_vm4, %v3642_v18, %v8373_v60  ;;  %v8376_v63 = vld [vmem:[#allocation37_spill] sm:$0xff] }
 0x4d3   : > { %2941 = vrot.lane.b32.xlu0 %v2530_v10, %s4712_s27  ;;  %v2564_v10 = vld [vmem:[#allocation2 + $0x159] sm:$0xff] }
 0x4d4   : > { %v3428_v41 = vpop.permute.xlu1 %3427 }
 0x4d5   : > { %v3302_v21 = vpop.permute.xlu0 %3301  ;;  %v3831_v47 = vsel %vm1847_vm9, %v3799_v38, %v3428_v41  ;;  %v2534_v38 = vld [vmem:[#allocation2 + $0x170] sm:$0xff] }
 0x4d6   : > { %3575 = vrot.lane.b32.xlu1 %v2593_v12, %s4717_s17  ;;  %v3800_v3 = vsel %vm1814_vm8, %v3768_v22, %v3302_v21  ;;  %v8374_v21 = vld [vmem:[#allocation171_spill] sm:$0xff] }
 0x4d7   : > { %3449 = vrot.lane.b32.xlu0 %v2562_v39, %s4716_s14 }
 0x4d8   : > { %v3430_v52 = vpop.permute.xlu1 %3429 }
 0x4d9   : > { %v3048_v9 = vpop.permute.xlu0 %3047  ;;  %v3832_v29 = vsel %vm1847_vm9, %v3800_v3, %v3430_v52 }
 0x4da   : > { %3195 = vrot.lane.b32.xlu1 %v2593_v12, %s4714_s29  ;;  %v3737_v8 = vsel %vm1748_vm6, %v3705_v15, %v3048_v9  ;;  %v3706_v12 = vsel %vm1715_vm5, %v3674_v55, %v8374_v21  ;;  %v2441_v55 = vld [vmem:[#allocation2 + $0x180] sm:$0xff]  ;;  %v8382_v21 = vld [vmem:[#allocation106_spill] sm:$0xff] }
 0x4db   : > { %3069 = vrot.lane.b32.xlu0 %v2562_v39, %s4713_s28 }
 0x4dc   : > { %v3050_v32 = vpop.permute.xlu1 %3049 }
 0x4dd   : > { %v3556_v30 = vpop.permute.xlu0 %3555  ;;  %v3738_v28 = vsel %vm1748_vm6, %v3706_v12, %v3050_v32  ;;  %v8375_v32 = vld [vmem:[#allocation43_spill] sm:$0xff] }
 0x4de   : > { %v3863_v13 = vsel %vm1880_vm10, %v3831_v47, %v3556_v30  ;;  %3197 = vrot.lane.b32.xlu1 %v2500_v45, %s4714_s29  ;;  %v3643_v47 = vsel %vm257_vm0, %v8376_v63, %v8375_v32  ;;  %v8377_v30 = vld [vmem:[#allocation131_spill] sm:$0xff]  ;;  %v8387_v63 = vld [vmem:[#allocation114_spill] sm:$0xff] }
 0x4df   : > { %3577 = vrot.lane.b32.xlu0 %v2500_v45, %s4717_s17  ;;  %4606 = vmatprep.mubr.msk.f32.mxu1 %vm1920_vm11, %v3863_v13  ;;  %v3675_v45 = vsel %vm1682_vm4, %v3643_v47, %v8377_v30  ;;  %v8378_v13 = vld [vmem:[#allocation69_spill] sm:$0xff] }
 0x4e0   : > { %v3558_v19 = vpop.permute.xlu1 %3557  ;;  %v3707_v3 = vsel %vm1715_vm5, %v3675_v45, %v8378_v13  ;;  %v2599_v45 = vld [vmem:[#allocation2 + $0x182] sm:$0xff] }
 0x4e1   : > { %v3864_v54 = vsel %vm1880_vm10, %v3832_v29, %v3558_v19  ;;  %v3176_v42 = vpop.permute.xlu0 %3175  ;;  %v8379_v19 = vld [vmem:[#allocation46_spill] sm:$0xff] }
 0x4e2   : > { %2943 = vrot.lane.b32.xlu1 %v2437_v50, %s4712_s27  ;;  %4607 = vmatmul.mubr.msk.f32.gmra.mrb[12].mxu1 %vm1920_vm11, %v3864_v54  ;;  %v3769_v41 = vsel %vm1781_vm7, %v3737_v8, %v3176_v42  ;;  %v3644_v54 = vsel %vm257_vm0, %v6821_v53, %v8379_v19  ;;  %v2504_v8 = vld [vmem:[#allocation2 + $0x172] sm:$0xff]  ;;  %v2568_v13 = vld [vmem:[#allocation2 + $0x189] sm:$0xff] }
 0x4e3   : > { %3323 = vrot.lane.b32.xlu0 %v2437_v50, %s4715_s30  ;;  %v8380_v50 = vld [vmem:[#allocation59_spill] sm:$0xff] }
 0x4e4   : > { %v3304_v44 = vpop.permute.xlu1 %3303 }
 0x4e5   : > { %v3178_v23 = vpop.permute.xlu0 %3177  ;;  %v3801_v39 = vsel %vm1814_vm8, %v3769_v41, %v3304_v44  ;;  %v3676_v44 = vsel %vm1682_vm4, %v3644_v54, %v8380_v50  ;;  %v4696_v41 = vld [vmem:[#allocation2 + $0xd8] sm:$0xff] }
 0x4e6   : > { %3451 = vrot.lane.b32.xlu1 %v2563_v6, %s4716_s14  ;;  %v3770_v26 = vsel %vm1781_vm7, %v3738_v28, %v3178_v23  ;;  %v3645_v12 = vsel %vm257_vm0, %v4696_v41, %v8382_v21  ;;  %v8384_v28 = vld [vmem:[#allocation67_spill] sm:$0xff]  ;;  %v2601_v41 = vld [vmem:[#allocation2 + $0x19a] sm:$0xff] }
 0x4e7   : > { %3325 = vrot.lane.b32.xlu0 %v2532_v35, %s4715_s30 }
 0x4e8   : > { %v3432_v48 = vpop.permute.xlu1 %3431 }
 0x4e9   : > { %v3306_v59 = vpop.permute.xlu0 %3305  ;;  %v3833_v2 = vsel %vm1847_vm9, %v3801_v39, %v3432_v48  ;;  %v8383_v39 = vld [vmem:[#allocation48_spill] sm:$0xff] }
 0x4ea   : > { %3071 = vrot.lane.b32.xlu1 %v2563_v6, %s4713_s28  ;;  %v3802_v16 = vsel %vm1814_vm8, %v3770_v26, %v3306_v59  ;;  %v8381_v6 = vld [vmem:[#allocation170_spill] sm:$0xff] }
 0x4eb   : > { %2945 = vrot.lane.b32.xlu0 %v2532_v35, %s4712_s27  ;;  %v3708_v35 = vsel %vm1715_vm5, %v3676_v44, %v8381_v6  ;;  %v2506_v6 = vld [vmem:[#allocation2 + $0x18a] sm:$0xff] }
 0x4ec   : > { %v3434_v56 = vpop.permute.xlu1 %3433 }
 0x4ed   : > { %v3052_v37 = vpop.permute.xlu0 %3051  ;;  %v3834_v25 = vsel %vm1847_vm9, %v3802_v16, %v3434_v56  ;;  %v2566_v56 = vld [vmem:[#allocation2 + $0x171] sm:$0xff]  ;;  %v2567_v16 = vld [vmem:[#allocation2 + $0x181] sm:$0xff] }
 0x4ee   : > { %3579 = vrot.lane.b32.xlu1 %v2595_v62, %s4717_s17  ;;  %v3739_v42 = vsel %vm1748_vm6, %v3707_v3, %v3052_v37 }
 0x4ef   : > { %3453 = vrot.lane.b32.xlu0 %v2564_v10, %s4716_s14 }
 0x4f0   : > { %v3054_v24 = vpop.permute.xlu1 %3053 }
 0x4f1   : > { %v3560_v40 = vpop.permute.xlu0 %3559  ;;  %v3740_v49 = vsel %vm1748_vm6, %v3708_v35, %v3054_v24  ;;  %v3677_v24 = vsel %vm1682_vm4, %v3645_v12, %v8383_v39  ;;  %v2538_v35 = vld [vmem:[#allocation2 + $0x1a0] sm:$0xff]  ;;  %v4699_v39 = vld [vmem:[#allocation2 + $0xf8] sm:$0xff] }
 0x4f2   : > { %v3865_v52 = vsel %vm1880_vm10, %v3833_v2, %v3560_v40  ;;  %3199 = vrot.lane.b32.xlu1 %v2595_v62, %s4714_s29  ;;  %v3709_v2 = vsel %vm1715_vm5, %v3677_v24, %v8384_v28  ;;  %v8391_v24 = vld [vmem:[#allocation51_spill] sm:$0xff] }
 0x4f3   : > { %3073 = vrot.lane.b32.xlu0 %v2564_v10, %s4713_s28  ;;  %4609 = vmatprep.mubr.msk.f32.mxu1 %vm1920_vm11, %v3865_v52  ;;  %v3648_v28 = vsel %vm257_vm0, %v4699_v39, %v8391_v24 }
 0x4f4   : > { %v3562_v9 = vpop.permute.xlu1 %3561 }
 0x4f5   : > { %v3866_v1 = vsel %vm1880_vm10, %v3834_v25, %v3562_v9  ;;  %v3180_v14 = vpop.permute.xlu0 %3179  ;;  %v2536_v9 = vld [vmem:[#allocation2 + $0x188] sm:$0xff] }
 0x4f6   : > { %3201 = vrot.lane.b32.xlu1 %v2502_v5, %s4714_s29  ;;  %4610 = vmatmul.mubr.msk.f32.gmra.mrb[14].mxu1 %vm1920_vm11, %v3866_v1  ;;  %v3771_v23 = vsel %vm1781_vm7, %v3739_v42, %v3180_v14 }
 0x4f7   : > { %3581 = vrot.lane.b32.xlu0 %v2502_v5, %s4717_s17 }
 0x4f8   : > { %v3308_v57 = vpop.permute.xlu1 %3307 }
 0x4f9   : > { %v3182_v0 = vpop.permute.xlu0 %3181  ;;  %v3803_v48 = vsel %vm1814_vm8, %v3771_v23, %v3308_v57 }
 0x4fa   : > { %2947 = vrot.lane.b32.xlu1 %v2439_v27, %s4712_s27  ;;  %v3772_v7 = vsel %vm1781_vm7, %v3740_v49, %v3182_v0 }
 0x4fb   : > { %3327 = vrot.lane.b32.xlu0 %v2439_v27, %s4715_s30  ;;  %v4697_v27 = vld [vmem:[#allocation2 + $0xe0] sm:$0xff] }
 0x4fc   : > { %v3436_v31 = vpop.permute.xlu1 %3435 }
 0x4fd   : > { %v3310_v46 = vpop.permute.xlu0 %3309  ;;  %v3835_v53 = vsel %vm1847_vm9, %v3803_v48, %v3436_v31  ;;  %v8385_v31 = vld [vmem:[#allocation49_spill] sm:$0xff] }
 0x4fe   : > { %3455 = vrot.lane.b32.xlu1 %v2565_v36, %s4716_s14  ;;  %v3804_v4 = vsel %vm1814_vm8, %v3772_v7, %v3310_v46  ;;  %v3646_v46 = vsel %vm257_vm0, %v4697_v27, %v8385_v31  ;;  %v8389_v7 = vld [vmem:[#allocation96_spill] sm:$0xff] }
 0x4ff   : > { %3329 = vrot.lane.b32.xlu0 %v2534_v38, %s4715_s30 }
 0x500   : > { %v3438_v22 = vpop.permute.xlu1 %3437 }
 0x501   : > { %v3056_v29 = vpop.permute.xlu0 %3055  ;;  %v3836_v15 = vsel %vm1847_vm9, %v3804_v4, %v3438_v22  ;;  %v8390_v4 = vld [vmem:[#allocation135_spill] sm:$0xff] }
 0x502   : > { %3075 = vrot.lane.b32.xlu1 %v2565_v36, %s4713_s28  ;;  %v3741_v26 = vsel %vm1748_vm6, %v3709_v2, %v3056_v29  ;;  %v8386_v36 = vld [vmem:[#allocation109_spill] sm:$0xff]  ;;  %v8392_v2 = vld [vmem:[#allocation130_spill] sm:$0xff] }
 0x503   : > { %2949 = vrot.lane.b32.xlu0 %v2534_v38, %s4712_s27  ;;  %v3678_v38 = vsel %vm1682_vm4, %v3646_v46, %v8386_v36 }
 0x504   : > { %v3058_v59 = vpop.permute.xlu1 %3057  ;;  %v3710_v47 = vsel %vm1715_vm5, %v3678_v38, %v8387_v63 }
 0x505   : > { %v3564_v17 = vpop.permute.xlu0 %3563  ;;  %v3742_v22 = vsel %vm1748_vm6, %v3710_v47, %v3058_v59  ;;  %v2537_v59 = vld [vmem:[#allocation2 + $0x198] sm:$0xff]  ;;  %v8393_v47 = vld [vmem:[#allocation5_spill] sm:$0xff] }
 0x506   : > { %v3867_v43 = vsel %vm1880_vm10, %v3835_v53, %v3564_v17  ;;  %3583 = vrot.lane.b32.xlu1 %v2597_v51, %s4717_s17  ;;  %v4698_v53 = vld [vmem:[#allocation2 + $0xf0] sm:$0xff]  ;;  %v8388_v17 = vld [vmem:[#allocation88_spill] sm:$0xff] }
 0x507   : > { %3457 = vrot.lane.b32.xlu0 %v2566_v56, %s4716_s14  ;;  %4612 = vmatprep.mubr.msk.f32.mxu1 %vm1920_vm11, %v3867_v43 }
 0x508   : > { %v3566_v37 = vpop.permute.xlu1 %3565 }
 0x509   : > { %v3868_v62 = vsel %vm1880_vm10, %v3836_v15, %v3566_v37  ;;  %v3184_v33 = vpop.permute.xlu0 %3183 }
 0x50a   : > { %3203 = vrot.lane.b32.xlu1 %v2597_v51, %s4714_s29  ;;  %4613 = vmatmul.mubr.msk.f32.gmra.mrb[16].mxu1 %vm1920_vm11, %v3868_v62  ;;  %v3773_v25 = vsel %vm1781_vm7, %v3741_v26, %v3184_v33  ;;  %v3647_v51 = vsel %vm257_vm0, %v4698_v53, %v8388_v17  ;;  %v2569_v62 = vld [vmem:[#allocation2 + $0x199] sm:$0xff] }
 0x50b   : > { %3077 = vrot.lane.b32.xlu0 %v2566_v56, %s4713_s28  ;;  %v3679_v43 = vsel %vm1682_vm4, %v3647_v51, %v8389_v7  ;;  %v2570_v56 = vld [vmem:[#allocation2 + $0x1a1] sm:$0xff] }
 0x50c   : > { %v3312_v20 = vpop.permute.xlu1 %3311  ;;  %v3711_v15 = vsel %vm1715_vm5, %v3679_v43, %v8390_v4 }
 0x50d   : > { %v3186_v18 = vpop.permute.xlu0 %3185  ;;  %v3805_v1 = vsel %vm1814_vm8, %v3773_v25, %v3312_v20 }
 0x50e   : > { %3205 = vrot.lane.b32.xlu1 %v2504_v8, %s4714_s29  ;;  %v3774_v3 = vsel %vm1781_vm7, %v3742_v22, %v3186_v18  ;;  %v8394_v22 = vld [vmem:[#allocation3_spill] sm:$0xff] }
 0x50f   : > { %3585 = vrot.lane.b32.xlu0 %v2504_v8, %s4717_s17 }
 0x510   : > { %v3440_v10 = vpop.permute.xlu1 %3439 }
 0x511   : > { %v3314_v60 = vpop.permute.xlu0 %3313  ;;  %v3837_v14 = vsel %vm1847_vm9, %v3805_v1, %v3440_v10  ;;  %v2602_v10 = vld [vmem:[#allocation2 + $0x1a2] sm:$0xff] }
 0x512   : > { %2951 = vrot.lane.b32.xlu1 %v2441_v55, %s4712_s27  ;;  %v3806_v29 = vsel %vm1814_vm8, %v3774_v3, %v3314_v60 }
 0x513   : > { %3331 = vrot.lane.b32.xlu0 %v2441_v55, %s4715_s30 }
 0x514   : > { %v3060_v40 = vpop.permute.xlu1 %3059 }
 0x515   : > { %v7483_v52 = vpop.permute.xlu0 %2933  ;;  %v3743_v33 = vsel %vm1748_vm6, %v3711_v15, %v3060_v40  ;;  %v3680_v40 = vsel %vm1682_vm4, %v3648_v28, %v8392_v2  ;;  %v8398_v15 = vld [vmem:[#allocation45_spill] sm:$0xff]  ;;  %v8399_v28 = vld [vmem:[#allocation7_spill] sm:$0xff] }
 0x516   : > { %3459 = vrot.lane.b32.xlu1 %v2567_v16, %s4716_s14 }
 0x517   : > { %3333 = vrot.lane.b32.xlu0 %v2536_v9, %s4715_s30 }
 0x518   : > { %v3568_v5 = vpop.permute.xlu1 %3567 }
 0x519   : > { %v3869_v57 = vsel %vm1880_vm10, %v3837_v14, %v3568_v5  ;;  %v3442_v0 = vpop.permute.xlu0 %3441 }
 0x51a   : > { %3079 = vrot.lane.b32.xlu1 %v2567_v16, %s4713_s28  ;;  %4615 = vmatprep.mubr.msk.f32.mxu1 %vm1920_vm11, %v3869_v57  ;;  %v3838_v54 = vsel %vm1847_vm9, %v3806_v29, %v3442_v0  ;;  %v3712_v16 = vsel %vm1715_vm5, %v3680_v40, %v7483_v52  ;;  %v7547_v52 = vld [vmem:[%s7809_s4] ss:$0 sm:$0xff]  ;;  %v4700_v29 = vld [vmem:[#allocation2 + $0x108] sm:$0xff] }
 0x51b   : > { %2953 = vrot.lane.b32.xlu0 %v2536_v9, %s4712_s27 }
 0x51c   : > { %v3188_v32 = vpop.permute.xlu1 %3187 }
 0x51d   : > { %v3062_v30 = vpop.permute.xlu0 %3061  ;;  %v3775_v18 = vsel %vm1781_vm7, %v3743_v33, %v3188_v32 }
 0x51e   : > { %3587 = vrot.lane.b32.xlu1 %v2599_v45, %s4717_s17  ;;  %v3744_v9 = vsel %vm1748_vm6, %v3712_v16, %v3062_v30 }
 0x51f   : > { %3461 = vrot.lane.b32.xlu0 %v2568_v13, %s4716_s14 }
 0x520   : > { %v3190_v19 = vpop.permute.xlu1 %3189 }
 0x521   : > { %v3570_v42 = vpop.permute.xlu0 %3569  ;;  %v3776_v1 = vsel %vm1781_vm7, %v3744_v9, %v3190_v19  ;;  %v8395_v19 = vld [vmem:[#allocation86_spill] sm:$0xff] }
 0x522   : > { %v3870_v50 = vsel %vm1880_vm10, %v3838_v54, %v3570_v42  ;;  %3207 = vrot.lane.b32.xlu1 %v2599_v45, %s4714_s29  ;;  %v3649_v54 = vsel %vm257_vm0, %v4700_v29, %v8395_v19  ;;  %v8404_v29 = vld [vmem:[#allocation94_spill] sm:$0xff] }
 0x523   : > { %3081 = vrot.lane.b32.xlu0 %v2568_v13, %s4713_s28  ;;  %4616 = vmatmul.mubr.msk.f32.gmra.mrb[18].mxu1 %vm1920_vm11, %v3870_v50  ;;  %v8396_v50 = vld [vmem:[#allocation169_spill] sm:$0xff] }
 0x524   : > { %v7510_v44 = vpop.permute.xlu1 %2935 }
 0x525   : > { %v3316_v23 = vpop.permute.xlu0 %3315 }
 0x526   : > { %3209 = vrot.lane.b32.xlu1 %v2506_v6, %s4714_s29  ;;  %v3807_v8 = vsel %vm1814_vm8, %v3775_v18, %v3316_v23  ;;  %v3681_v23 = vsel %vm1682_vm4, %v3649_v54, %v8396_v50 }
 0x527   : > { %3589 = vrot.lane.b32.xlu0 %v2506_v6, %s4717_s17 }
 0x528   : > { %v3444_v48 = vpop.permute.xlu1 %3443 }
 0x529   : > { %v3318_v49 = vpop.permute.xlu0 %3317  ;;  %v3839_v60 = vsel %vm1847_vm9, %v3807_v8, %v3444_v48 }
 0x52a   : > { %3337 = vrot.lane.b32.xlu1 %v2538_v35, %s4715_s30  ;;  %v3808_v14 = vsel %vm1814_vm8, %v3776_v1, %v3318_v49  ;;  %v3713_v35 = vsel %vm1715_vm5, %v3681_v23, %v7510_v44  ;;  %v8397_v44 = vld [vmem:[#allocation165_spill] sm:$0xff] }
 0x52b   : > { %3335 = vrot.lane.b32.xlu0 %v2537_v59, %s4715_s30  ;;  %v3650_v4 = vsel %vm257_vm0, %v7254_v11, %v8397_v44 }
 0x52c   : > { %v3064_v37 = vpop.permute.xlu1 %3063 }
 0x52d   : > { %v2938_v20 = vpop.permute.xlu0 %2937  ;;  %v3745_v59 = vsel %vm1748_vm6, %v3713_v35, %v3064_v37  ;;  %v3682_v37 = vsel %vm1682_vm4, %v3650_v4, %v8398_v15 }
 0x52e   : > { %3465 = vrot.lane.b32.xlu1 %v2570_v56, %s4716_s14  ;;  %v3714_v33 = vsel %vm1715_vm5, %v3682_v37, %v2938_v20 }
 0x52f   : > { %3463 = vrot.lane.b32.xlu0 %v2569_v62, %s4716_s14 }
 0x530   : > { %v3572_v55 = vpop.permute.xlu1 %3571 }
 0x531   : > { %v3871_v21 = vsel %vm1880_vm10, %v3839_v60, %v3572_v55  ;;  %v3446_v12 = vpop.permute.xlu0 %3445 }
 0x532   : > { %3593 = vrot.lane.b32.xlu1 %v2602_v10, %s4717_s17  ;;  %4618 = vmatprep.mubr.msk.f32.mxu1 %vm1920_vm11, %v3871_v21  ;;  %v3840_v57 = vsel %vm1847_vm9, %v3808_v14, %v3446_v12 }
 0x533   : > { %3591 = vrot.lane.b32.xlu0 %v2601_v41, %s4717_s17 }
 0x534   : > { %v3192_v26 = vpop.permute.xlu1 %3191 }
 0x535   : > { %v3066_v25 = vpop.permute.xlu0 %3065  ;;  %v3777_v53 = vsel %vm1781_vm7, %v3745_v59, %v3192_v26  ;;  %v8400_v26 = vld [vmem:[#allocation4_spill] sm:$0xff] }
 0x536   : > { %v3746_v8 = vsel %vm1748_vm6, %v3714_v33, %v3066_v25 }
 0x538   : > { %v3194_v5 = vpop.permute.xlu1 %3193 }
 0x539   : > { %v3574_v0 = vpop.permute.xlu0 %3573  ;;  %v3778_v10 = vsel %vm1781_vm7, %v3746_v8, %v3194_v5 }
 0x53a   : > { %v3872_v27 = vsel %vm1880_vm10, %v3840_v57, %v3574_v0  ;;  %v8401_v57 = vld [vmem:[#allocation57_spill] sm:$0xff] }
 0x53b   : > { %4619 = vmatmul.mubr.msk.f32.gmra.mrb[20].mxu1 %vm1920_vm11, %v3872_v27  ;;  %v3651_v0 = vsel %vm257_vm0, %v7289_v34, %v8401_v57  ;;  %v8402_v27 = vld [vmem:[#allocation168_spill] sm:$0xff]  ;;  %v8410_v57 = vld [vmem:[#allocation65_spill] sm:$0xff] }
 0x53c   : > { %v2940_v31 = vpop.permute.xlu1 %2939  ;;  %v8403_v34 = vld [vmem:[#allocation164_spill] sm:$0xff] }
 0x53d   : > { %v4590_v46 = vpop.f32.mrb[0].mxu1  ;;  %v3320_v36 = vpop.permute.xlu0 %3319 }
 0x53e   : > { %v4061_v38 = vadd.f32 %v4590_v46, %v7547_v52  ;;  %v4055_v32 = vpop.f32.mrb[1].mxu1  ;;  %v3809_v17 = vsel %vm1814_vm8, %v3777_v53, %v3320_v36  ;;  %v3683_v46 = vsel %vm1682_vm4, %v3651_v0, %v8402_v27  ;;  %v8411_v27 = vld [vmem:[#allocation11_spill] sm:$0xff] }
 0x53f   : > { %v4056_v63 = vadd.f32 %v7547_v52, %v4055_v32  ;;  %v3715_v36 = vsel %vm1715_vm5, %v3683_v46, %v2940_v31  ;;  %v3652_v31 = vsel %vm257_vm0, %v7309_v58, %v8403_v34 }
 0x540   : > { %v4215_v30 = vadd.f32 %v4061_v38, %v8393_v47  ;;  %v3448_v45 = vpop.permute.xlu1 %3447  ;;  %v3684_v19 = vsel %vm1682_vm4, %v3652_v31, %v8404_v29 }
 0x541   : > { %v4214_v13 = vadd.f32 %v4056_v63, %v8394_v22  ;;  %v3322_v3 = vpop.permute.xlu0 %3321  ;;  %v3841_v51 = vsel %vm1847_vm9, %v3809_v17, %v3448_v45  ;;  %v8405_v17 = vld [vmem:[#allocation9_spill] sm:$0xff] }
 0x542   : > { %v4247_v42 = vmax.f32 %v4215_v30, 0.0  ;;  %v3810_v60 = vsel %vm1814_vm8, %v3778_v10, %v3322_v3  ;;  %v8407_v10 = vld [vmem:[#allocation55_spill] sm:$0xff] }
 0x543   : > { %v4246_v6 = vmax.f32 %v4214_v13, 0.0 }
 0x544   : > { %4279 = vst.msk [vmem:[%s7557_s12 + $0x8] sm:$0xff] %vm257_vm0, %v4247_v42  ;;  %v3068_v48 = vpop.permute.xlu1 %3067 }
 0x545   : > { %4278 = vst.msk [vmem:[%s7557_s12] sm:$0xff] %vm257_vm0, %v4246_v6  ;;  %v2942_v49 = vpop.permute.xlu0 %2941  ;;  %v3747_v32 = vsel %vm1748_vm6, %v3715_v36, %v3068_v48 }
 0x546   : > { %v3716_v42 = vsel %vm1715_vm5, %v3684_v19, %v2942_v49 }
 0x548   : > { %v3576_v7 = vpop.permute.xlu1 %3575 }
 0x549   : > { %v3873_v43 = vsel %vm1880_vm10, %v3841_v51, %v3576_v7  ;;  %v3450_v56 = vpop.permute.xlu0 %3449 }
 0x54a   : > { %4621 = vmatprep.mubr.msk.f32.mxu1 %vm1920_vm11, %v3873_v43  ;;  %v3842_v41 = vsel %vm1847_vm9, %v3810_v60, %v3450_v56  ;;  %v8406_v43 = vld [vmem:[#allocation6_spill] sm:$0xff]  ;;  %v3653_v60 = vsel %vm257_vm0, %v7347_v61, %v8407_v10 }
 0x54c   : > { %v3196_v62 = vpop.permute.xlu1 %3195 }
 0x54d   : > { %v3070_v18 = vpop.permute.xlu0 %3069  ;;  %v3779_v47 = vsel %vm1781_vm7, %v3747_v32, %v3196_v62  ;;  %v8412_v32 = vld [vmem:[#allocation8_spill] sm:$0xff] }
 0x54e   : > { %v3748_v6 = vsel %vm1748_vm6, %v3716_v42, %v3070_v18 }
 0x550   : > { %v3198_v55 = vpop.permute.xlu1 %3197 }
 0x551   : > { %v4593_v21 = vpop.f32.mrb[2].mxu1  ;;  %v3578_v11 = vpop.permute.xlu0 %3577  ;;  %v3780_v59 = vsel %vm1781_vm7, %v3748_v6, %v3198_v55  ;;  %v8408_v55 = vld [vmem:[#allocation112_spill] sm:$0xff] }
 0x552   : > { %v4071_v12 = vadd.f32 %v4593_v21, %v7547_v52  ;;  %v3874_v39 = vsel %vm1880_vm10, %v3842_v41, %v3578_v11  ;;  %v4065_v24 = vpop.f32.mrb[3].mxu1  ;;  %v3685_v41 = vsel %vm1682_vm4, %v3653_v60, %v8408_v55 }
 0x553   : > { %v4066_v20 = vadd.f32 %v7547_v52, %v4065_v24  ;;  %4622 = vmatmul.mubr.msk.f32.gmra.mrb[22].mxu1 %vm1920_vm11, %v3874_v39 }
 0x554   : > { %v4217_v2 = vadd.f32 %v4071_v12, %v8399_v28  ;;  %v2944_v40 = vpop.permute.xlu1 %2943 }
 0x555   : > { %v4216_v16 = vadd.f32 %v4066_v20, %v8400_v26  ;;  %v3324_v25 = vpop.permute.xlu0 %3323  ;;  %v3717_v21 = vsel %vm1715_vm5, %v3685_v41, %v2944_v40  ;;  %v2344_v41 = vld [vmem:[#allocation2 + $0x158] sm:$0xff] }
 0x556   : > { %v4249_v9 = vmax.f32 %v4217_v2, 0.0  ;;  %v3811_v30 = vsel %vm1814_vm8, %v3779_v47, %v3324_v25  ;;  %v2342_v25 = vld [vmem:[#allocation2 + $0x140] sm:$0xff] }
 0x557   : > { %v4248_v1 = vmax.f32 %v4216_v16, 0.0 }
 0x558   : > { %4281 = vst.msk [vmem:[%s7557_s12 + $0x18] sm:$0xff] %vm257_vm0, %v4249_v9  ;;  %v3452_v14 = vpop.permute.xlu1 %3451 }
 0x559   : > { %4280 = vst.msk [vmem:[%s7557_s12 + $0x10] sm:$0xff] %vm257_vm0, %v4248_v1  ;;  %v3326_v5 = vpop.permute.xlu0 %3325  ;;  %v3843_v45 = vsel %vm1847_vm9, %v3811_v30, %v3452_v14  ;;  %v8409_v1 = vld [vmem:[#allocation108_spill] sm:$0xff] }
 0x55a   : > { %v3812_v58 = vsel %vm1814_vm8, %v3780_v59, %v3326_v5  ;;  %v3654_v14 = vsel %vm257_vm0, %v2342_v25, %v8409_v1  ;;  %v8414_v59 = vld [vmem:[#allocation133_spill] sm:$0xff] }
 0x55b   : > { %v3686_v0 = vsel %vm1682_vm4, %v3654_v14, %v8410_v57 }
 0x55c   : > { %v3072_v38 = vpop.permute.xlu1 %3071 }
 0x55d   : > { %v2946_v63 = vpop.permute.xlu0 %2945  ;;  %v3749_v12 = vsel %vm1748_vm6, %v3717_v21, %v3072_v38 }
 0x55e   : > { %v3718_v38 = vsel %vm1715_vm5, %v3686_v0, %v2946_v63 }
 0x560   : > { %v3580_v22 = vpop.permute.xlu1 %3579 }
 0x561   : > { %v3875_v13 = vsel %vm1880_vm10, %v3843_v45, %v3580_v22  ;;  %v3454_v3 = vpop.permute.xlu0 %3453 }
 0x562   : > { %4624 = vmatprep.mubr.msk.f32.mxu1 %vm1920_vm11, %v3875_v13  ;;  %v3844_v49 = vsel %vm1847_vm9, %v3812_v58, %v3454_v3 }
 0x564   : > { %v3200_v54 = vpop.permute.xlu1 %3199 }
 0x565   : > { %v3074_v50 = vpop.permute.xlu0 %3073  ;;  %v4596_v23 = vpop.f32.mrb[4].mxu1  ;;  %v3781_v24 = vsel %vm1781_vm7, %v3749_v12, %v3200_v54 }
 0x566   : > { %v4081_v35 = vadd.f32 %v4596_v23, %v7547_v52  ;;  %v4075_v48 = vpop.f32.mrb[5].mxu1  ;;  %v3750_v45 = vsel %vm1748_vm6, %v3718_v38, %v3074_v50  ;;  %v2343_v23 = vld [vmem:[#allocation2 + $0x150] sm:$0xff]  ;;  %v8420_v38 = vld [vmem:[#allocation41_spill] sm:$0xff] }
 0x567   : > { %v4076_v53 = vadd.f32 %v7547_v52, %v4075_v48 }
 0x568   : > { %v4219_v51 = vadd.f32 %v4081_v35, %v8405_v17  ;;  %v3202_v7 = vpop.permute.xlu1 %3201  ;;  %v8413_v35 = vld [vmem:[#allocation107_spill] sm:$0xff] }
 0x569   : > { %v4218_v56 = vadd.f32 %v4076_v53, %v8406_v43  ;;  %v3582_v44 = vpop.permute.xlu0 %3581  ;;  %v3782_v13 = vsel %vm1781_vm7, %v3750_v45, %v3202_v7  ;;  %v3655_v48 = vsel %vm257_vm0, %v2343_v23, %v8413_v35 }
 0x56a   : > { %v4251_v4 = vmax.f32 %v4219_v51, 0.0  ;;  %v3876_v15 = vsel %vm1880_vm10, %v3844_v49, %v3582_v44  ;;  %v3687_v53 = vsel %vm1682_vm4, %v3655_v48, %v8414_v59  ;;  %v8423_v48 = vld [vmem:[#allocation15_spill] sm:$0xff] }
 0x56b   : > { %v4250_v37 = vmax.f32 %v4218_v56, 0.0  ;;  %4625 = vmatmul.mubr.msk.f32.gmra.mrb[24].mxu1 %vm1920_vm11, %v3876_v15 }
 0x56c   : > { %4283 = vst.msk [vmem:[%s7557_s12 + $0x28] sm:$0xff] %vm257_vm0, %v4251_v4  ;;  %v2948_v62 = vpop.permute.xlu1 %2947 }
 0x56d   : > { %4282 = vst.msk [vmem:[%s7557_s12 + $0x20] sm:$0xff] %vm257_vm0, %v4250_v37  ;;  %v3328_v33 = vpop.permute.xlu0 %3327  ;;  %v3719_v58 = vsel %vm1715_vm5, %v3687_v53, %v2948_v62 }
 0x56e   : > { %v3813_v20 = vsel %vm1814_vm8, %v3781_v24, %v3328_v33  ;;  %v8415_v33 = vld [vmem:[#allocation13_spill] sm:$0xff] }
 0x570   : > { %v3456_v18 = vpop.permute.xlu1 %3455 }
 0x571   : > { %v3330_v8 = vpop.permute.xlu0 %3329  ;;  %v3845_v28 = vsel %vm1847_vm9, %v3813_v20, %v3456_v18  ;;  %v8418_v20 = vld [vmem:[#allocation63_spill] sm:$0xff] }
 0x572   : > { %v3814_v34 = vsel %vm1814_vm8, %v3782_v13, %v3330_v8  ;;  %v8416_v8 = vld [vmem:[#allocation10_spill] sm:$0xff] }
 0x574   : > { %v3076_v11 = vpop.permute.xlu1 %3075 }
 0x575   : > { %v7635_v39 = vpop.permute.xlu0 %2949  ;;  %v3751_v51 = vsel %vm1748_vm6, %v3719_v58, %v3076_v11  ;;  %v8417_v11 = vld [vmem:[#allocation129_spill] sm:$0xff] }
 0x576   : > { %v3656_v12 = vsel %vm257_vm0, %v2344_v41, %v8417_v11 }
 0x578   : > { %v3584_v2 = vpop.permute.xlu1 %3583 }
 0x579   : > { %v3877_v26 = vsel %vm1880_vm10, %v3845_v28, %v3584_v2  ;;  %v3458_v61 = vpop.permute.xlu0 %3457  ;;  %v4599_v16 = vpop.f32.mrb[6].mxu1  ;;  %v3688_v28 = vsel %vm1682_vm4, %v3656_v12, %v8418_v20 }
 0x57a   : > { %v4091_v9 = vadd.f32 %v4599_v16, %v7547_v52  ;;  %v4085_v40 = vpop.f32.mrb[7].mxu1  ;;  %4627 = vmatprep.mubr.msk.f32.mxu1 %vm1920_vm11, %v3877_v26  ;;  %v3846_v29 = vsel %vm1847_vm9, %v3814_v34, %v3458_v61  ;;  %v3720_v26 = vsel %vm1715_vm5, %v3688_v28, %v7635_v39  ;;  %v2345_v39 = vld [vmem:[#allocation2 + $0x168] sm:$0xff]  ;;  %v8427_v28 = vld [vmem:[#allocation19_spill] sm:$0xff] }
 0x57b   : > { %v4086_v5 = vadd.f32 %v7547_v52, %v4085_v40 }
 0x57c   : > { %v4221_v46 = vadd.f32 %v4091_v9, %v8411_v27  ;;  %v3204_v36 = vpop.permute.xlu1 %3203  ;;  %v2346_v27 = vld [vmem:[#allocation2 + $0x170] sm:$0xff] }
 0x57d   : > { %v4220_v47 = vadd.f32 %v4086_v5, %v8412_v32  ;;  %v3078_v30 = vpop.permute.xlu0 %3077  ;;  %v3783_v43 = vsel %vm1781_vm7, %v3751_v51, %v3204_v36  ;;  %v3658_v32 = vsel %vm257_vm0, %v2346_v27, %v8420_v38  ;;  %v8424_v51 = vld [vmem:[#allocation12_spill] sm:$0xff] }
 0x57e   : > { %v4253_v22 = vmax.f32 %v4221_v46, 0.0  ;;  %v3752_v16 = vsel %vm1748_vm6, %v3720_v26, %v3078_v30  ;;  %v8419_v46 = vld [vmem:[#allocation128_spill] sm:$0xff] }
 0x57f   : > { %v4252_v3 = vmax.f32 %v4220_v47, 0.0  ;;  %v3657_v36 = vsel %vm257_vm0, %v2345_v39, %v8419_v46  ;;  %v8421_v47 = vld [vmem:[#allocation54_spill] sm:$0xff]  ;;  %v8428_v26 = vld [vmem:[#allocation16_spill] sm:$0xff] }
 0x580   : > { %4285 = vst.msk [vmem:[%s7557_s12 + $0x38] sm:$0xff] %vm257_vm0, %v4253_v22  ;;  %v3206_v31 = vpop.permute.xlu1 %3205  ;;  %v3689_v30 = vsel %vm1682_vm4, %v3657_v36, %v8421_v47  ;;  %v8422_v22 = vld [vmem:[#allocation111_spill] sm:$0xff] }
 0x581   : > { %4284 = vst.msk [vmem:[%s7557_s12 + $0x30] sm:$0xff] %vm257_vm0, %v4252_v3  ;;  %v3586_v19 = vpop.permute.xlu0 %3585  ;;  %v3784_v25 = vsel %vm1781_vm7, %v3752_v16, %v3206_v31  ;;  %v3690_v13 = vsel %vm1682_vm4, %v3658_v32, %v8422_v22  ;;  %v8432_v22 = vld [vmem:[#allocation20_spill] sm:$0xff] }
 0x582   : > { %v3878_v63 = vsel %vm1880_vm10, %v3846_v29, %v3586_v19 }
 0x583   : > { %4628 = vmatmul.mubr.msk.f32.gmra.mrb[26].mxu1 %vm1920_vm11, %v3878_v63 }
 0x584   : > { %v2952_v54 = vpop.permute.xlu1 %2951 }
 0x585   : > { %v3332_v42 = vpop.permute.xlu0 %3331  ;;  %v3721_v3 = vsel %vm1715_vm5, %v3689_v30, %v2952_v54  ;;  %v8431_v30 = vld [vmem:[#allocation23_spill] sm:$0xff] }
 0x586   : > { %v3815_v4 = vsel %vm1814_vm8, %v3783_v43, %v3332_v42 }
 0x588   : > { %v3460_v50 = vpop.permute.xlu1 %3459 }
 0x589   : > { %v3334_v6 = vpop.permute.xlu0 %3333  ;;  %v3847_v37 = vsel %vm1847_vm9, %v3815_v4, %v3460_v50 }
 0x58a   : > { %v3816_v9 = vsel %vm1814_vm8, %v3784_v25, %v3334_v6 }
 0x58c   : > { %v3080_v17 = vpop.permute.xlu1 %3079 }
 0x58d   : > { %v2954_v7 = vpop.permute.xlu0 %2953  ;;  %v4602_v49 = vpop.f32.mrb[8].mxu1  ;;  %v3753_v29 = vsel %vm1748_vm6, %v3721_v3, %v3080_v17 }
 0x58e   : > { %v4101_v56 = vadd.f32 %v4602_v49, %v7547_v52  ;;  %v4095_v44 = vpop.f32.mrb[9].mxu1  ;;  %v3722_v19 = vsel %vm1715_vm5, %v3690_v13, %v2954_v7 }
 0x58f   : > { %v4096_v15 = vadd.f32 %v7547_v52, %v4095_v44 }
 0x590   : > { %v4223_v62 = vadd.f32 %v4101_v56, %v8415_v33  ;;  %v3588_v18 = vpop.permute.xlu1 %3587 }
 0x591   : > { %v4222_v10 = vadd.f32 %v4096_v15, %v8416_v8  ;;  %v3879_v60 = vsel %vm1880_vm10, %v3847_v37, %v3588_v18  ;;  %v3462_v55 = vpop.permute.xlu0 %3461  ;;  %v8425_v8 = vld [vmem:[#allocation17_spill] sm:$0xff] }
 0x592   : > { %v4255_v21 = vmax.f32 %v4223_v62, 0.0  ;;  %4630 = vmatprep.mubr.msk.f32.mxu1 %vm1920_vm11, %v3879_v60  ;;  %v3848_v1 = vsel %vm1847_vm9, %v3816_v9, %v3462_v55  ;;  %v8426_v60 = vld [vmem:[#allocation14_spill] sm:$0xff] }
 0x593   : > { %v4254_v24 = vmax.f32 %v4222_v10, 0.0 }
 0x594   : > { %4287 = vst.msk [vmem:[%s7557_s12 + $0x48] sm:$0xff] %vm257_vm0, %v4255_v21  ;;  %v3208_v2 = vpop.permute.xlu1 %3207 }
 0x595   : > { %4286 = vst.msk [vmem:[%s7557_s12 + $0x40] sm:$0xff] %vm257_vm0, %v4254_v24  ;;  %v3082_v61 = vpop.permute.xlu0 %3081  ;;  %v3785_v50 = vsel %vm1781_vm7, %v3753_v29, %v3208_v2 }
 0x596   : > { %v3754_v23 = vsel %vm1748_vm6, %v3722_v19, %v3082_v61 }
 0x598   : > { %v3210_v40 = vpop.permute.xlu1 %3209 }
 0x599   : > { %v3590_v14 = vpop.permute.xlu0 %3589  ;;  %v3786_v35 = vsel %vm1781_vm7, %v3754_v23, %v3210_v40  ;;  %v8434_v23 = vld [vmem:[#allocation22_spill] sm:$0xff] }
 0x59a   : > { %v3880_v5 = vsel %vm1880_vm10, %v3848_v1, %v3590_v14 }
 0x59b   : > { %4631 = vmatmul.mubr.msk.f32.gmra.mrb[28].mxu1 %vm1920_vm11, %v3880_v5  ;;  %v8429_v5 = vld [vmem:[#allocation21_spill] sm:$0xff] }
 0x59c   : > { %v3338_v57 = vpop.permute.xlu1 %3337 }
 0x59d   : > { %v3336_v0 = vpop.permute.xlu0 %3335  ;;  %v3818_v58 = vsel %vm1814_vm8, %v3786_v35, %v3338_v57 }
 0x59e   : > { %v3817_v54 = vsel %vm1814_vm8, %v3785_v50, %v3336_v0  ;;  %v8430_v0 = vld [vmem:[#allocation18_spill] sm:$0xff] }
 0x5a0   : > { %v3466_v45 = vpop.permute.xlu1 %3465 }
 0x5a1   : > { %v3464_v34 = vpop.permute.xlu0 %3463  ;;  %v4605_v31 = vpop.f32.mrb[10].mxu1  ;;  %v3850_v43 = vsel %vm1847_vm9, %v3818_v58, %v3466_v45 }
 0x5a2   : > { %v4111_v63 = vadd.f32 %v4605_v31, %v7547_v52  ;;  %v4105_v42 = vpop.f32.mrb[11].mxu1  ;;  %v3849_v17 = vsel %vm1847_vm9, %v3817_v54, %v3464_v34 }
 0x5a3   : > { %v4106_v6 = vadd.f32 %v7547_v52, %v4105_v42  ;;  %v8433_v42 = vld [vmem:[#allocation25_spill] sm:$0xff] }
 0x5a4   : > { %v4225_v59 = vadd.f32 %v4111_v63, %v8423_v48  ;;  %v3594_v53 = vpop.permute.xlu1 %3593 }
 0x5a5   : > { %v4224_v7 = vadd.f32 %v4106_v6, %v8424_v51  ;;  %v3592_v49 = vpop.permute.xlu0 %3591  ;;  %v3882_v15 = vsel %vm1880_vm10, %v3850_v43, %v3594_v53 }
 0x5a6   : > { %v4257_v56 = vmax.f32 %v4225_v59, 0.0  ;;  %v3881_v44 = vsel %vm1880_vm10, %v3849_v17, %v3592_v49  ;;  %v8435_v17 = vld [vmem:[#allocation27_spill] sm:$0xff] }
 0x5a7   : > { %v4256_v4 = vmax.f32 %v4224_v7, 0.0  ;;  %4633 = vmatprep.mubr.msk.f32.mxu1 %vm1920_vm11, %v3881_v44  ;;  %v8436_v7 = vld [vmem:[#allocation24_spill] sm:$0xff] }
 0x5a8   : > { %4289 = vst.msk [vmem:[%s7557_s12 + $0x58] sm:$0xff] %vm257_vm0, %v4257_v56  ;;  %4634 = vmatmul.mubr.msk.f32.gmra.mrb[30].mxu1 %vm1920_vm11, %v3882_v15 }
 0x5a9   : > { %4288 = vst.msk [vmem:[%s7557_s12 + $0x50] sm:$0xff] %vm257_vm0, %v4256_v4 }
 0x5b5   : > { %v4608_v37 = vpop.f32.mrb[12].mxu1 }
 0x5b6   : > { %v4121_v33 = vadd.f32 %v4608_v37, %v7547_v52  ;;  %v4115_v62 = vpop.f32.mrb[13].mxu1 }
 0x5b7   : > { %v4116_v18 = vadd.f32 %v7547_v52, %v4115_v62 }
 0x5b8   : > { %v4227_v10 = vadd.f32 %v4121_v33, %v8425_v8  ;;  %v8437_v33 = vld [vmem:[#allocation29_spill] sm:$0xff] }
 0x5b9   : > { %v4226_v55 = vadd.f32 %v4116_v18, %v8426_v60  ;;  %v8438_v18 = vld [vmem:[#allocation26_spill] sm:$0xff] }
 0x5ba   : > { %v4259_v41 = vmax.f32 %v4227_v10, 0.0 }
 0x5bb   : > { %v4258_v21 = vmax.f32 %v4226_v55, 0.0 }
 0x5bc   : > { %4291 = vst.msk [vmem:[%s7557_s12 + $0x68] sm:$0xff] %vm257_vm0, %v4259_v41 }
 0x5bd   : > { %4290 = vst.msk [vmem:[%s7557_s12 + $0x60] sm:$0xff] %vm257_vm0, %v4258_v21 }
 0x5c9   : > { %v4611_v11 = vpop.f32.mrb[14].mxu1 }
 0x5ca   : > { %v4131_v12 = vadd.f32 %v4611_v11, %v7547_v52  ;;  %v4125_v24 = vpop.f32.mrb[15].mxu1 }
 0x5cb   : > { %v4126_v20 = vadd.f32 %v7547_v52, %v4125_v24 }
 0x5cc   : > { %v4229_v2 = vadd.f32 %v4131_v12, %v8427_v28  ;;  %v8439_v12 = vld [vmem:[#allocation31_spill] sm:$0xff] }
 0x5cd   : > { %v4228_v61 = vadd.f32 %v4126_v20, %v8428_v26  ;;  %v8440_v20 = vld [vmem:[#allocation28_spill] sm:$0xff] }
 0x5ce   : > { %v4261_v16 = vmax.f32 %v4229_v2, 0.0 }
 0x5cf   : > { %v4260_v25 = vmax.f32 %v4228_v61, 0.0 }
 0x5d0   : > { %4293 = vst.msk [vmem:[%s7557_s12 + $0x78] sm:$0xff] %vm257_vm0, %v4261_v16 }
 0x5d1   : > { %4292 = vst.msk [vmem:[%s7557_s12 + $0x70] sm:$0xff] %vm257_vm0, %v4260_v25 }
 0x5dd   : > { %v4614_v9 = vpop.f32.mrb[16].mxu1 }
 0x5de   : > { %v4141_v40 = vadd.f32 %v4614_v9, %v7547_v52  ;;  %v4135_v1 = vpop.f32.mrb[17].mxu1 }
 0x5df   : > { %v4136_v14 = vadd.f32 %v7547_v52, %v4135_v1 }
 0x5e0   : > { %v4231_v57 = vadd.f32 %v4141_v40, %v8429_v5  ;;  %v8441_v40 = vld [vmem:[#allocation32_spill] sm:$0xff] }
 0x5e1   : > { %v4230_v39 = vadd.f32 %v4136_v14, %v8430_v0  ;;  %v8442_v14 = vld [vmem:[#allocation30_spill] sm:$0xff] }
 0x5e2   : > { %v4263_v27 = vmax.f32 %v4231_v57, 0.0 }
 0x5e3   : > { %v4262_v46 = vmax.f32 %v4230_v39, 0.0 }
 0x5e4   : > { %4295 = vst.msk [vmem:[%s7557_s12 + $0x88] sm:$0xff] %vm257_vm0, %v4263_v27 }
 0x5e5   : > { %4294 = vst.msk [vmem:[%s7557_s12 + $0x80] sm:$0xff] %vm257_vm0, %v4262_v46 }
 0x5f6   : > { %v4617_v36 = vpop.f32.mrb[18].mxu1 }
 0x5f7   : > { %v4151_v38 = vadd.f32 %v4617_v36, %v7547_v52  ;;  %v4145_v32 = vpop.f32.mrb[19].mxu1 }
 0x5f8   : > { %v4146_v47 = vadd.f32 %v7547_v52, %v4145_v32 }
 0x5f9   : > { %v4233_v45 = vadd.f32 %v4151_v38, %v8431_v30  ;;  %v8443_v38 = vld [vmem:[#allocation34_spill] sm:$0xff] }
 0x5fa   : > { %v4232_v13 = vadd.f32 %v4146_v47, %v8432_v22  ;;  %v8444_v47 = vld [vmem:[#allocation33_spill] sm:$0xff] }
 0x5fb   : > { %v4265_v3 = vmax.f32 %v4233_v45, 0.0 }
 0x5fc   : > { %v4264_v34 = vmax.f32 %v4232_v13, 0.0 }
 0x5fd   : > { %4297 = vst.msk [vmem:[%s7557_s12 + $0x98] sm:$0xff] %vm257_vm0, %v4265_v3 }
 0x5fe   : > { %4296 = vst.msk [vmem:[%s7557_s12 + $0x90] sm:$0xff] %vm257_vm0, %v4264_v34 }
 0x60e   : > { %v4620_v31 = vpop.f32.mrb[20].mxu1 }
 0x60f   : > { %v4161_v29 = vadd.f32 %v4620_v31, %v7547_v52  ;;  %v4155_v19 = vpop.f32.mrb[21].mxu1 }
 0x610   : > { %v4156_v63 = vadd.f32 %v7547_v52, %v4155_v19 }
 0x611   : > { %v4235_v50 = vadd.f32 %v4161_v29, %v8433_v42 }
 0x612   : > { %v4234_v6 = vadd.f32 %v4156_v63, %v8434_v23 }
 0x613   : > { %v4267_v35 = vmax.f32 %v4235_v50, 0.0 }
 0x614   : > { %v4266_v54 = vmax.f32 %v4234_v6, 0.0 }
 0x615   : > { %4299 = vst.msk [vmem:[%s7557_s12 + $0xa8] sm:$0xff] %vm257_vm0, %v4267_v35 }
 0x616   : > { %4298 = vst.msk [vmem:[%s7557_s12 + $0xa0] sm:$0xff] %vm257_vm0, %v4266_v54 }
 0x626   : > { %v4623_v48 = vpop.f32.mrb[22].mxu1 }
 0x627   : > { %v4171_v59 = vadd.f32 %v4623_v48, %v7547_v52  ;;  %v4165_v53 = vpop.f32.mrb[23].mxu1 }
 0x628   : > { %v4166_v58 = vadd.f32 %v7547_v52, %v4165_v53 }
 0x629   : > { %v4237_v51 = vadd.f32 %v4171_v59, %v8435_v17 }
 0x62a   : > { %v4236_v49 = vadd.f32 %v4166_v58, %v8436_v7 }
 0x62b   : > { %v4269_v43 = vmax.f32 %v4237_v51, 0.0 }
 0x62c   : > { %v4268_v56 = vmax.f32 %v4236_v49, 0.0 }
 0x62d   : > { %4301 = vst.msk [vmem:[%s7557_s12 + $0xb8] sm:$0xff] %vm257_vm0, %v4269_v43 }
 0x62e   : > { %4300 = vst.msk [vmem:[%s7557_s12 + $0xb0] sm:$0xff] %vm257_vm0, %v4268_v56 }
 0x63e   : > { %v4626_v44 = vpop.f32.mrb[24].mxu1 }
 0x63f   : > { %v4181_v4 = vadd.f32 %v4626_v44, %v7547_v52  ;;  %v4175_v15 = vpop.f32.mrb[25].mxu1 }
 0x640   : > { %v4176_v37 = vadd.f32 %v7547_v52, %v4175_v15 }
 0x641   : > { %v4239_v62 = vadd.f32 %v4181_v4, %v8437_v33 }
 0x642   : > { %v4238_v8 = vadd.f32 %v4176_v37, %v8438_v18 }
 0x643   : > { %v4271_v10 = vmax.f32 %v4239_v62, 0.0 }
 0x644   : > { %v4270_v60 = vmax.f32 %v4238_v8, 0.0 }
 0x645   : > { %4303 = vst.msk [vmem:[%s7557_s12 + $0xc8] sm:$0xff] %vm257_vm0, %v4271_v10 }
 0x646   : > { %4302 = vst.msk [vmem:[%s7557_s12 + $0xc0] sm:$0xff] %vm257_vm0, %v4270_v60 }
 0x656   : > { %v4629_v55 = vpop.f32.mrb[26].mxu1 }
 0x657   : > { %v4191_v41 = vadd.f32 %v4629_v55, %v7547_v52  ;;  %v4185_v21 = vpop.f32.mrb[27].mxu1 }
 0x658   : > { %v4186_v11 = vadd.f32 %v7547_v52, %v4185_v21 }
 0x659   : > { %v4241_v24 = vadd.f32 %v4191_v41, %v8439_v12 }
 0x65a   : > { %v4240_v28 = vadd.f32 %v4186_v11, %v8440_v20 }
 0x65b   : > { %v4273_v2 = vmax.f32 %v4241_v24, 0.0 }
 0x65c   : > { %v4272_v26 = vmax.f32 %v4240_v28, 0.0 }
 0x65d   : > { %4305 = vst.msk [vmem:[%s7557_s12 + $0xd8] sm:$0xff] %vm257_vm0, %v4273_v2 }
 0x65e   : > { %4304 = vst.msk [vmem:[%s7557_s12 + $0xd0] sm:$0xff] %vm257_vm0, %v4272_v26 }
 0x66e   : > { %v4632_v61 = vpop.f32.mrb[28].mxu1 }
 0x66f   : > { %v4201_v16 = vadd.f32 %v4632_v61, %v7547_v52  ;;  %v4195_v25 = vpop.f32.mrb[29].mxu1 }
 0x670   : > { %v4196_v9 = vadd.f32 %v7547_v52, %v4195_v25 }
 0x671   : > { %v4243_v1 = vadd.f32 %v4201_v16, %v8441_v40 }
 0x672   : > { %v4242_v5 = vadd.f32 %v4196_v9, %v8442_v14 }
 0x673   : > { %v4275_v57 = vmax.f32 %v4243_v1, 0.0 }
 0x674   : > { %v4274_v0 = vmax.f32 %v4242_v5, 0.0 }
 0x675   : > { %4307 = vst.msk [vmem:[%s7557_s12 + $0xe8] sm:$0xff] %vm257_vm0, %v4275_v57 }
 0x676   : > { %4306 = vst.msk [vmem:[%s7557_s12 + $0xe0] sm:$0xff] %vm257_vm0, %v4274_v0 }
 0x67b   : > { %v4635_v39 = vpop.f32.mrb[30].mxu1 }
 0x67c   : > { %v4211_v27 = vadd.f32 %v4635_v39, %v7547_v52  ;;  %v4205_v46 = vpop.f32.mrb[31].mxu1 }
 0x67d   : > { %v4206_v36 = vadd.f32 %v7547_v52, %v4205_v46 }
 0x67e   : > { %v4245_v32 = vadd.f32 %v4211_v27, %v8443_v38 }
 0x67f   : > { %v4244_v30 = vadd.f32 %v4206_v36, %v8444_v47 }
 0x680   : > { %v4277_v45 = vmax.f32 %v4245_v32, 0.0 }
 0x681   : > { %v4276_v22 = vmax.f32 %v4244_v30, 0.0 }
 0x682   : > { %4309 = vst.msk [vmem:[%s7557_s12 + $0xf8] sm:$0xff] %vm257_vm0, %v4277_v45 }
 0x683   : > { %4308 = vst.msk [vmem:[%s7557_s12 + $0xf0] sm:$0xff] %vm257_vm0, %v4276_v22 }
 0x684 PF: > { %s15_s18 = sadd.s32 1, %s4707_s18  }
 0x685   : > { %p12_p4 = scmp.ge.s32.totalorder %s15_s18, 4  }
 0x687   :  { %14 = sbr.rel (!%p12_p4) target bundleno = 1 (0x1), region = 73 }

</bundles_post_ra>
